<compile_context>
chip_gen: v7x
topology: tpu7x:2x2x1
jax: 0.10.0
libtpu: 0.0.40
codegen_flags: <defaults>
</compile_context>

<pallas_src>
import functools

import jax
import jax.numpy as jnp
import numpy as np
from jax.experimental import pallas as pl
from jax.experimental.pallas import tpu as pltpu


_NB_CAP = 64   # max images per grid block (multiple of 8); ~7 MB VMEM peak


def _pick_batch_block(n):
    """Images per grid step: multiple of 8, >=2 blocks when possible (v7x)."""
    n8 = ((n + 7) // 8) * 8
    if n8 < 16:
        return n8                      # can't split below the 8-row sublane tile
    half = (((n8 + 1) // 2) + 7) // 8 * 8
    return min(half, _NB_CAP)


# ----------------------------------------------------------------------------
# Fused whole-network kernel
# ----------------------------------------------------------------------------
def _net_kernel(x_ref, w1_ref, b1_ref, w2_ref, b2_ref,
                wf1_ref, bf1_ref, wf2_ref, bf2_ref, wf3_ref, bf3_ref,
                o_ref, *, nb):
    """Forward pass for one batch block of `nb` images (nb % 8 == 0).

    x_ref  : (32*nb, 96)  rows ordered (r = h%4, q = h//4, image n); lanes = w*3+ic
    w1_ref : (10, 96, 84) conv1 Toeplitz matrices, index pj*5+ki; out lanes px*6+oc
    w2_ref : (10, 84, 80) conv2 Toeplitz matrices, index pj2*5+ki2; out lanes px2*16+oc
    wf1_ref: (5, 80, 128) fc1 split per conv2-pooled row h2 (PyTorch flatten folded in)
    o_ref  : (nb, 128)    lane-padded logits
    """
    f32 = jnp.float32
    xf = x_ref[...]                                              # (32*nb, 96)

    # ---- conv1 + bias + ReLU + 2x2/2 maxpool (stays in VMEM) --------------
    # o1[(s, pi, pj)][u*nb+n, px*6+oc] = pre-bias conv1 output at
    #   row y = 2*(2u+s)+pi, column x = 2*px+pj.  Input row h = 4u + (2s+pi+ki).
    o1 = {}
    for pj in range(2):
        for ki in range(5):
            y = jnp.dot(xf, w1_ref[pj * 5 + ki], preferred_element_type=f32)
            for s in range(2):
                for pi in range(2):
                    t = 2 * s + pi + ki
                    a = ((t % 4) * 8 + t // 4) * nb      # 8-aligned row offset
                    term = y[a:a + 7 * nb]               # (7*nb, 84)
                    key = (s, pi, pj)
                    o1[key] = term if key not in o1 else o1[key] + term
    p1 = []
    for s in range(2):
        m = jnp.maximum(jnp.maximum(o1[(s, 0, 0)], o1[(s, 0, 1)]),
                        jnp.maximum(o1[(s, 1, 0)], o1[(s, 1, 1)]))
        # max(relu(z+b)) == relu(max(z)+b): bias shared, relu monotone
        p1.append(jnp.maximum(m + b1_ref[...], 0.0))     # (7*nb, 84)

    # ---- conv2 + bias + ReLU + 2x2/2 maxpool -------------------------------
    o2 = {}
    for pj2 in range(2):
        for ki2 in range(5):
            for s in range(2):
                z = jnp.dot(p1[s], w2_ref[pj2 * 5 + ki2],
                            preferred_element_type=f32)   # (7*nb, 80)
                pi2 = (s + ki2) % 2
                off = (pi2 + ki2) // 2
                term = z[off * nb:off * nb + 5 * nb]      # (5*nb, 80)
                key = (pi2, pj2)
                o2[key] = term if key not in o2 else o2[key] + term
    p2 = jnp.maximum(jnp.maximum(o2[(0, 0)], o2[(0, 1)]),
                     jnp.maximum(o2[(1, 0)], o2[(1, 1)]))
    p2 = jnp.maximum(p2 + b2_ref[...], 0.0)               # (5*nb, 80), rows (h2, n)

    # ---- fc1 + ReLU -> fc2 + ReLU -> fc3 (128-lane dense) ------------------
    h = jnp.dot(p2[0:nb], wf1_ref[0], preferred_element_type=f32)
    for r in range(1, 5):
        h = h + jnp.dot(p2[r * nb:(r + 1) * nb], wf1_ref[r],
                        preferred_element_type=f32)
    h = jnp.maximum(h + bf1_ref[...], 0.0)
    h = jnp.maximum(jnp.dot(h, wf2_ref[...], preferred_element_type=f32)
                    + bf2_ref[...], 0.0)
    h = jnp.dot(h, wf3_ref[...], preferred_element_type=f32) + bf3_ref[...]
    o_ref[...] = h.astype(o_ref.dtype)


def _lenet_pallas(prepped, x_nhwc, nb):
    """x_nhwc: (N_pad, 32, 32, 3) with N_pad % nb == 0 -> (N_pad, 128) logits."""
    n_pad = x_nhwc.shape[0]
    n_blk = n_pad // nb
    # Rows ordered (block, h%4, h//4, image) so every in-kernel pooling /
    # shift slice is a contiguous, 8-aligned sublane slice; lanes = (w, ic).
    xs = (x_nhwc.reshape(n_blk, nb, 8, 4, 96)
          .transpose(0, 3, 2, 1, 4)
          .reshape(n_blk * 32 * nb, 96))
    operands = (xs,
                prepped["w1"], prepped["b1"], prepped["w2"], prepped["b2"],
                prepped["wf1"], prepped["bf1"], prepped["wf2"], prepped["bf2"],
                prepped["wf3"], prepped["bf3"])

    def _resident(a):  # whole-array block, constant index_map -> stays in VMEM
        nd = a.ndim
        return pl.BlockSpec(a.shape, lambda b: (0,) * nd)

    return pl.pallas_call(
        functools.partial(_net_kernel, nb=nb),
        out_shape=jax.ShapeDtypeStruct((n_pad, 128), jnp.float32),
        grid=(n_blk,),
        in_specs=[pl.BlockSpec((32 * nb, 96), lambda b: (b, 0))]
                 + [_resident(a) for a in operands[1:]],
        out_specs=pl.BlockSpec((nb, 128), lambda b: (b, 0)),
        compiler_params=pltpu.CompilerParams(
            dimension_semantics=("parallel",)),
    )(*operands)


# ----------------------------------------------------------------------------
# Parameters
# ----------------------------------------------------------------------------
def init_params(key):
    """Deterministic parameter init (PyTorch `Net.__init__` shapes/layout)."""
    def uniform(key, shape, fan_in):
        bound = 1.0 / jnp.sqrt(fan_in)
        return jax.random.uniform(key, shape, jnp.float32, -bound, bound)

    keys = jax.random.split(key, 10)
    return {
        "conv1_w": uniform(keys[0], (6, 3, 5, 5), 3 * 5 * 5),
        "conv1_b": uniform(keys[1], (6,), 3 * 5 * 5),
        "conv2_w": uniform(keys[2], (16, 6, 5, 5), 6 * 5 * 5),
        "conv2_b": uniform(keys[3], (16,), 6 * 5 * 5),
        "fc1_w": uniform(keys[4], (400, 120), 400),   # stored (in, out)
        "fc1_b": uniform(keys[5], (120,), 400),
        "fc2_w": uniform(keys[6], (120, 84), 120),
        "fc2_b": uniform(keys[7], (84,), 120),
        "fc3_w": uniform(keys[8], (84, 10), 84),
        "fc3_b": uniform(keys[9], (10,), 84),
    }


def prepare_params(params):
    """One-time weight prep (outside the jit hot path).

    Convs are lowered to Toeplitz matmul matrices whose input lanes are
    (column, in-channel) and output lanes are (pooled column, out-channel),
    one matrix per (pool x-phase pj, kernel row ki).  fc1 is split per
    conv2-pooled row with PyTorch's (C,H,W) flatten folded into the row
    permutation; fc weights/biases are zero-padded to 128 lanes (exact).
    """
    def conv_toeplitz(w, in_w):
        oc, ic, kh, kw = w.shape
        n_px = (in_w - kw + 1) // 2
        m = np.zeros((2, kh, in_w * ic, n_px * oc), np.float32)
        for pj in range(2):
            for ki in range(kh):
                for px in range(n_px):
                    for kj in range(kw):
                        wi = 2 * px + pj + kj
                        m[pj, ki, wi * ic:(wi + 1) * ic,
                          px * oc:(px + 1) * oc] = w[:, :, ki, kj].T
        return jnp.asarray(m.reshape(2 * kh, in_w * ic, n_px * oc))

    c1 = np.asarray(params["conv1_w"], np.float32)
    c2 = np.asarray(params["conv2_w"], np.float32)
    w1 = conv_toeplitz(c1, 32)                        # (10, 96, 84)
    w2 = conv_toeplitz(c2, 14)                        # (10, 84, 80)
    b1 = jnp.asarray(np.tile(np.asarray(params["conv1_b"], np.float32),
                             14).reshape(1, 84))
    b2 = jnp.asarray(np.tile(np.asarray(params["conv2_b"], np.float32),
                             5).reshape(1, 80))

    f1 = np.asarray(params["fc1_w"], np.float32)      # (400, 120)
    wf1 = np.zeros((5, 80, 128), np.float32)
    for h in range(5):
        for w_ in range(5):
            for c in range(16):
                # P2 lane = w_*16 + c ; PyTorch flat index = c*25 + h*5 + w_
                wf1[h, w_ * 16 + c, :120] = f1[c * 25 + h * 5 + w_, :]
    bf1 = np.zeros((1, 128), np.float32)
    bf1[0, :120] = np.asarray(params["fc1_b"], np.float32)
    wf2 = np.zeros((128, 128), np.float32)
    wf2[:120, :84] = np.asarray(params["fc2_w"], np.float32)
    bf2 = np.zeros((1, 128), np.float32)
    bf2[0, :84] = np.asarray(params["fc2_b"], np.float32)
    wf3 = np.zeros((128, 128), np.float32)
    wf3[:84, :10] = np.asarray(params["fc3_w"], np.float32)
    bf3 = np.zeros((1, 128), np.float32)
    bf3[0, :10] = np.asarray(params["fc3_b"], np.float32)

    return {"w1": w1, "b1": b1, "w2": w2, "b2": b2,
            "wf1": jnp.asarray(wf1), "bf1": jnp.asarray(bf1),
            "wf2": jnp.asarray(wf2), "bf2": jnp.asarray(bf2),
            "wf3": jnp.asarray(wf3), "bf3": jnp.asarray(bf3)}


# ----------------------------------------------------------------------------
# Full Net forward
# ----------------------------------------------------------------------------
@jax.jit
def net_forward(prepped, x_nchw):
    """x_nchw: (N, 3, 32, 32) f32 -> logits (N, 10) f32."""
    n = x_nchw.shape[0]
    nb = _pick_batch_block(n)
    n_pad = ((n + nb - 1) // nb) * nb
    # TODO(synk): this input-layout transpose (12 KB/img) is the only XLA-side
    # data movement left; folding it into the kernel would need an in-kernel
    # NCHW -> (w,c)-lane relayout that Mosaic doesn't lower cleanly.
    x = jnp.transpose(x_nchw, (0, 2, 3, 1))           # (N, 32, 32, 3)
    if n_pad != n:
        x = jnp.pad(x, ((0, n_pad - n), (0, 0), (0, 0), (0, 0)))
    logits = _lenet_pallas(prepped, x, nb)
    return logits[:n, :10]


# ----------------------------------------------------------------------------
# Pure-JAX reference (correctness check against the PyTorch semantics)
# ----------------------------------------------------------------------------
def reference_forward(params, x_nchw):
    hi = jax.lax.Precision.HIGHEST

    def conv(x, w, b):
        y = jax.lax.conv_general_dilated(
            x, w, window_strides=(1, 1), padding="VALID",
            dimension_numbers=("NCHW", "OIHW", "NCHW"), precision=hi)
        return jax.nn.relu(y + b[None, :, None, None])

    def pool(x):  # NCHW 2x2/2 maxpool
        return jnp.maximum(
            jnp.maximum(x[:, :, 0::2, 0::2], x[:, :, 0::2, 1::2]),
            jnp.maximum(x[:, :, 1::2, 0::2], x[:, :, 1::2, 1::2]))

    x = pool(conv(x_nchw, params["conv1_w"], params["conv1_b"]))
    x = pool(conv(x, params["conv2_w"], params["conv2_b"]))
    x = x.reshape(x.shape[0], -1)                    # PyTorch (C,H,W) flatten
    x = jax.nn.relu(jnp.dot(x, params["fc1_w"], precision=hi) + params["fc1_b"])
    x = jax.nn.relu(jnp.dot(x, params["fc2_w"], precision=hi) + params["fc2_b"])
    return jnp.dot(x, params["fc3_w"], precision=hi) + params["fc3_b"]


if __name__ == "__main__":
    key = jax.random.PRNGKey(0)
    pkey, xkey = jax.random.split(key)
    params = init_params(pkey)
    prepped = prepare_params(params)
    # input must be 32x32 spatial for the 16*5*5 flatten to hold
    x = jax.random.normal(xkey, (2, 3, 32, 32), jnp.float32)

    logits = net_forward(prepped, x)
    jax.block_until_ready(logits)
    assert logits.shape == (2, 10) and logits.dtype == jnp.float32

    ref = reference_forward(params, x)
    max_err = float(jnp.max(jnp.abs(logits - ref)))
    assert max_err < 1e-2, f"mismatch vs reference: max abs err {max_err}"

    print("KERNEL_OK")
</pallas_src>

<mosaic_0001>
module attributes {stable_mosaic.version = 11 : i64} {
  func.func @_net_kernel(%arg0: i32, %arg1: memref<256x96xf32, #tpu.memory_space<vmem>>, %arg2: memref<10x96x84xf32, #tpu.memory_space<vmem>>, %arg3: memref<1x84xf32, #tpu.memory_space<vmem>>, %arg4: memref<10x84x80xf32, #tpu.memory_space<vmem>>, %arg5: memref<1x80xf32, #tpu.memory_space<vmem>>, %arg6: memref<5x80x128xf32, #tpu.memory_space<vmem>>, %arg7: memref<1x128xf32, #tpu.memory_space<vmem>>, %arg8: memref<128x128xf32, #tpu.memory_space<vmem>>, %arg9: memref<1x128xf32, #tpu.memory_space<vmem>>, %arg10: memref<128x128xf32, #tpu.memory_space<vmem>>, %arg11: memref<1x128xf32, #tpu.memory_space<vmem>>, %arg12: memref<8x128xf32, #tpu.memory_space<vmem>>) attributes {dimension_semantics = [#tpu.dimension_semantics<parallel>], iteration_bounds = array<i64: 1>, scalar_prefetch = 0 : i64, scratch_operands = 0 : i64, tpu.core_type = #tpu.core_type<tc>, window_params = [{transform_indices = @transform_0, window_bounds = array<i64: 256, 96>}, {pipeline_mode = #tpu.pipeline_mode<synchronous>, transform_indices = @transform_1, window_bounds = array<i64: 10, 96, 84>}, {pipeline_mode = #tpu.pipeline_mode<synchronous>, transform_indices = @transform_2, window_bounds = array<i64: 1, 84>}, {pipeline_mode = #tpu.pipeline_mode<synchronous>, transform_indices = @transform_3, window_bounds = array<i64: 10, 84, 80>}, {pipeline_mode = #tpu.pipeline_mode<synchronous>, transform_indices = @transform_4, window_bounds = array<i64: 1, 80>}, {pipeline_mode = #tpu.pipeline_mode<synchronous>, transform_indices = @transform_5, window_bounds = array<i64: 5, 80, 128>}, {pipeline_mode = #tpu.pipeline_mode<synchronous>, transform_indices = @transform_6, window_bounds = array<i64: 1, 128>}, {pipeline_mode = #tpu.pipeline_mode<synchronous>, transform_indices = @transform_7, window_bounds = array<i64: 128, 128>}, {pipeline_mode = #tpu.pipeline_mode<synchronous>, transform_indices = @transform_8, window_bounds = array<i64: 1, 128>}, {pipeline_mode = #tpu.pipeline_mode<synchronous>, transform_indices = @transform_9, window_bounds = array<i64: 128, 128>}, {pipeline_mode = #tpu.pipeline_mode<synchronous>, transform_indices = @transform_10, window_bounds = array<i64: 1, 128>}, {transform_indices = @transform_11, window_bounds = array<i64: 8, 128>}]} {
    %c0 = arith.constant 0 : index
    %c0_0 = arith.constant 0 : index
    %0 = vector.load %arg1[%c0, %c0_0] : memref<256x96xf32, #tpu.memory_space<vmem>>, vector<256x96xf32>
    %c0_1 = arith.constant 0 : index
    %c0_2 = arith.constant 0 : index
    %c0_3 = arith.constant 0 : index
    %1 = vector.load %arg2[%c0_1, %c0_2, %c0_3] : memref<10x96x84xf32, #tpu.memory_space<vmem>>, vector<1x96x84xf32>
    %2 = vector.shape_cast %1 : vector<1x96x84xf32> to vector<96x84xf32>
    %cst = arith.constant dense<0.000000e+00> : vector<256x84xf32>
    %3 = tpu.matmul %0, %2, %cst {dimension_numbers = #tpu.dot_dimension_numbers<[1], [0], [0], [1], [0, 0, 1, 1], [], []>} : vector<256x96xf32>, vector<96x84xf32>, vector<256x84xf32> -> vector<256x84xf32>
    %4 = vector.extract_strided_slice %3 {offsets = [0, 0], sizes = [56, 84], strides = [1, 1]} : vector<256x84xf32> to vector<56x84xf32>
    %5 = vector.extract_strided_slice %3 {offsets = [64, 0], sizes = [56, 84], strides = [1, 1]} : vector<256x84xf32> to vector<56x84xf32>
    %6 = vector.extract_strided_slice %3 {offsets = [128, 0], sizes = [56, 84], strides = [1, 1]} : vector<256x84xf32> to vector<56x84xf32>
    %7 = vector.extract_strided_slice %3 {offsets = [192, 0], sizes = [56, 84], strides = [1, 1]} : vector<256x84xf32> to vector<56x84xf32>
    %c1 = arith.constant 1 : index
    %c0_4 = arith.constant 0 : index
    %c0_5 = arith.constant 0 : index
    %8 = vector.load %arg2[%c1, %c0_4, %c0_5] : memref<10x96x84xf32, #tpu.memory_space<vmem>>, vector<1x96x84xf32>
    %9 = vector.shape_cast %8 : vector<1x96x84xf32> to vector<96x84xf32>
    %cst_6 = arith.constant dense<0.000000e+00> : vector<256x84xf32>
    %10 = tpu.matmul %0, %9, %cst_6 {dimension_numbers = #tpu.dot_dimension_numbers<[1], [0], [0], [1], [0, 0, 1, 1], [], []>} : vector<256x96xf32>, vector<96x84xf32>, vector<256x84xf32> -> vector<256x84xf32>
    %11 = vector.extract_strided_slice %10 {offsets = [64, 0], sizes = [56, 84], strides = [1, 1]} : vector<256x84xf32> to vector<56x84xf32>
    %12 = arith.addf %4, %11 : vector<56x84xf32>
    %13 = vector.extract_strided_slice %10 {offsets = [128, 0], sizes = [56, 84], strides = [1, 1]} : vector<256x84xf32> to vector<56x84xf32>
    %14 = arith.addf %5, %13 : vector<56x84xf32>
    %15 = vector.extract_strided_slice %10 {offsets = [192, 0], sizes = [56, 84], strides = [1, 1]} : vector<256x84xf32> to vector<56x84xf32>
    %16 = arith.addf %6, %15 : vector<56x84xf32>
    %17 = vector.extract_strided_slice %10 {offsets = [8, 0], sizes = [56, 84], strides = [1, 1]} : vector<256x84xf32> to vector<56x84xf32>
    %18 = arith.addf %7, %17 : vector<56x84xf32>
    %c2 = arith.constant 2 : index
    %c0_7 = arith.constant 0 : index
    %c0_8 = arith.constant 0 : index
    %19 = vector.load %arg2[%c2, %c0_7, %c0_8] : memref<10x96x84xf32, #tpu.memory_space<vmem>>, vector<1x96x84xf32>
    %20 = vector.shape_cast %19 : vector<1x96x84xf32> to vector<96x84xf32>
    %cst_9 = arith.constant dense<0.000000e+00> : vector<256x84xf32>
    %21 = tpu.matmul %0, %20, %cst_9 {dimension_numbers = #tpu.dot_dimension_numbers<[1], [0], [0], [1], [0, 0, 1, 1], [], []>} : vector<256x96xf32>, vector<96x84xf32>, vector<256x84xf32> -> vector<256x84xf32>
    %22 = vector.extract_strided_slice %21 {offsets = [128, 0], sizes = [56, 84], strides = [1, 1]} : vector<256x84xf32> to vector<56x84xf32>
    %23 = arith.addf %12, %22 : vector<56x84xf32>
    %24 = vector.extract_strided_slice %21 {offsets = [192, 0], sizes = [56, 84], strides = [1, 1]} : vector<256x84xf32> to vector<56x84xf32>
    %25 = arith.addf %14, %24 : vector<56x84xf32>
    %26 = vector.extract_strided_slice %21 {offsets = [8, 0], sizes = [56, 84], strides = [1, 1]} : vector<256x84xf32> to vector<56x84xf32>
    %27 = arith.addf %16, %26 : vector<56x84xf32>
    %28 = vector.extract_strided_slice %21 {offsets = [72, 0], sizes = [56, 84], strides = [1, 1]} : vector<256x84xf32> to vector<56x84xf32>
    %29 = arith.addf %18, %28 : vector<56x84xf32>
    %c3 = arith.constant 3 : index
    %c0_10 = arith.constant 0 : index
    %c0_11 = arith.constant 0 : index
    %30 = vector.load %arg2[%c3, %c0_10, %c0_11] : memref<10x96x84xf32, #tpu.memory_space<vmem>>, vector<1x96x84xf32>
    %31 = vector.shape_cast %30 : vector<1x96x84xf32> to vector<96x84xf32>
    %cst_12 = arith.constant dense<0.000000e+00> : vector<256x84xf32>
    %32 = tpu.matmul %0, %31, %cst_12 {dimension_numbers = #tpu.dot_dimension_numbers<[1], [0], [0], [1], [0, 0, 1, 1], [], []>} : vector<256x96xf32>, vector<96x84xf32>, vector<256x84xf32> -> vector<256x84xf32>
    %33 = vector.extract_strided_slice %32 {offsets = [192, 0], sizes = [56, 84], strides = [1, 1]} : vector<256x84xf32> to vector<56x84xf32>
    %34 = arith.addf %23, %33 : vector<56x84xf32>
    %35 = vector.extract_strided_slice %32 {offsets = [8, 0], sizes = [56, 84], strides = [1, 1]} : vector<256x84xf32> to vector<56x84xf32>
    %36 = arith.addf %25, %35 : vector<56x84xf32>
    %37 = vector.extract_strided_slice %32 {offsets = [72, 0], sizes = [56, 84], strides = [1, 1]} : vector<256x84xf32> to vector<56x84xf32>
    %38 = arith.addf %27, %37 : vector<56x84xf32>
    %39 = vector.extract_strided_slice %32 {offsets = [136, 0], sizes = [56, 84], strides = [1, 1]} : vector<256x84xf32> to vector<56x84xf32>
    %40 = arith.addf %29, %39 : vector<56x84xf32>
    %c4 = arith.constant 4 : index
    %c0_13 = arith.constant 0 : index
    %c0_14 = arith.constant 0 : index
    %41 = vector.load %arg2[%c4, %c0_13, %c0_14] : memref<10x96x84xf32, #tpu.memory_space<vmem>>, vector<1x96x84xf32>
    %42 = vector.shape_cast %41 : vector<1x96x84xf32> to vector<96x84xf32>
    %cst_15 = arith.constant dense<0.000000e+00> : vector<256x84xf32>
    %43 = tpu.matmul %0, %42, %cst_15 {dimension_numbers = #tpu.dot_dimension_numbers<[1], [0], [0], [1], [0, 0, 1, 1], [], []>} : vector<256x96xf32>, vector<96x84xf32>, vector<256x84xf32> -> vector<256x84xf32>
    %44 = vector.extract_strided_slice %43 {offsets = [8, 0], sizes = [56, 84], strides = [1, 1]} : vector<256x84xf32> to vector<56x84xf32>
    %45 = arith.addf %34, %44 : vector<56x84xf32>
    %46 = vector.extract_strided_slice %43 {offsets = [72, 0], sizes = [56, 84], strides = [1, 1]} : vector<256x84xf32> to vector<56x84xf32>
    %47 = arith.addf %36, %46 : vector<56x84xf32>
    %48 = vector.extract_strided_slice %43 {offsets = [136, 0], sizes = [56, 84], strides = [1, 1]} : vector<256x84xf32> to vector<56x84xf32>
    %49 = arith.addf %38, %48 : vector<56x84xf32>
    %50 = vector.extract_strided_slice %43 {offsets = [200, 0], sizes = [56, 84], strides = [1, 1]} : vector<256x84xf32> to vector<56x84xf32>
    %51 = arith.addf %40, %50 : vector<56x84xf32>
    %c5 = arith.constant 5 : index
    %c0_16 = arith.constant 0 : index
    %c0_17 = arith.constant 0 : index
    %52 = vector.load %arg2[%c5, %c0_16, %c0_17] : memref<10x96x84xf32, #tpu.memory_space<vmem>>, vector<1x96x84xf32>
    %53 = vector.shape_cast %52 : vector<1x96x84xf32> to vector<96x84xf32>
    %cst_18 = arith.constant dense<0.000000e+00> : vector<256x84xf32>
    %54 = tpu.matmul %0, %53, %cst_18 {dimension_numbers = #tpu.dot_dimension_numbers<[1], [0], [0], [1], [0, 0, 1, 1], [], []>} : vector<256x96xf32>, vector<96x84xf32>, vector<256x84xf32> -> vector<256x84xf32>
    %55 = vector.extract_strided_slice %54 {offsets = [0, 0], sizes = [56, 84], strides = [1, 1]} : vector<256x84xf32> to vector<56x84xf32>
    %56 = vector.extract_strided_slice %54 {offsets = [64, 0], sizes = [56, 84], strides = [1, 1]} : vector<256x84xf32> to vector<56x84xf32>
    %57 = vector.extract_strided_slice %54 {offsets = [128, 0], sizes = [56, 84], strides = [1, 1]} : vector<256x84xf32> to vector<56x84xf32>
    %58 = vector.extract_strided_slice %54 {offsets = [192, 0], sizes = [56, 84], strides = [1, 1]} : vector<256x84xf32> to vector<56x84xf32>
    %c6 = arith.constant 6 : index
    %c0_19 = arith.constant 0 : index
    %c0_20 = arith.constant 0 : index
    %59 = vector.load %arg2[%c6, %c0_19, %c0_20] : memref<10x96x84xf32, #tpu.memory_space<vmem>>, vector<1x96x84xf32>
    %60 = vector.shape_cast %59 : vector<1x96x84xf32> to vector<96x84xf32>
    %cst_21 = arith.constant dense<0.000000e+00> : vector<256x84xf32>
    %61 = tpu.matmul %0, %60, %cst_21 {dimension_numbers = #tpu.dot_dimension_numbers<[1], [0], [0], [1], [0, 0, 1, 1], [], []>} : vector<256x96xf32>, vector<96x84xf32>, vector<256x84xf32> -> vector<256x84xf32>
    %62 = vector.extract_strided_slice %61 {offsets = [64, 0], sizes = [56, 84], strides = [1, 1]} : vector<256x84xf32> to vector<56x84xf32>
    %63 = arith.addf %55, %62 : vector<56x84xf32>
    %64 = vector.extract_strided_slice %61 {offsets = [128, 0], sizes = [56, 84], strides = [1, 1]} : vector<256x84xf32> to vector<56x84xf32>
    %65 = arith.addf %56, %64 : vector<56x84xf32>
    %66 = vector.extract_strided_slice %61 {offsets = [192, 0], sizes = [56, 84], strides = [1, 1]} : vector<256x84xf32> to vector<56x84xf32>
    %67 = arith.addf %57, %66 : vector<56x84xf32>
    %68 = vector.extract_strided_slice %61 {offsets = [8, 0], sizes = [56, 84], strides = [1, 1]} : vector<256x84xf32> to vector<56x84xf32>
    %69 = arith.addf %58, %68 : vector<56x84xf32>
    %c7 = arith.constant 7 : index
    %c0_22 = arith.constant 0 : index
    %c0_23 = arith.constant 0 : index
    %70 = vector.load %arg2[%c7, %c0_22, %c0_23] : memref<10x96x84xf32, #tpu.memory_space<vmem>>, vector<1x96x84xf32>
    %71 = vector.shape_cast %70 : vector<1x96x84xf32> to vector<96x84xf32>
    %cst_24 = arith.constant dense<0.000000e+00> : vector<256x84xf32>
    %72 = tpu.matmul %0, %71, %cst_24 {dimension_numbers = #tpu.dot_dimension_numbers<[1], [0], [0], [1], [0, 0, 1, 1], [], []>} : vector<256x96xf32>, vector<96x84xf32>, vector<256x84xf32> -> vector<256x84xf32>
    %73 = vector.extract_strided_slice %72 {offsets = [128, 0], sizes = [56, 84], strides = [1, 1]} : vector<256x84xf32> to vector<56x84xf32>
    %74 = arith.addf %63, %73 : vector<56x84xf32>
    %75 = vector.extract_strided_slice %72 {offsets = [192, 0], sizes = [56, 84], strides = [1, 1]} : vector<256x84xf32> to vector<56x84xf32>
    %76 = arith.addf %65, %75 : vector<56x84xf32>
    %77 = vector.extract_strided_slice %72 {offsets = [8, 0], sizes = [56, 84], strides = [1, 1]} : vector<256x84xf32> to vector<56x84xf32>
    %78 = arith.addf %67, %77 : vector<56x84xf32>
    %79 = vector.extract_strided_slice %72 {offsets = [72, 0], sizes = [56, 84], strides = [1, 1]} : vector<256x84xf32> to vector<56x84xf32>
    %80 = arith.addf %69, %79 : vector<56x84xf32>
    %c8 = arith.constant 8 : index
    %c0_25 = arith.constant 0 : index
    %c0_26 = arith.constant 0 : index
    %81 = vector.load %arg2[%c8, %c0_25, %c0_26] : memref<10x96x84xf32, #tpu.memory_space<vmem>>, vector<1x96x84xf32>
    %82 = vector.shape_cast %81 : vector<1x96x84xf32> to vector<96x84xf32>
    %cst_27 = arith.constant dense<0.000000e+00> : vector<256x84xf32>
    %83 = tpu.matmul %0, %82, %cst_27 {dimension_numbers = #tpu.dot_dimension_numbers<[1], [0], [0], [1], [0, 0, 1, 1], [], []>} : vector<256x96xf32>, vector<96x84xf32>, vector<256x84xf32> -> vector<256x84xf32>
    %84 = vector.extract_strided_slice %83 {offsets = [192, 0], sizes = [56, 84], strides = [1, 1]} : vector<256x84xf32> to vector<56x84xf32>
    %85 = arith.addf %74, %84 : vector<56x84xf32>
    %86 = vector.extract_strided_slice %83 {offsets = [8, 0], sizes = [56, 84], strides = [1, 1]} : vector<256x84xf32> to vector<56x84xf32>
    %87 = arith.addf %76, %86 : vector<56x84xf32>
    %88 = vector.extract_strided_slice %83 {offsets = [72, 0], sizes = [56, 84], strides = [1, 1]} : vector<256x84xf32> to vector<56x84xf32>
    %89 = arith.addf %78, %88 : vector<56x84xf32>
    %90 = vector.extract_strided_slice %83 {offsets = [136, 0], sizes = [56, 84], strides = [1, 1]} : vector<256x84xf32> to vector<56x84xf32>
    %91 = arith.addf %80, %90 : vector<56x84xf32>
    %c9 = arith.constant 9 : index
    %c0_28 = arith.constant 0 : index
    %c0_29 = arith.constant 0 : index
    %92 = vector.load %arg2[%c9, %c0_28, %c0_29] : memref<10x96x84xf32, #tpu.memory_space<vmem>>, vector<1x96x84xf32>
    %93 = vector.shape_cast %92 : vector<1x96x84xf32> to vector<96x84xf32>
    %cst_30 = arith.constant dense<0.000000e+00> : vector<256x84xf32>
    %94 = tpu.matmul %0, %93, %cst_30 {dimension_numbers = #tpu.dot_dimension_numbers<[1], [0], [0], [1], [0, 0, 1, 1], [], []>} : vector<256x96xf32>, vector<96x84xf32>, vector<256x84xf32> -> vector<256x84xf32>
    %95 = vector.extract_strided_slice %94 {offsets = [8, 0], sizes = [56, 84], strides = [1, 1]} : vector<256x84xf32> to vector<56x84xf32>
    %96 = arith.addf %85, %95 : vector<56x84xf32>
    %97 = vector.extract_strided_slice %94 {offsets = [72, 0], sizes = [56, 84], strides = [1, 1]} : vector<256x84xf32> to vector<56x84xf32>
    %98 = arith.addf %87, %97 : vector<56x84xf32>
    %99 = vector.extract_strided_slice %94 {offsets = [136, 0], sizes = [56, 84], strides = [1, 1]} : vector<256x84xf32> to vector<56x84xf32>
    %100 = arith.addf %89, %99 : vector<56x84xf32>
    %101 = vector.extract_strided_slice %94 {offsets = [200, 0], sizes = [56, 84], strides = [1, 1]} : vector<256x84xf32> to vector<56x84xf32>
    %102 = arith.addf %91, %101 : vector<56x84xf32>
    %103 = arith.maximumf %45, %96 : vector<56x84xf32>
    %104 = arith.maximumf %47, %98 : vector<56x84xf32>
    %105 = arith.maximumf %103, %104 : vector<56x84xf32>
    %c0_31 = arith.constant 0 : index
    %c0_32 = arith.constant 0 : index
    %106 = vector.load %arg3[%c0_31, %c0_32] : memref<1x84xf32, #tpu.memory_space<vmem>>, vector<1x84xf32>
    %107 = vector.broadcast %106 : vector<1x84xf32> to vector<56x84xf32>
    %108 = arith.addf %105, %107 : vector<56x84xf32>
    %cst_33 = arith.constant 0.000000e+00 : f32
    %109 = vector.broadcast %cst_33 : f32 to vector<56x84xf32>
    %110 = arith.maximumf %108, %109 : vector<56x84xf32>
    %111 = arith.maximumf %49, %100 : vector<56x84xf32>
    %112 = arith.maximumf %51, %102 : vector<56x84xf32>
    %113 = arith.maximumf %111, %112 : vector<56x84xf32>
    %c0_34 = arith.constant 0 : index
    %c0_35 = arith.constant 0 : index
    %114 = vector.load %arg3[%c0_34, %c0_35] : memref<1x84xf32, #tpu.memory_space<vmem>>, vector<1x84xf32>
    %115 = vector.broadcast %114 : vector<1x84xf32> to vector<56x84xf32>
    %116 = arith.addf %113, %115 : vector<56x84xf32>
    %cst_36 = arith.constant 0.000000e+00 : f32
    %117 = vector.broadcast %cst_36 : f32 to vector<56x84xf32>
    %118 = arith.maximumf %116, %117 : vector<56x84xf32>
    %c0_37 = arith.constant 0 : index
    %c0_38 = arith.constant 0 : index
    %c0_39 = arith.constant 0 : index
    %119 = vector.load %arg4[%c0_37, %c0_38, %c0_39] : memref<10x84x80xf32, #tpu.memory_space<vmem>>, vector<1x84x80xf32>
    %120 = vector.shape_cast %119 : vector<1x84x80xf32> to vector<84x80xf32>
    %cst_40 = arith.constant dense<0.000000e+00> : vector<56x80xf32>
    %121 = tpu.matmul %110, %120, %cst_40 {dimension_numbers = #tpu.dot_dimension_numbers<[1], [0], [0], [1], [0, 0, 1, 1], [], []>} : vector<56x84xf32>, vector<84x80xf32>, vector<56x80xf32> -> vector<56x80xf32>
    %122 = vector.extract_strided_slice %121 {offsets = [0, 0], sizes = [40, 80], strides = [1, 1]} : vector<56x80xf32> to vector<40x80xf32>
    %c0_41 = arith.constant 0 : index
    %c0_42 = arith.constant 0 : index
    %c0_43 = arith.constant 0 : index
    %123 = vector.load %arg4[%c0_41, %c0_42, %c0_43] : memref<10x84x80xf32, #tpu.memory_space<vmem>>, vector<1x84x80xf32>
    %124 = vector.shape_cast %123 : vector<1x84x80xf32> to vector<84x80xf32>
    %cst_44 = arith.constant dense<0.000000e+00> : vector<56x80xf32>
    %125 = tpu.matmul %118, %124, %cst_44 {dimension_numbers = #tpu.dot_dimension_numbers<[1], [0], [0], [1], [0, 0, 1, 1], [], []>} : vector<56x84xf32>, vector<84x80xf32>, vector<56x80xf32> -> vector<56x80xf32>
    %126 = vector.extract_strided_slice %125 {offsets = [0, 0], sizes = [40, 80], strides = [1, 1]} : vector<56x80xf32> to vector<40x80xf32>
    %c1_45 = arith.constant 1 : index
    %c0_46 = arith.constant 0 : index
    %c0_47 = arith.constant 0 : index
    %127 = vector.load %arg4[%c1_45, %c0_46, %c0_47] : memref<10x84x80xf32, #tpu.memory_space<vmem>>, vector<1x84x80xf32>
    %128 = vector.shape_cast %127 : vector<1x84x80xf32> to vector<84x80xf32>
    %cst_48 = arith.constant dense<0.000000e+00> : vector<56x80xf32>
    %129 = tpu.matmul %110, %128, %cst_48 {dimension_numbers = #tpu.dot_dimension_numbers<[1], [0], [0], [1], [0, 0, 1, 1], [], []>} : vector<56x84xf32>, vector<84x80xf32>, vector<56x80xf32> -> vector<56x80xf32>
    %130 = vector.extract_strided_slice %129 {offsets = [8, 0], sizes = [40, 80], strides = [1, 1]} : vector<56x80xf32> to vector<40x80xf32>
    %131 = arith.addf %126, %130 : vector<40x80xf32>
    %c1_49 = arith.constant 1 : index
    %c0_50 = arith.constant 0 : index
    %c0_51 = arith.constant 0 : index
    %132 = vector.load %arg4[%c1_49, %c0_50, %c0_51] : memref<10x84x80xf32, #tpu.memory_space<vmem>>, vector<1x84x80xf32>
    %133 = vector.shape_cast %132 : vector<1x84x80xf32> to vector<84x80xf32>
    %cst_52 = arith.constant dense<0.000000e+00> : vector<56x80xf32>
    %134 = tpu.matmul %118, %133, %cst_52 {dimension_numbers = #tpu.dot_dimension_numbers<[1], [0], [0], [1], [0, 0, 1, 1], [], []>} : vector<56x84xf32>, vector<84x80xf32>, vector<56x80xf32> -> vector<56x80xf32>
    %135 = vector.extract_strided_slice %134 {offsets = [0, 0], sizes = [40, 80], strides = [1, 1]} : vector<56x80xf32> to vector<40x80xf32>
    %136 = arith.addf %122, %135 : vector<40x80xf32>
    %c2_53 = arith.constant 2 : index
    %c0_54 = arith.constant 0 : index
    %c0_55 = arith.constant 0 : index
    %137 = vector.load %arg4[%c2_53, %c0_54, %c0_55] : memref<10x84x80xf32, #tpu.memory_space<vmem>>, vector<1x84x80xf32>
    %138 = vector.shape_cast %137 : vector<1x84x80xf32> to vector<84x80xf32>
    %cst_56 = arith.constant dense<0.000000e+00> : vector<56x80xf32>
    %139 = tpu.matmul %110, %138, %cst_56 {dimension_numbers = #tpu.dot_dimension_numbers<[1], [0], [0], [1], [0, 0, 1, 1], [], []>} : vector<56x84xf32>, vector<84x80xf32>, vector<56x80xf32> -> vector<56x80xf32>
    %140 = vector.extract_strided_slice %139 {offsets = [8, 0], sizes = [40, 80], strides = [1, 1]} : vector<56x80xf32> to vector<40x80xf32>
    %141 = arith.addf %136, %140 : vector<40x80xf32>
    %c2_57 = arith.constant 2 : index
    %c0_58 = arith.constant 0 : index
    %c0_59 = arith.constant 0 : index
    %142 = vector.load %arg4[%c2_57, %c0_58, %c0_59] : memref<10x84x80xf32, #tpu.memory_space<vmem>>, vector<1x84x80xf32>
    %143 = vector.shape_cast %142 : vector<1x84x80xf32> to vector<84x80xf32>
    %cst_60 = arith.constant dense<0.000000e+00> : vector<56x80xf32>
    %144 = tpu.matmul %118, %143, %cst_60 {dimension_numbers = #tpu.dot_dimension_numbers<[1], [0], [0], [1], [0, 0, 1, 1], [], []>} : vector<56x84xf32>, vector<84x80xf32>, vector<56x80xf32> -> vector<56x80xf32>
    %145 = vector.extract_strided_slice %144 {offsets = [8, 0], sizes = [40, 80], strides = [1, 1]} : vector<56x80xf32> to vector<40x80xf32>
    %146 = arith.addf %131, %145 : vector<40x80xf32>
    %c3_61 = arith.constant 3 : index
    %c0_62 = arith.constant 0 : index
    %c0_63 = arith.constant 0 : index
    %147 = vector.load %arg4[%c3_61, %c0_62, %c0_63] : memref<10x84x80xf32, #tpu.memory_space<vmem>>, vector<1x84x80xf32>
    %148 = vector.shape_cast %147 : vector<1x84x80xf32> to vector<84x80xf32>
    %cst_64 = arith.constant dense<0.000000e+00> : vector<56x80xf32>
    %149 = tpu.matmul %110, %148, %cst_64 {dimension_numbers = #tpu.dot_dimension_numbers<[1], [0], [0], [1], [0, 0, 1, 1], [], []>} : vector<56x84xf32>, vector<84x80xf32>, vector<56x80xf32> -> vector<56x80xf32>
    %150 = vector.extract_strided_slice %149 {offsets = [16, 0], sizes = [40, 80], strides = [1, 1]} : vector<56x80xf32> to vector<40x80xf32>
    %151 = arith.addf %146, %150 : vector<40x80xf32>
    %c3_65 = arith.constant 3 : index
    %c0_66 = arith.constant 0 : index
    %c0_67 = arith.constant 0 : index
    %152 = vector.load %arg4[%c3_65, %c0_66, %c0_67] : memref<10x84x80xf32, #tpu.memory_space<vmem>>, vector<1x84x80xf32>
    %153 = vector.shape_cast %152 : vector<1x84x80xf32> to vector<84x80xf32>
    %cst_68 = arith.constant dense<0.000000e+00> : vector<56x80xf32>
    %154 = tpu.matmul %118, %153, %cst_68 {dimension_numbers = #tpu.dot_dimension_numbers<[1], [0], [0], [1], [0, 0, 1, 1], [], []>} : vector<56x84xf32>, vector<84x80xf32>, vector<56x80xf32> -> vector<56x80xf32>
    %155 = vector.extract_strided_slice %154 {offsets = [8, 0], sizes = [40, 80], strides = [1, 1]} : vector<56x80xf32> to vector<40x80xf32>
    %156 = arith.addf %141, %155 : vector<40x80xf32>
    %c4_69 = arith.constant 4 : index
    %c0_70 = arith.constant 0 : index
    %c0_71 = arith.constant 0 : index
    %157 = vector.load %arg4[%c4_69, %c0_70, %c0_71] : memref<10x84x80xf32, #tpu.memory_space<vmem>>, vector<1x84x80xf32>
    %158 = vector.shape_cast %157 : vector<1x84x80xf32> to vector<84x80xf32>
    %cst_72 = arith.constant dense<0.000000e+00> : vector<56x80xf32>
    %159 = tpu.matmul %110, %158, %cst_72 {dimension_numbers = #tpu.dot_dimension_numbers<[1], [0], [0], [1], [0, 0, 1, 1], [], []>} : vector<56x84xf32>, vector<84x80xf32>, vector<56x80xf32> -> vector<56x80xf32>
    %160 = vector.extract_strided_slice %159 {offsets = [16, 0], sizes = [40, 80], strides = [1, 1]} : vector<56x80xf32> to vector<40x80xf32>
    %161 = arith.addf %156, %160 : vector<40x80xf32>
    %c4_73 = arith.constant 4 : index
    %c0_74 = arith.constant 0 : index
    %c0_75 = arith.constant 0 : index
    %162 = vector.load %arg4[%c4_73, %c0_74, %c0_75] : memref<10x84x80xf32, #tpu.memory_space<vmem>>, vector<1x84x80xf32>
    %163 = vector.shape_cast %162 : vector<1x84x80xf32> to vector<84x80xf32>
    %cst_76 = arith.constant dense<0.000000e+00> : vector<56x80xf32>
    %164 = tpu.matmul %118, %163, %cst_76 {dimension_numbers = #tpu.dot_dimension_numbers<[1], [0], [0], [1], [0, 0, 1, 1], [], []>} : vector<56x84xf32>, vector<84x80xf32>, vector<56x80xf32> -> vector<56x80xf32>
    %165 = vector.extract_strided_slice %164 {offsets = [16, 0], sizes = [40, 80], strides = [1, 1]} : vector<56x80xf32> to vector<40x80xf32>
    %166 = arith.addf %151, %165 : vector<40x80xf32>
    %c5_77 = arith.constant 5 : index
    %c0_78 = arith.constant 0 : index
    %c0_79 = arith.constant 0 : index
    %167 = vector.load %arg4[%c5_77, %c0_78, %c0_79] : memref<10x84x80xf32, #tpu.memory_space<vmem>>, vector<1x84x80xf32>
    %168 = vector.shape_cast %167 : vector<1x84x80xf32> to vector<84x80xf32>
    %cst_80 = arith.constant dense<0.000000e+00> : vector<56x80xf32>
    %169 = tpu.matmul %110, %168, %cst_80 {dimension_numbers = #tpu.dot_dimension_numbers<[1], [0], [0], [1], [0, 0, 1, 1], [], []>} : vector<56x84xf32>, vector<84x80xf32>, vector<56x80xf32> -> vector<56x80xf32>
    %170 = vector.extract_strided_slice %169 {offsets = [0, 0], sizes = [40, 80], strides = [1, 1]} : vector<56x80xf32> to vector<40x80xf32>
    %c5_81 = arith.constant 5 : index
    %c0_82 = arith.constant 0 : index
    %c0_83 = arith.constant 0 : index
    %171 = vector.load %arg4[%c5_81, %c0_82, %c0_83] : memref<10x84x80xf32, #tpu.memory_space<vmem>>, vector<1x84x80xf32>
    %172 = vector.shape_cast %171 : vector<1x84x80xf32> to vector<84x80xf32>
    %cst_84 = arith.constant dense<0.000000e+00> : vector<56x80xf32>
    %173 = tpu.matmul %118, %172, %cst_84 {dimension_numbers = #tpu.dot_dimension_numbers<[1], [0], [0], [1], [0, 0, 1, 1], [], []>} : vector<56x84xf32>, vector<84x80xf32>, vector<56x80xf32> -> vector<56x80xf32>
    %174 = vector.extract_strided_slice %173 {offsets = [0, 0], sizes = [40, 80], strides = [1, 1]} : vector<56x80xf32> to vector<40x80xf32>
    %c6_85 = arith.constant 6 : index
    %c0_86 = arith.constant 0 : index
    %c0_87 = arith.constant 0 : index
    %175 = vector.load %arg4[%c6_85, %c0_86, %c0_87] : memref<10x84x80xf32, #tpu.memory_space<vmem>>, vector<1x84x80xf32>
    %176 = vector.shape_cast %175 : vector<1x84x80xf32> to vector<84x80xf32>
    %cst_88 = arith.constant dense<0.000000e+00> : vector<56x80xf32>
    %177 = tpu.matmul %110, %176, %cst_88 {dimension_numbers = #tpu.dot_dimension_numbers<[1], [0], [0], [1], [0, 0, 1, 1], [], []>} : vector<56x84xf32>, vector<84x80xf32>, vector<56x80xf32> -> vector<56x80xf32>
    %178 = vector.extract_strided_slice %177 {offsets = [8, 0], sizes = [40, 80], strides = [1, 1]} : vector<56x80xf32> to vector<40x80xf32>
    %179 = arith.addf %174, %178 : vector<40x80xf32>
    %c6_89 = arith.constant 6 : index
    %c0_90 = arith.constant 0 : index
    %c0_91 = arith.constant 0 : index
    %180 = vector.load %arg4[%c6_89, %c0_90, %c0_91] : memref<10x84x80xf32, #tpu.memory_space<vmem>>, vector<1x84x80xf32>
    %181 = vector.shape_cast %180 : vector<1x84x80xf32> to vector<84x80xf32>
    %cst_92 = arith.constant dense<0.000000e+00> : vector<56x80xf32>
    %182 = tpu.matmul %118, %181, %cst_92 {dimension_numbers = #tpu.dot_dimension_numbers<[1], [0], [0], [1], [0, 0, 1, 1], [], []>} : vector<56x84xf32>, vector<84x80xf32>, vector<56x80xf32> -> vector<56x80xf32>
    %183 = vector.extract_strided_slice %182 {offsets = [0, 0], sizes = [40, 80], strides = [1, 1]} : vector<56x80xf32> to vector<40x80xf32>
    %184 = arith.addf %170, %183 : vector<40x80xf32>
    %c7_93 = arith.constant 7 : index
    %c0_94 = arith.constant 0 : index
    %c0_95 = arith.constant 0 : index
    %185 = vector.load %arg4[%c7_93, %c0_94, %c0_95] : memref<10x84x80xf32, #tpu.memory_space<vmem>>, vector<1x84x80xf32>
    %186 = vector.shape_cast %185 : vector<1x84x80xf32> to vector<84x80xf32>
    %cst_96 = arith.constant dense<0.000000e+00> : vector<56x80xf32>
    %187 = tpu.matmul %110, %186, %cst_96 {dimension_numbers = #tpu.dot_dimension_numbers<[1], [0], [0], [1], [0, 0, 1, 1], [], []>} : vector<56x84xf32>, vector<84x80xf32>, vector<56x80xf32> -> vector<56x80xf32>
    %188 = vector.extract_strided_slice %187 {offsets = [8, 0], sizes = [40, 80], strides = [1, 1]} : vector<56x80xf32> to vector<40x80xf32>
    %189 = arith.addf %184, %188 : vector<40x80xf32>
    %c7_97 = arith.constant 7 : index
    %c0_98 = arith.constant 0 : index
    %c0_99 = arith.constant 0 : index
    %190 = vector.load %arg4[%c7_97, %c0_98, %c0_99] : memref<10x84x80xf32, #tpu.memory_space<vmem>>, vector<1x84x80xf32>
    %191 = vector.shape_cast %190 : vector<1x84x80xf32> to vector<84x80xf32>
    %cst_100 = arith.constant dense<0.000000e+00> : vector<56x80xf32>
    %192 = tpu.matmul %118, %191, %cst_100 {dimension_numbers = #tpu.dot_dimension_numbers<[1], [0], [0], [1], [0, 0, 1, 1], [], []>} : vector<56x84xf32>, vector<84x80xf32>, vector<56x80xf32> -> vector<56x80xf32>
    %193 = vector.extract_strided_slice %192 {offsets = [8, 0], sizes = [40, 80], strides = [1, 1]} : vector<56x80xf32> to vector<40x80xf32>
    %194 = arith.addf %179, %193 : vector<40x80xf32>
    %c8_101 = arith.constant 8 : index
    %c0_102 = arith.constant 0 : index
    %c0_103 = arith.constant 0 : index
    %195 = vector.load %arg4[%c8_101, %c0_102, %c0_103] : memref<10x84x80xf32, #tpu.memory_space<vmem>>, vector<1x84x80xf32>
    %196 = vector.shape_cast %195 : vector<1x84x80xf32> to vector<84x80xf32>
    %cst_104 = arith.constant dense<0.000000e+00> : vector<56x80xf32>
    %197 = tpu.matmul %110, %196, %cst_104 {dimension_numbers = #tpu.dot_dimension_numbers<[1], [0], [0], [1], [0, 0, 1, 1], [], []>} : vector<56x84xf32>, vector<84x80xf32>, vector<56x80xf32> -> vector<56x80xf32>
    %198 = vector.extract_strided_slice %197 {offsets = [16, 0], sizes = [40, 80], strides = [1, 1]} : vector<56x80xf32> to vector<40x80xf32>
    %199 = arith.addf %194, %198 : vector<40x80xf32>
    %c8_105 = arith.constant 8 : index
    %c0_106 = arith.constant 0 : index
    %c0_107 = arith.constant 0 : index
    %200 = vector.load %arg4[%c8_105, %c0_106, %c0_107] : memref<10x84x80xf32, #tpu.memory_space<vmem>>, vector<1x84x80xf32>
    %201 = vector.shape_cast %200 : vector<1x84x80xf32> to vector<84x80xf32>
    %cst_108 = arith.constant dense<0.000000e+00> : vector<56x80xf32>
    %202 = tpu.matmul %118, %201, %cst_108 {dimension_numbers = #tpu.dot_dimension_numbers<[1], [0], [0], [1], [0, 0, 1, 1], [], []>} : vector<56x84xf32>, vector<84x80xf32>, vector<56x80xf32> -> vector<56x80xf32>
    %203 = vector.extract_strided_slice %202 {offsets = [8, 0], sizes = [40, 80], strides = [1, 1]} : vector<56x80xf32> to vector<40x80xf32>
    %204 = arith.addf %189, %203 : vector<40x80xf32>
    %c9_109 = arith.constant 9 : index
    %c0_110 = arith.constant 0 : index
    %c0_111 = arith.constant 0 : index
    %205 = vector.load %arg4[%c9_109, %c0_110, %c0_111] : memref<10x84x80xf32, #tpu.memory_space<vmem>>, vector<1x84x80xf32>
    %206 = vector.shape_cast %205 : vector<1x84x80xf32> to vector<84x80xf32>
    %cst_112 = arith.constant dense<0.000000e+00> : vector<56x80xf32>
    %207 = tpu.matmul %110, %206, %cst_112 {dimension_numbers = #tpu.dot_dimension_numbers<[1], [0], [0], [1], [0, 0, 1, 1], [], []>} : vector<56x84xf32>, vector<84x80xf32>, vector<56x80xf32> -> vector<56x80xf32>
    %208 = vector.extract_strided_slice %207 {offsets = [16, 0], sizes = [40, 80], strides = [1, 1]} : vector<56x80xf32> to vector<40x80xf32>
    %209 = arith.addf %204, %208 : vector<40x80xf32>
    %c9_113 = arith.constant 9 : index
    %c0_114 = arith.constant 0 : index
    %c0_115 = arith.constant 0 : index
    %210 = vector.load %arg4[%c9_113, %c0_114, %c0_115] : memref<10x84x80xf32, #tpu.memory_space<vmem>>, vector<1x84x80xf32>
    %211 = vector.shape_cast %210 : vector<1x84x80xf32> to vector<84x80xf32>
    %cst_116 = arith.constant dense<0.000000e+00> : vector<56x80xf32>
    %212 = tpu.matmul %118, %211, %cst_116 {dimension_numbers = #tpu.dot_dimension_numbers<[1], [0], [0], [1], [0, 0, 1, 1], [], []>} : vector<56x84xf32>, vector<84x80xf32>, vector<56x80xf32> -> vector<56x80xf32>
    %213 = vector.extract_strided_slice %212 {offsets = [16, 0], sizes = [40, 80], strides = [1, 1]} : vector<56x80xf32> to vector<40x80xf32>
    %214 = arith.addf %199, %213 : vector<40x80xf32>
    %215 = arith.maximumf %161, %209 : vector<40x80xf32>
    %216 = arith.maximumf %166, %214 : vector<40x80xf32>
    %217 = arith.maximumf %215, %216 : vector<40x80xf32>
    %c0_117 = arith.constant 0 : index
    %c0_118 = arith.constant 0 : index
    %218 = vector.load %arg5[%c0_117, %c0_118] : memref<1x80xf32, #tpu.memory_space<vmem>>, vector<1x80xf32>
    %219 = vector.broadcast %218 : vector<1x80xf32> to vector<40x80xf32>
    %220 = arith.addf %217, %219 : vector<40x80xf32>
    %cst_119 = arith.constant 0.000000e+00 : f32
    %221 = vector.broadcast %cst_119 : f32 to vector<40x80xf32>
    %222 = arith.maximumf %220, %221 : vector<40x80xf32>
    %223 = vector.extract_strided_slice %222 {offsets = [0, 0], sizes = [8, 80], strides = [1, 1]} : vector<40x80xf32> to vector<8x80xf32>
    %c0_120 = arith.constant 0 : index
    %c0_121 = arith.constant 0 : index
    %c0_122 = arith.constant 0 : index
    %224 = vector.load %arg6[%c0_120, %c0_121, %c0_122] : memref<5x80x128xf32, #tpu.memory_space<vmem>>, vector<1x80x128xf32>
    %225 = vector.shape_cast %224 : vector<1x80x128xf32> to vector<80x128xf32>
    %cst_123 = arith.constant dense<0.000000e+00> : vector<8x128xf32>
    %226 = tpu.matmul %223, %225, %cst_123 {dimension_numbers = #tpu.dot_dimension_numbers<[1], [0], [0], [1], [0, 0, 1, 1], [], []>} : vector<8x80xf32>, vector<80x128xf32>, vector<8x128xf32> -> vector<8x128xf32>
    %227 = vector.extract_strided_slice %222 {offsets = [8, 0], sizes = [8, 80], strides = [1, 1]} : vector<40x80xf32> to vector<8x80xf32>
    %c1_124 = arith.constant 1 : index
    %c0_125 = arith.constant 0 : index
    %c0_126 = arith.constant 0 : index
    %228 = vector.load %arg6[%c1_124, %c0_125, %c0_126] : memref<5x80x128xf32, #tpu.memory_space<vmem>>, vector<1x80x128xf32>
    %229 = vector.shape_cast %228 : vector<1x80x128xf32> to vector<80x128xf32>
    %cst_127 = arith.constant dense<0.000000e+00> : vector<8x128xf32>
    %230 = tpu.matmul %227, %229, %cst_127 {dimension_numbers = #tpu.dot_dimension_numbers<[1], [0], [0], [1], [0, 0, 1, 1], [], []>} : vector<8x80xf32>, vector<80x128xf32>, vector<8x128xf32> -> vector<8x128xf32>
    %231 = arith.addf %226, %230 : vector<8x128xf32>
    %232 = vector.extract_strided_slice %222 {offsets = [16, 0], sizes = [8, 80], strides = [1, 1]} : vector<40x80xf32> to vector<8x80xf32>
    %c2_128 = arith.constant 2 : index
    %c0_129 = arith.constant 0 : index
    %c0_130 = arith.constant 0 : index
    %233 = vector.load %arg6[%c2_128, %c0_129, %c0_130] : memref<5x80x128xf32, #tpu.memory_space<vmem>>, vector<1x80x128xf32>
    %234 = vector.shape_cast %233 : vector<1x80x128xf32> to vector<80x128xf32>
    %cst_131 = arith.constant dense<0.000000e+00> : vector<8x128xf32>
    %235 = tpu.matmul %232, %234, %cst_131 {dimension_numbers = #tpu.dot_dimension_numbers<[1], [0], [0], [1], [0, 0, 1, 1], [], []>} : vector<8x80xf32>, vector<80x128xf32>, vector<8x128xf32> -> vector<8x128xf32>
    %236 = arith.addf %231, %235 : vector<8x128xf32>
    %237 = vector.extract_strided_slice %222 {offsets = [24, 0], sizes = [8, 80], strides = [1, 1]} : vector<40x80xf32> to vector<8x80xf32>
    %c3_132 = arith.constant 3 : index
    %c0_133 = arith.constant 0 : index
    %c0_134 = arith.constant 0 : index
    %238 = vector.load %arg6[%c3_132, %c0_133, %c0_134] : memref<5x80x128xf32, #tpu.memory_space<vmem>>, vector<1x80x128xf32>
    %239 = vector.shape_cast %238 : vector<1x80x128xf32> to vector<80x128xf32>
    %cst_135 = arith.constant dense<0.000000e+00> : vector<8x128xf32>
    %240 = tpu.matmul %237, %239, %cst_135 {dimension_numbers = #tpu.dot_dimension_numbers<[1], [0], [0], [1], [0, 0, 1, 1], [], []>} : vector<8x80xf32>, vector<80x128xf32>, vector<8x128xf32> -> vector<8x128xf32>
    %241 = arith.addf %236, %240 : vector<8x128xf32>
    %242 = vector.extract_strided_slice %222 {offsets = [32, 0], sizes = [8, 80], strides = [1, 1]} : vector<40x80xf32> to vector<8x80xf32>
    %c4_136 = arith.constant 4 : index
    %c0_137 = arith.constant 0 : index
    %c0_138 = arith.constant 0 : index
    %243 = vector.load %arg6[%c4_136, %c0_137, %c0_138] : memref<5x80x128xf32, #tpu.memory_space<vmem>>, vector<1x80x128xf32>
    %244 = vector.shape_cast %243 : vector<1x80x128xf32> to vector<80x128xf32>
    %cst_139 = arith.constant dense<0.000000e+00> : vector<8x128xf32>
    %245 = tpu.matmul %242, %244, %cst_139 {dimension_numbers = #tpu.dot_dimension_numbers<[1], [0], [0], [1], [0, 0, 1, 1], [], []>} : vector<8x80xf32>, vector<80x128xf32>, vector<8x128xf32> -> vector<8x128xf32>
    %246 = arith.addf %241, %245 : vector<8x128xf32>
    %c0_140 = arith.constant 0 : index
    %c0_141 = arith.constant 0 : index
    %247 = vector.load %arg7[%c0_140, %c0_141] : memref<1x128xf32, #tpu.memory_space<vmem>>, vector<1x128xf32>
    %248 = vector.broadcast %247 : vector<1x128xf32> to vector<8x128xf32>
    %249 = arith.addf %246, %248 : vector<8x128xf32>
    %cst_142 = arith.constant 0.000000e+00 : f32
    %250 = vector.broadcast %cst_142 : f32 to vector<8x128xf32>
    %251 = arith.maximumf %249, %250 : vector<8x128xf32>
    %c0_143 = arith.constant 0 : index
    %c0_144 = arith.constant 0 : index
    %252 = vector.load %arg8[%c0_143, %c0_144] : memref<128x128xf32, #tpu.memory_space<vmem>>, vector<128x128xf32>
    %cst_145 = arith.constant dense<0.000000e+00> : vector<8x128xf32>
    %253 = tpu.matmul %251, %252, %cst_145 {dimension_numbers = #tpu.dot_dimension_numbers<[1], [0], [0], [1], [0, 0, 1, 1], [], []>} : vector<8x128xf32>, vector<128x128xf32>, vector<8x128xf32> -> vector<8x128xf32>
    %c0_146 = arith.constant 0 : index
    %c0_147 = arith.constant 0 : index
    %254 = vector.load %arg9[%c0_146, %c0_147] : memref<1x128xf32, #tpu.memory_space<vmem>>, vector<1x128xf32>
    %255 = vector.broadcast %254 : vector<1x128xf32> to vector<8x128xf32>
    %256 = arith.addf %253, %255 : vector<8x128xf32>
    %cst_148 = arith.constant 0.000000e+00 : f32
    %257 = vector.broadcast %cst_148 : f32 to vector<8x128xf32>
    %258 = arith.maximumf %256, %257 : vector<8x128xf32>
    %c0_149 = arith.constant 0 : index
    %c0_150 = arith.constant 0 : index
    %259 = vector.load %arg10[%c0_149, %c0_150] : memref<128x128xf32, #tpu.memory_space<vmem>>, vector<128x128xf32>
    %cst_151 = arith.constant dense<0.000000e+00> : vector<8x128xf32>
    %260 = tpu.matmul %258, %259, %cst_151 {dimension_numbers = #tpu.dot_dimension_numbers<[1], [0], [0], [1], [0, 0, 1, 1], [], []>} : vector<8x128xf32>, vector<128x128xf32>, vector<8x128xf32> -> vector<8x128xf32>
    %c0_152 = arith.constant 0 : index
    %c0_153 = arith.constant 0 : index
    %261 = vector.load %arg11[%c0_152, %c0_153] : memref<1x128xf32, #tpu.memory_space<vmem>>, vector<1x128xf32>
    %262 = vector.broadcast %261 : vector<1x128xf32> to vector<8x128xf32>
    %263 = arith.addf %260, %262 : vector<8x128xf32>
    %c0_154 = arith.constant 0 : index
    %c0_155 = arith.constant 0 : index
    %264 = vector.load %arg12[%c0_154, %c0_155] : memref<8x128xf32, #tpu.memory_space<vmem>>, vector<8x128xf32>
    tpu.vector_store %arg12[%c0_154, %c0_155], %263 {strides = array<i32>} : memref<8x128xf32, #tpu.memory_space<vmem>>, vector<8x128xf32>,
    return
  }
  func.func @transform_0(%arg0: i32) -> (i32, i32) {
    %c0_i32 = arith.constant 0 : i32
    %c0_i32_0 = arith.constant 0 : i32
    return %arg0, %c0_i32 : i32, i32
  }
  func.func @transform_1(%arg0: i32) -> (i32, i32, i32) {
    %c0_i32 = arith.constant 0 : i32
    %c0_i32_0 = arith.constant 0 : i32
    %c0_i32_1 = arith.constant 0 : i32
    %c0_i32_2 = arith.constant 0 : i32
    return %c0_i32, %c0_i32_0, %c0_i32_1 : i32, i32, i32
  }
  func.func @transform_2(%arg0: i32) -> (i32, i32) {
    %c0_i32 = arith.constant 0 : i32
    %c0_i32_0 = arith.constant 0 : i32
    %c0_i32_1 = arith.constant 0 : i32
    return %c0_i32, %c0_i32_0 : i32, i32
  }
  func.func @transform_3(%arg0: i32) -> (i32, i32, i32) {
    %c0_i32 = arith.constant 0 : i32
    %c0_i32_0 = arith.constant 0 : i32
    %c0_i32_1 = arith.constant 0 : i32
    %c0_i32_2 = arith.constant 0 : i32
    return %c0_i32, %c0_i32_0, %c0_i32_1 : i32, i32, i32
  }
  func.func @transform_4(%arg0: i32) -> (i32, i32) {
    %c0_i32 = arith.constant 0 : i32
    %c0_i32_0 = arith.constant 0 : i32
    %c0_i32_1 = arith.constant 0 : i32
    return %c0_i32, %c0_i32_0 : i32, i32
  }
  func.func @transform_5(%arg0: i32) -> (i32, i32, i32) {
    %c0_i32 = arith.constant 0 : i32
    %c0_i32_0 = arith.constant 0 : i32
    %c0_i32_1 = arith.constant 0 : i32
    %c0_i32_2 = arith.constant 0 : i32
    return %c0_i32, %c0_i32_0, %c0_i32_1 : i32, i32, i32
  }
  func.func @transform_6(%arg0: i32) -> (i32, i32) {
    %c0_i32 = arith.constant 0 : i32
    %c0_i32_0 = arith.constant 0 : i32
    %c0_i32_1 = arith.constant 0 : i32
    return %c0_i32, %c0_i32_0 : i32, i32
  }
  func.func @transform_7(%arg0: i32) -> (i32, i32) {
    %c0_i32 = arith.constant 0 : i32
    %c0_i32_0 = arith.constant 0 : i32
    %c0_i32_1 = arith.constant 0 : i32
    return %c0_i32, %c0_i32_0 : i32, i32
  }
  func.func @transform_8(%arg0: i32) -> (i32, i32) {
    %c0_i32 = arith.constant 0 : i32
    %c0_i32_0 = arith.constant 0 : i32
    %c0_i32_1 = arith.constant 0 : i32
    return %c0_i32, %c0_i32_0 : i32, i32
  }
  func.func @transform_9(%arg0: i32) -> (i32, i32) {
    %c0_i32 = arith.constant 0 : i32
    %c0_i32_0 = arith.constant 0 : i32
    %c0_i32_1 = arith.constant 0 : i32
    return %c0_i32, %c0_i32_0 : i32, i32
  }
  func.func @transform_10(%arg0: i32) -> (i32, i32) {
    %c0_i32 = arith.constant 0 : i32
    %c0_i32_0 = arith.constant 0 : i32
    %c0_i32_1 = arith.constant 0 : i32
    return %c0_i32, %c0_i32_0 : i32, i32
  }
  func.func @transform_11(%arg0: i32) -> (i32, i32) {
    %c0_i32 = arith.constant 0 : i32
    %c0_i32_0 = arith.constant 0 : i32
    return %arg0, %c0_i32 : i32, i32
  }
}

</mosaic_0001>

<bundles_post_ra>
// kernel: net_forward.1
= control target key start
LH: loop header
LB: loop body
LE: loop exit
PB: predicated region body
PF: predicated region fallthrough
CT: control target
= control target key end

     0   :  { %vm82_vm0 = vcmask 785408   ;;  %vm2840_vm1 = vcmask 1043456   ;;  %vm10092_vm2 = vmmov 0   ;;  %vm2818_vm3 = vcmask 687104   ;;  %s13186_s1 = inlined_call_operand.vmem [shape: f32[10,96,84], index: 1, kind: input, shape index: {}]   ;;  %s13187_s0 = inlined_call_operand.vmem [shape: f32[256,96], index: 0, kind: input, shape index: {}]   ;;  %s13188_s3 = inlined_call_operand.vmem [shape: f32[10,84,80], index: 3, kind: input, shape index: {}]   ;;  %s13189_s2 = inlined_call_operand.vmem [shape: f32[1,84], index: 2, kind: input, shape index: {}]   ;;  %s13190_s5 = inlined_call_operand.vmem [shape: f32[5,80,128], index: 5, kind: input, shape index: {}]   ;;  %s13191_s4 = inlined_call_operand.vmem [shape: f32[1,80], index: 4, kind: input, shape index: {}]   ;;  %s13192_s7 = inlined_call_operand.vmem [shape: f32[128,128], index: 7, kind: input, shape index: {}]   ;;  %s13193_s9 = inlined_call_operand.vmem [shape: f32[128,128], index: 9, kind: input, shape index: {}]   ;;  %s13194_s6 = inlined_call_operand.vmem [shape: f32[1,128], index: 6, kind: input, shape index: {}]   ;;  %s13195_s8 = inlined_call_operand.vmem [shape: f32[1,128], index: 8, kind: input, shape index: {}]   ;;  %s13196_s10 = inlined_call_operand.vmem [shape: f32[1,128], index: 10, kind: input, shape index: {}]   ;;  %s13197_s11 = inlined_call_operand.vmem [shape: f32[8,128], index: 11, kind: output, shape index: {}]  }
   0x1   :  { %v70_v0 = vld [vmem:[%s13186_s1] sm:$0xff]  ;;  %v71_v1 = vld [vmem:[%s13186_s1 + $0x8] sm:$0xff]  ;;  %v72_v5 = vld [vmem:[%s13186_s1 + $0x10] sm:$0xff]  ;;  %vm5093_vm4 = vcmask 654336  }
   0x2   :  { %v5904_v2 = vld [vmem:[%s13186_s1 + $0x1e0] sm:$0xff]  ;;  %v9087_v3 = vpack.c.bf16 %v71_v1, %v70_v0  ;;  %v5905_v4 = vld [vmem:[%s13186_s1 + $0x1e8] sm:$0xff]  ;;  %v73_v6 = vld [vmem:[%s13186_s1 + $0x18] sm:$0xff] }
   0x3   :  { %v9207_v7 = vpack.c.bf16 %v5905_v4, %v5904_v2  ;;  %v9091_v8 = vpack.c.bf16 %v73_v6, %v72_v5  ;;  %v5906_v9 = vld [vmem:[%s13186_s1 + $0x1f0] sm:$0xff]  ;;  %v5907_v10 = vld [vmem:[%s13186_s1 + $0x1f8] sm:$0xff]  ;;  %v74_v11 = vld [vmem:[%s13186_s1 + $0x20] sm:$0xff] }
   0x4   :  { %9088 = vmatprep.subr.bf16.mxu0 %v9087_v3  ;;  %v9211_v12 = vpack.c.bf16 %v5907_v10, %v5906_v9  ;;  %v75_v13 = vld [vmem:[%s13186_s1 + $0x28] sm:$0xff]  ;;  %v5908_v14 = vld [vmem:[%s13186_s1 + $0x200] sm:$0xff]  ;;  %v76_v18 = vld [vmem:[%s13186_s1 + $0x30] sm:$0xff] }
   0x5   :  { %v5909_v15 = vld [vmem:[%s13186_s1 + $0x208] sm:$0xff]  ;;  %9208 = vmatprep.subr.bf16.mxu1 %v9207_v7  ;;  %9090 = vmatpush3.bf16.msra.mxu0 %v9087_v3  ;;  %v9095_v16 = vpack.c.bf16 %v75_v13, %v74_v11  ;;  %v77_v19 = vld [vmem:[%s13186_s1 + $0x38] sm:$0xff]  ;;  %v5910_v20 = vld [vmem:[%s13186_s1 + $0x210] sm:$0xff] }
   0x6   :  { %9210 = vmatpush3.bf16.msra.mxu1 %v9207_v7  ;;  %9092 = vmatprep.subr.bf16.mxu0 %v9091_v8  ;;  %v9215_v17 = vpack.c.bf16 %v5909_v15, %v5908_v14  ;;  %v5911_v21 = vld [vmem:[%s13186_s1 + $0x218] sm:$0xff]  ;;  %v10204_v22 = vld [vmem:[%s13187_s0] sm:$0xff]  ;;  %v9099_v23 = vpack.c.bf16 %v77_v19, %v76_v18  ;;  %v79_v26 = vld [vmem:[%s13186_s1 + $0x48] sm:$0xff] }
   0x7   :  { %9212 = vmatprep.subr.bf16.mxu1 %v9211_v12  ;;  %v9219_v24 = vpack.c.bf16 %v5911_v21, %v5910_v20  ;;  %v78_v25 = vld [vmem:[%s13186_s1 + $0x40] sm:$0xff]  ;;  %7346 = vmatprep.mubr.msk.f32.mxu0 %vm82_vm0, %v10204_v22  ;;  %v5913_v28 = vld [vmem:[%s13186_s1 + $0x228] sm:$0xff]  ;;  %v80_v31 = vld [vmem:[%s13186_s1 + $0x50] sm:$0xff] }
   0x8   :  { %v5912_v27 = vld [vmem:[%s13186_s1 + $0x220] sm:$0xff]  ;;  %7706 = vmatprep.mubr.msk.f32.mxu1 %vm82_vm0, %v10204_v22  ;;  %v9103_v29 = vpack.c.bf16 %v79_v26, %v78_v25  ;;  %v81_v32 = vld [vmem:[%s13186_s1 + $0x58] sm:$0xff]  ;;  %v5914_v33 = vld [vmem:[%s13186_s1 + $0x230] sm:$0xff] }
   0x9   :  { %9094 = vmatpush3.bf16.msra.mxu0 %v9091_v8  ;;  %v9223_v30 = vpack.c.bf16 %v5913_v28, %v5912_v27  ;;  %v5915_v34 = vld [vmem:[%s13186_s1 + $0x238] sm:$0xff]  ;;  %v9107_v35 = vpack.c.bf16 %v81_v32, %v80_v31  ;;  %v5728_v37 = vld [vmem:[%s13186_s1 + $0x60] sm:$0xff]  ;;  %v5729_v38 = vld [vmem:[%s13186_s1 + $0x68] sm:$0xff] }
   0xa   :  { %9214 = vmatpush3.bf16.msra.mxu1 %v9211_v12  ;;  %9096 = vmatprep.subr.bf16.mxu0 %v9095_v16  ;;  %v9227_v36 = vpack.c.bf16 %v5915_v34, %v5914_v33  ;;  %v5948_v39 = vld [vmem:[%s13186_s1 + $0x240] sm:$0xff]  ;;  %v5949_v40 = vld [vmem:[%s13186_s1 + $0x248] sm:$0xff]  ;;  %v9111_v41 = vpack.c.bf16 %v5729_v38, %v5728_v37  ;;  %v5730_v43 = vld [vmem:[%s13186_s1 + $0x70] sm:$0xff] }
   0xb   :  { %9216 = vmatprep.subr.bf16.mxu1 %v9215_v17  ;;  %v9231_v42 = vpack.c.bf16 %v5949_v40, %v5948_v39  ;;  %v5731_v44 = vld [vmem:[%s13186_s1 + $0x78] sm:$0xff]  ;;  %v10255_v45 = vld [vmem:[%s13187_s0 + $0x8] sm:$0xff]  ;;  %v5950_v46 = vld [vmem:[%s13186_s1 + $0x250] sm:$0xff] }
   0xc   :  { %v5951_v47 = vld [vmem:[%s13186_s1 + $0x258] sm:$0xff]  ;;  %v10266_v48 = vld [vmem:[%s13187_s0 + $0x10] sm:$0xff]  ;;  %v9115_v49 = vpack.c.bf16 %v5731_v44, %v5730_v43  ;;  %v5732_v51 = vld [vmem:[%s13186_s1 + $0x80] sm:$0xff] }
   0xd   :  { %9098 = vmatpush3.bf16.msra.mxu0 %v9095_v16  ;;  %v9235_v50 = vpack.c.bf16 %v5951_v47, %v5950_v46  ;;  %v5733_v52 = vld [vmem:[%s13186_s1 + $0x88] sm:$0xff]  ;;  %v10281_v53 = vld [vmem:[%s13187_s0 + $0x18] sm:$0xff]  ;;  %v5952_v54 = vld [vmem:[%s13186_s1 + $0x260] sm:$0xff] }
   0xe   :  { %9218 = vmatpush3.bf16.msra.mxu1 %v9215_v17  ;;  %9100 = vmatprep.subr.bf16.mxu0 %v9099_v23  ;;  %v5953_v55 = vld [vmem:[%s13186_s1 + $0x268] sm:$0xff]  ;;  %v10294_v56 = vld [vmem:[%s13187_s0 + $0x20] sm:$0xff]  ;;  %v9119_v57 = vpack.c.bf16 %v5733_v52, %v5732_v51  ;;  %v5734_v59 = vld [vmem:[%s13186_s1 + $0x90] sm:$0xff] }
   0xf   :  { %9220 = vmatprep.subr.bf16.mxu1 %v9219_v24  ;;  %v9239_v58 = vpack.c.bf16 %v5953_v55, %v5952_v54  ;;  %v5735_v60 = vld [vmem:[%s13186_s1 + $0x98] sm:$0xff]  ;;  %v10313_v61 = vld [vmem:[%s13187_s0 + $0x28] sm:$0xff]  ;;  %v5954_v62 = vld [vmem:[%s13186_s1 + $0x270] sm:$0xff] }
  0x10   :  { %v5955_v63 = vld [vmem:[%s13186_s1 + $0x278] sm:$0xff]  ;;  %v10326_v0 = vld [vmem:[%s13187_s0 + $0x30] sm:$0xff]  ;;  %v9123_v1 = vpack.c.bf16 %v5735_v60, %v5734_v59  ;;  %v5736_v3 = vld [vmem:[%s13186_s1 + $0xa0] sm:$0xff] }
  0x11   :  { %9102 = vmatpush3.bf16.msra.mxu0 %v9099_v23  ;;  %v9243_v2 = vpack.c.bf16 %v5955_v63, %v5954_v62  ;;  %v5737_v4 = vld [vmem:[%s13186_s1 + $0xa8] sm:$0xff]  ;;  %v10343_v5 = vld [vmem:[%s13187_s0 + $0x38] sm:$0xff]  ;;  %v5956_v6 = vld [vmem:[%s13186_s1 + $0x280] sm:$0xff] }
  0x12   :  { %9222 = vmatpush3.bf16.msra.mxu1 %v9219_v24  ;;  %9104 = vmatprep.subr.bf16.mxu0 %v9103_v29  ;;  %v5957_v7 = vld [vmem:[%s13186_s1 + $0x288] sm:$0xff]  ;;  %v10356_v8 = vld [vmem:[%s13187_s0 + $0x40] sm:$0xff]  ;;  %v9127_v9 = vpack.c.bf16 %v5737_v4, %v5736_v3  ;;  %v5738_v11 = vld [vmem:[%s13186_s1 + $0xb0] sm:$0xff] }
  0x13   :  { %9224 = vmatprep.subr.bf16.mxu1 %v9223_v30  ;;  %v9247_v10 = vpack.c.bf16 %v5957_v7, %v5956_v6  ;;  %v5739_v12 = vld [vmem:[%s13186_s1 + $0xb8] sm:$0xff]  ;;  %v10373_v13 = vld [vmem:[%s13187_s0 + $0x48] sm:$0xff]  ;;  %v5958_v14 = vld [vmem:[%s13186_s1 + $0x290] sm:$0xff] }
  0x14   :  { %v5959_v15 = vld [vmem:[%s13186_s1 + $0x298] sm:$0xff]  ;;  %v10386_v16 = vld [vmem:[%s13187_s0 + $0x50] sm:$0xff]  ;;  %v9131_v17 = vpack.c.bf16 %v5739_v12, %v5738_v11  ;;  %v5772_v19 = vld [vmem:[%s13186_s1 + $0xc0] sm:$0xff] }
  0x15   :  { %9106 = vmatpush3.bf16.msra.mxu0 %v9103_v29  ;;  %v9251_v18 = vpack.c.bf16 %v5959_v15, %v5958_v14  ;;  %v5773_v20 = vld [vmem:[%s13186_s1 + $0xc8] sm:$0xff]  ;;  %v10403_v21 = vld [vmem:[%s13187_s0 + $0x58] sm:$0xff]  ;;  %v5992_v23 = vld [vmem:[%s13186_s1 + $0x2a0] sm:$0xff] }
  0x16   :  { %9226 = vmatpush3.bf16.msra.mxu1 %v9223_v30  ;;  %9108 = vmatprep.subr.bf16.mxu0 %v9107_v35  ;;  %v5993_v24 = vld [vmem:[%s13186_s1 + $0x2a8] sm:$0xff]  ;;  %v10416_v25 = vld [vmem:[%s13187_s0 + $0x60] sm:$0xff]  ;;  %v10418_v26 = vpack.c.bf16 %v5773_v20, %v5772_v19  ;;  %v10438_v29 = vld [vmem:[%s13187_s0 + $0x70] sm:$0xff] }
  0x17   :  { %9228 = vmatprep.subr.bf16.mxu1 %v9227_v36  ;;  %v10422_v27 = vpack.c.bf16 %v5993_v24, %v5992_v23  ;;  %v10431_v28 = vld [vmem:[%s13187_s0 + $0x68] sm:$0xff]  ;;  %v10451_v30 = vld [vmem:[%s13187_s0 + $0x78] sm:$0xff]  ;;  %v10458_v31 = vld [vmem:[%s13187_s0 + $0x80] sm:$0xff] }
  0x18   :  { %v10469_v32 = vld [vmem:[%s13187_s0 + $0x88] sm:$0xff]  ;;  %v10476_v33 = vld [vmem:[%s13187_s0 + $0x90] sm:$0xff]  ;;  %v10487_v34 = vld [vmem:[%s13187_s0 + $0x98] sm:$0xff] }
  0x19   :  { %9110 = vmatpush3.bf16.msra.mxu0 %v9107_v35  ;;  %v10494_v35 = vld [vmem:[%s13187_s0 + $0xa0] sm:$0xff]  ;;  %v10512_v37 = vld [vmem:[%s13187_s0 + $0xb0] sm:$0xff]  ;;  %v10523_v38 = vld [vmem:[%s13187_s0 + $0xb8] sm:$0xff] }
  0x1a   :  { %9230 = vmatpush3.bf16.msra.mxu1 %v9227_v36  ;;  %9112 = vmatprep.subr.bf16.mxu0 %v9111_v41  ;;  %v10505_v36 = vld [vmem:[%s13187_s0 + $0xa8] sm:$0xff]  ;;  %v10530_v39 = vld [vmem:[%s13187_s0 + $0xc0] sm:$0xff]  ;;  %v10584_v46 = vld [vmem:[%s13187_s0 + $0xf0] sm:$0xff] }
  0x1b   :  { %9232 = vmatprep.subr.bf16.mxu1 %v9231_v42  ;;  %v10541_v40 = vld [vmem:[%s13187_s0 + $0xc8] sm:$0xff]  ;;  %v10566_v43 = vld [vmem:[%s13187_s0 + $0xe0] sm:$0xff]  ;;  %v10595_v47 = vld [vmem:[%s13187_s0 + $0xf8] sm:$0xff] }
  0x1c   :  { %7347 = vmatmul.mubr.msk.f32.vlgmr.msra.gmra.mrb[0].mxu0 %vm82_vm0, %v10255_v45  ;;  %v10577_v44 = vld [vmem:[%s13187_s0 + $0xe8] sm:$0xff]  ;;  %v5994_v51 = vld [vmem:[%s13186_s1 + $0x2b0] sm:$0xff]  ;;  %v5995_v52 = vld [vmem:[%s13186_s1 + $0x2b8] sm:$0xff] }
  0x1d   :  { %7707 = vmatmul.mubr.msk.f32.vlgmr.msra.gmra.mrb[0].mxu1 %vm82_vm0, %v10255_v45  ;;  %9114 = vmatpush3.bf16.msra.mxu0 %v9111_v41  ;;  %v10548_v41 = vld [vmem:[%s13187_s0 + $0xd0] sm:$0xff]  ;;  %v9259_v55 = vpack.c.bf16 %v5995_v52, %v5994_v51  ;;  %v5996_v59 = vld [vmem:[%s13186_s1 + $0x2c0] sm:$0xff]  ;;  %v5997_v60 = vld [vmem:[%s13186_s1 + $0x2c8] sm:$0xff] }
  0x1e   :  { %9234 = vmatpush3.bf16.msra.mxu1 %v9231_v42  ;;  %7349 = vmatprep.mubr.msk.f32.mxu0 %vm82_vm0, %v10266_v48  ;;  %v10559_v42 = vld [vmem:[%s13187_s0 + $0xd8] sm:$0xff]  ;;  %v9263_v63 = vpack.c.bf16 %v5997_v60, %v5996_v59  ;;  %v5998_v3 = vld [vmem:[%s13186_s1 + $0x2d0] sm:$0xff]  ;;  %v6000_v11 = vld [vmem:[%s13186_s1 + $0x2e0] sm:$0xff] }
  0x1f   :  { %7709 = vmatprep.mubr.msk.f32.mxu1 %vm82_vm0, %v10266_v48  ;;  %9116 = vmatprep.subr.bf16.mxu0 %v9115_v49  ;;  %v5999_v4 = vld [vmem:[%s13186_s1 + $0x2d8] sm:$0xff]  ;;  %v6001_v12 = vld [vmem:[%s13186_s1 + $0x2e8] sm:$0xff]  ;;  %v6002_v19 = vld [vmem:[%s13186_s1 + $0x2f0] sm:$0xff] }
  0x20   :  { %7350 = vmatmul.mubr.msk.f32.gmra.mrb[2].mxu0 %vm82_vm0, %v10281_v53  ;;  %9236 = vmatprep.subr.bf16.mxu1 %v9235_v50  ;;  %v9267_v7 = vpack.c.bf16 %v5999_v4, %v5998_v3  ;;  %v9271_v15 = vpack.c.bf16 %v6001_v12, %v6000_v11  ;;  %v6003_v20 = vld [vmem:[%s13186_s1 + $0x2f8] sm:$0xff] }
  0x21   :  { %7710 = vmatmul.mubr.msk.f32.gmra.mrb[2].mxu1 %vm82_vm0, %v10281_v53  ;;  %7352 = vmatprep.mubr.msk.f32.mxu0 %vm82_vm0, %v10294_v56  ;;  %v9275_v24 = vpack.c.bf16 %v6003_v20, %v6002_v19 }
  0x22   :  { %7712 = vmatprep.mubr.msk.f32.mxu1 %vm82_vm0, %v10294_v56  ;;  %9118 = vmatpush3.bf16.msra.mxu0 %v9115_v49  ;;  %v5774_v49 = vld [vmem:[%s13186_s1 + $0xd0] sm:$0xff] }
  0x23   :  { %9238 = vmatpush3.bf16.msra.mxu1 %v9235_v50  ;;  %9120 = vmatprep.subr.bf16.mxu0 %v9119_v57  ;;  %v5775_v50 = vld [vmem:[%s13186_s1 + $0xd8] sm:$0xff] }
  0x24   :  { %7353 = vmatmul.mubr.msk.f32.gmra.mrb[4].mxu0 %vm82_vm0, %v10313_v61  ;;  %9240 = vmatprep.subr.bf16.mxu1 %v9239_v58  ;;  %v9139_v54 = vpack.c.bf16 %v5775_v50, %v5774_v49  ;;  %v6036_v49 = vld [vmem:[%s13186_s1 + $0x300] sm:$0xff]  ;;  %v6037_v50 = vld [vmem:[%s13186_s1 + $0x308] sm:$0xff] }
  0x25   :  { %7713 = vmatmul.mubr.msk.f32.gmra.mrb[4].mxu1 %vm82_vm0, %v10313_v61  ;;  %7355 = vmatprep.mubr.msk.f32.mxu0 %vm82_vm0, %v10326_v0  ;;  %v9279_v52 = vpack.c.bf16 %v6037_v50, %v6036_v49 }
  0x26   :  { %7715 = vmatprep.mubr.msk.f32.mxu1 %vm82_vm0, %v10326_v0  ;;  %9122 = vmatpush3.bf16.msra.mxu0 %v9119_v57  ;;  %v5776_v57 = vld [vmem:[%s13186_s1 + $0xe0] sm:$0xff] }
  0x27   :  { %9242 = vmatpush3.bf16.msra.mxu1 %v9239_v58  ;;  %9124 = vmatprep.subr.bf16.mxu0 %v9123_v1  ;;  %v5777_v58 = vld [vmem:[%s13186_s1 + $0xe8] sm:$0xff] }
  0x28   :  { %7356 = vmatmul.mubr.msk.f32.gmra.mrb[6].mxu0 %vm82_vm0, %v10343_v5  ;;  %9244 = vmatprep.subr.bf16.mxu1 %v9243_v2  ;;  %v9143_v62 = vpack.c.bf16 %v5777_v58, %v5776_v57  ;;  %v6038_v57 = vld [vmem:[%s13186_s1 + $0x310] sm:$0xff]  ;;  %v6039_v58 = vld [vmem:[%s13186_s1 + $0x318] sm:$0xff] }
  0x29   :  { %7716 = vmatmul.mubr.msk.f32.gmra.mrb[6].mxu1 %vm82_vm0, %v10343_v5  ;;  %7358 = vmatprep.mubr.msk.f32.mxu0 %vm82_vm0, %v10356_v8  ;;  %v9283_v60 = vpack.c.bf16 %v6039_v58, %v6038_v57 }
  0x2a   :  { %7718 = vmatprep.mubr.msk.f32.mxu1 %vm82_vm0, %v10356_v8  ;;  %9126 = vmatpush3.bf16.msra.mxu0 %v9123_v1  ;;  %v5778_v1 = vld [vmem:[%s13186_s1 + $0xf0] sm:$0xff] }
  0x2b   :  { %9246 = vmatpush3.bf16.msra.mxu1 %v9243_v2  ;;  %9128 = vmatprep.subr.bf16.mxu0 %v9127_v9  ;;  %v5779_v2 = vld [vmem:[%s13186_s1 + $0xf8] sm:$0xff] }
  0x2c   :  { %7359 = vmatmul.mubr.msk.f32.gmra.mrb[8].mxu0 %vm82_vm0, %v10373_v13  ;;  %9248 = vmatprep.subr.bf16.mxu1 %v9247_v10  ;;  %v9147_v6 = vpack.c.bf16 %v5779_v2, %v5778_v1  ;;  %v6040_v1 = vld [vmem:[%s13186_s1 + $0x320] sm:$0xff]  ;;  %v6041_v2 = vld [vmem:[%s13186_s1 + $0x328] sm:$0xff] }
  0x2d   :  { %7719 = vmatmul.mubr.msk.f32.gmra.mrb[8].mxu1 %vm82_vm0, %v10373_v13  ;;  %7361 = vmatprep.mubr.msk.f32.mxu0 %vm82_vm0, %v10386_v16  ;;  %v9287_v4 = vpack.c.bf16 %v6041_v2, %v6040_v1 }
  0x2e   :  { %7721 = vmatprep.mubr.msk.f32.mxu1 %vm82_vm0, %v10386_v16  ;;  %9130 = vmatpush3.bf16.msra.mxu0 %v9127_v9  ;;  %v5780_v9 = vld [vmem:[%s13186_s1 + $0x100] sm:$0xff] }
  0x2f   :  { %9250 = vmatpush3.bf16.msra.mxu1 %v9247_v10  ;;  %9132 = vmatprep.subr.bf16.mxu0 %v9131_v17  ;;  %v5781_v10 = vld [vmem:[%s13186_s1 + $0x108] sm:$0xff] }
  0x30   :  { %7362 = vmatmul.mubr.msk.f32.gmra.mrb[10].mxu0 %vm82_vm0, %v10403_v21  ;;  %9252 = vmatprep.subr.bf16.mxu1 %v9251_v18  ;;  %v9151_v14 = vpack.c.bf16 %v5781_v10, %v5780_v9  ;;  %v6042_v9 = vld [vmem:[%s13186_s1 + $0x330] sm:$0xff]  ;;  %v6043_v10 = vld [vmem:[%s13186_s1 + $0x338] sm:$0xff] }
  0x31   :  { %7722 = vmatmul.mubr.msk.f32.gmra.mrb[10].mxu1 %vm82_vm0, %v10403_v21  ;;  %7364 = vmatprep.mubr.msk.f32.mxu0 %vm82_vm0, %v10416_v25  ;;  %v9291_v12 = vpack.c.bf16 %v6043_v10, %v6042_v9  ;;  %v5866_v9 = vld [vmem:[%s13186_s1 + $0x1b0] sm:$0xff]  ;;  %v5867_v10 = vld [vmem:[%s13186_s1 + $0x1b8] sm:$0xff] }
  0x32   :  { %7724 = vmatprep.mubr.msk.f32.mxu1 %vm82_vm0, %v10416_v25  ;;  %9134 = vmatpush3.bf16.msra.mxu0 %v9131_v17  ;;  %v5782_v17 = vld [vmem:[%s13186_s1 + $0x110] sm:$0xff] }
  0x33   :  { %9254 = vmatpush3.bf16.msra.mxu1 %v9251_v18  ;;  %9136 = vmatprep.subr.bf16.mxu0 %v10418_v26  ;;  %v5783_v18 = vld [vmem:[%s13186_s1 + $0x118] sm:$0xff] }
  0x34   :  { %7365 = vmatmul.mubr.msk.f32.gmra.mrb[12].mxu0 %vm82_vm0, %v10431_v28  ;;  %9256 = vmatprep.subr.bf16.mxu1 %v10422_v27  ;;  %v9155_v23 = vpack.c.bf16 %v5783_v18, %v5782_v17  ;;  %v6044_v17 = vld [vmem:[%s13186_s1 + $0x340] sm:$0xff]  ;;  %v6045_v18 = vld [vmem:[%s13186_s1 + $0x348] sm:$0xff] }
  0x35   :  { %7725 = vmatmul.mubr.msk.f32.gmra.mrb[12].mxu1 %vm82_vm0, %v10431_v28  ;;  %7367 = vmatprep.mubr.msk.f32.mxu0 %vm82_vm0, %v10438_v29  ;;  %v9295_v20 = vpack.c.bf16 %v6045_v18, %v6044_v17  ;;  %v6088_v17 = vld [vmem:[%s13186_s1 + $0x3a0] sm:$0xff]  ;;  %v6089_v18 = vld [vmem:[%s13186_s1 + $0x3a8] sm:$0xff] }
  0x36   :  { %7727 = vmatprep.mubr.msk.f32.mxu1 %vm82_vm0, %v10438_v29 }
  0x38   :  { %7368 = vmatmul.mubr.msk.f32.gmra.mrb[14].mxu0 %vm82_vm0, %v10451_v30 }
  0x39   :  { %7728 = vmatmul.mubr.msk.f32.gmra.mrb[14].mxu1 %vm82_vm0, %v10451_v30  ;;  %7370 = vmatprep.mubr.msk.f32.mxu0 %vm82_vm0, %v10458_v31 }
  0x3a   :  { %7730 = vmatprep.mubr.msk.f32.mxu1 %vm82_vm0, %v10458_v31 }
  0x3c   :  { %7371 = vmatmul.mubr.msk.f32.gmra.mrb[16].mxu0 %vm82_vm0, %v10469_v32 }
  0x3d   :  { %7731 = vmatmul.mubr.msk.f32.gmra.mrb[16].mxu1 %vm82_vm0, %v10469_v32  ;;  %7373 = vmatprep.mubr.msk.f32.mxu0 %vm82_vm0, %v10476_v33 }
  0x3e   :  { %7733 = vmatprep.mubr.msk.f32.mxu1 %vm82_vm0, %v10476_v33 }
  0x40   :  { %7374 = vmatmul.mubr.msk.f32.gmra.mrb[18].mxu0 %vm82_vm0, %v10487_v34 }
  0x41   :  { %7734 = vmatmul.mubr.msk.f32.gmra.mrb[18].mxu1 %vm82_vm0, %v10487_v34  ;;  %7376 = vmatprep.mubr.msk.f32.mxu0 %vm82_vm0, %v10494_v35 }
  0x42   :  { %7736 = vmatprep.mubr.msk.f32.mxu1 %vm82_vm0, %v10494_v35 }
  0x44   :  { %7377 = vmatmul.mubr.msk.f32.gmra.mrb[20].mxu0 %vm82_vm0, %v10505_v36 }
  0x45   :  { %7737 = vmatmul.mubr.msk.f32.gmra.mrb[20].mxu1 %vm82_vm0, %v10505_v36  ;;  %7379 = vmatprep.mubr.msk.f32.mxu0 %vm82_vm0, %v10512_v37 }
  0x46   :  { %7739 = vmatprep.mubr.msk.f32.mxu1 %vm82_vm0, %v10512_v37 }
  0x48   :  { %7380 = vmatmul.mubr.msk.f32.gmra.mrb[22].mxu0 %vm82_vm0, %v10523_v38 }
  0x49   :  { %7740 = vmatmul.mubr.msk.f32.gmra.mrb[22].mxu1 %vm82_vm0, %v10523_v38  ;;  %7382 = vmatprep.mubr.msk.f32.mxu0 %vm82_vm0, %v10530_v39 }
  0x4a   :  { %7742 = vmatprep.mubr.msk.f32.mxu1 %vm82_vm0, %v10530_v39 }
  0x4c   :  { %7383 = vmatmul.mubr.msk.f32.gmra.mrb[24].mxu0 %vm82_vm0, %v10541_v40 }
  0x4d   :  { %7743 = vmatmul.mubr.msk.f32.gmra.mrb[24].mxu1 %vm82_vm0, %v10541_v40  ;;  %7385 = vmatprep.mubr.msk.f32.mxu0 %vm82_vm0, %v10548_v41 }
  0x4e   :  { %7745 = vmatprep.mubr.msk.f32.mxu1 %vm82_vm0, %v10548_v41 }
  0x50   :  { %7386 = vmatmul.mubr.msk.f32.gmra.mrb[26].mxu0 %vm82_vm0, %v10559_v42 }
  0x51   :  { %7746 = vmatmul.mubr.msk.f32.gmra.mrb[26].mxu1 %vm82_vm0, %v10559_v42  ;;  %7388 = vmatprep.mubr.msk.f32.mxu0 %vm82_vm0, %v10566_v43 }
  0x52   :  { %7748 = vmatprep.mubr.msk.f32.mxu1 %vm82_vm0, %v10566_v43 }
  0x54   :  { %7389 = vmatmul.mubr.msk.f32.gmra.mrb[28].mxu0 %vm82_vm0, %v10577_v44 }
  0x55   :  { %7749 = vmatmul.mubr.msk.f32.gmra.mrb[28].mxu1 %vm82_vm0, %v10577_v44  ;;  %7391 = vmatprep.mubr.msk.f32.mxu0 %vm82_vm0, %v10584_v46 }
  0x56   :  { %7751 = vmatprep.mubr.msk.f32.mxu1 %vm82_vm0, %v10584_v46 }
  0x58   :  { %7392 = vmatmul.mubr.msk.f32.gmra.mrb[30].mxu0 %vm82_vm0, %v10595_v47 }
  0x59   :  { %7752 = vmatmul.mubr.msk.f32.gmra.mrb[30].mxu1 %vm82_vm0, %v10595_v47  ;;  %7418 = vmatprep.mubr.msk.f32.mxu0 %vm82_vm0, %v10204_v22 }
  0x5a   :  { %7778 = vmatprep.mubr.msk.f32.mxu1 %vm82_vm0, %v10204_v22 }
  0x5c   :  { %7419 = vmatmul.mubr.msk.f32.vlgmr.msra.gmra.mrb[32].mxu0 %vm82_vm0, %v10255_v45 }
  0x5d   :  { %7779 = vmatmul.mubr.msk.f32.vlgmr.msra.gmra.mrb[32].mxu1 %vm82_vm0, %v10255_v45  ;;  %9138 = vmatpush3.bf16.msra.mxu0 %v10418_v26  ;;  %v5816_v26 = vld [vmem:[%s13186_s1 + $0x120] sm:$0xff] }
  0x5e   :  { %9258 = vmatpush3.bf16.msra.mxu1 %v10422_v27  ;;  %7421 = vmatprep.mubr.msk.f32.mxu0 %vm82_vm0, %v10266_v48  ;;  %v5817_v27 = vld [vmem:[%s13186_s1 + $0x128] sm:$0xff] }
  0x5f   :  { %7781 = vmatprep.mubr.msk.f32.mxu1 %vm82_vm0, %v10266_v48  ;;  %9140 = vmatprep.subr.bf16.mxu0 %v9139_v54  ;;  %v9159_v51 = vpack.c.bf16 %v5817_v27, %v5816_v26  ;;  %v6046_v26 = vld [vmem:[%s13186_s1 + $0x350] sm:$0xff]  ;;  %v6047_v27 = vld [vmem:[%s13186_s1 + $0x358] sm:$0xff] }
  0x60   :  { %7422 = vmatmul.mubr.msk.f32.gmra.mrb[34].mxu0 %vm82_vm0, %v10281_v53  ;;  %9260 = vmatprep.subr.bf16.mxu1 %v9259_v55  ;;  %v9299_v50 = vpack.c.bf16 %v6047_v27, %v6046_v26  ;;  %v6090_v26 = vld [vmem:[%s13186_s1 + $0x3b0] sm:$0xff]  ;;  %v6091_v27 = vld [vmem:[%s13186_s1 + $0x3b8] sm:$0xff] }
  0x61   :  { %7782 = vmatmul.mubr.msk.f32.gmra.mrb[34].mxu1 %vm82_vm0, %v10281_v53  ;;  %7424 = vmatprep.mubr.msk.f32.mxu0 %vm82_vm0, %v10294_v56 }
  0x62   :  { %7784 = vmatprep.mubr.msk.f32.mxu1 %vm82_vm0, %v10294_v56  ;;  %9142 = vmatpush3.bf16.msra.mxu0 %v9139_v54  ;;  %v5818_v54 = vld [vmem:[%s13186_s1 + $0x130] sm:$0xff] }
  0x63   :  { %9262 = vmatpush3.bf16.msra.mxu1 %v9259_v55  ;;  %9144 = vmatprep.subr.bf16.mxu0 %v9143_v62  ;;  %v5819_v55 = vld [vmem:[%s13186_s1 + $0x138] sm:$0xff] }
  0x64   :  { %7425 = vmatmul.mubr.msk.f32.gmra.mrb[36].mxu0 %vm82_vm0, %v10313_v61  ;;  %9264 = vmatprep.subr.bf16.mxu1 %v9263_v63  ;;  %v9163_v59 = vpack.c.bf16 %v5819_v55, %v5818_v54  ;;  %v6080_v54 = vld [vmem:[%s13186_s1 + $0x360] sm:$0xff]  ;;  %v6081_v55 = vld [vmem:[%s13186_s1 + $0x368] sm:$0xff] }
  0x65   :  { %7785 = vmatmul.mubr.msk.f32.gmra.mrb[36].mxu1 %vm82_vm0, %v10313_v61  ;;  %7427 = vmatprep.mubr.msk.f32.mxu0 %vm82_vm0, %v10326_v0  ;;  %v9303_v58 = vpack.c.bf16 %v6081_v55, %v6080_v54  ;;  %v10087_v54 = vld [vmem:[%s13187_s0 + $0x10] sm:$0xff] }
  0x66   :  { %7787 = vmatprep.mubr.msk.f32.mxu1 %vm82_vm0, %v10326_v0  ;;  %9146 = vmatpush3.bf16.msra.mxu0 %v9143_v62  ;;  %v5820_v62 = vld [vmem:[%s13186_s1 + $0x140] sm:$0xff] }
  0x67   :  { %9266 = vmatpush3.bf16.msra.mxu1 %v9263_v63  ;;  %9148 = vmatprep.subr.bf16.mxu0 %v9147_v6  ;;  %v5821_v63 = vld [vmem:[%s13186_s1 + $0x148] sm:$0xff] }
  0x68   :  { %7428 = vmatmul.mubr.msk.f32.gmra.mrb[38].mxu0 %vm82_vm0, %v10343_v5  ;;  %9268 = vmatprep.subr.bf16.mxu1 %v9267_v7  ;;  %v9167_v3 = vpack.c.bf16 %v5821_v63, %v5820_v62  ;;  %v6082_v62 = vld [vmem:[%s13186_s1 + $0x370] sm:$0xff]  ;;  %v6083_v63 = vld [vmem:[%s13186_s1 + $0x378] sm:$0xff] }
  0x69   :  { %7788 = vmatmul.mubr.msk.f32.gmra.mrb[38].mxu1 %vm82_vm0, %v10343_v5  ;;  %7430 = vmatprep.mubr.msk.f32.mxu0 %vm82_vm0, %v10356_v8  ;;  %v9307_v2 = vpack.c.bf16 %v6083_v63, %v6082_v62  ;;  %v10089_v62 = vld [vmem:[%s13187_s0 + $0x20] sm:$0xff] }
  0x6a   :  { %7790 = vmatprep.mubr.msk.f32.mxu1 %vm82_vm0, %v10356_v8  ;;  %9150 = vmatpush3.bf16.msra.mxu0 %v9147_v6  ;;  %v5822_v6 = vld [vmem:[%s13186_s1 + $0x150] sm:$0xff] }
  0x6b   :  { %9270 = vmatpush3.bf16.msra.mxu1 %v9267_v7  ;;  %9152 = vmatprep.subr.bf16.mxu0 %v9151_v14  ;;  %v5823_v7 = vld [vmem:[%s13186_s1 + $0x158] sm:$0xff] }
  0x6c   :  { %7431 = vmatmul.mubr.msk.f32.gmra.mrb[0].mxu0 %vm82_vm0, %v10373_v13  ;;  %9272 = vmatprep.subr.bf16.mxu1 %v9271_v15  ;;  %v9171_v11 = vpack.c.bf16 %v5823_v7, %v5822_v6  ;;  %v6085_v6 = vld [vmem:[%s13186_s1 + $0x388] sm:$0xff] }
  0x6d   :  { %7791 = vmatmul.mubr.msk.f32.gmra.mrb[0].mxu1 %vm82_vm0, %v10373_v13  ;;  %7433 = vmatprep.mubr.msk.f32.mxu0 %vm82_vm0, %v10386_v16 }
  0x6e   :  { %7793 = vmatprep.mubr.msk.f32.mxu1 %vm82_vm0, %v10386_v16  ;;  %9154 = vmatpush3.bf16.msra.mxu0 %v9151_v14  ;;  %v5824_v14 = vld [vmem:[%s13186_s1 + $0x160] sm:$0xff] }
  0x6f   :  { %9274 = vmatpush3.bf16.msra.mxu1 %v9271_v15  ;;  %9156 = vmatprep.subr.bf16.mxu0 %v9155_v23  ;;  %v5825_v15 = vld [vmem:[%s13186_s1 + $0x168] sm:$0xff] }
  0x70   :  { %7434 = vmatmul.mubr.msk.f32.gmra.mrb[2].mxu0 %vm82_vm0, %v10403_v21  ;;  %9276 = vmatprep.subr.bf16.mxu1 %v9275_v24  ;;  %v9175_v19 = vpack.c.bf16 %v5825_v15, %v5824_v14  ;;  %v5868_v14 = vld [vmem:[%s13186_s1 + $0x1c0] sm:$0xff]  ;;  %v5869_v15 = vld [vmem:[%s13186_s1 + $0x1c8] sm:$0xff] }
  0x71   :  { %7794 = vmatmul.mubr.msk.f32.gmra.mrb[2].mxu1 %vm82_vm0, %v10403_v21  ;;  %7436 = vmatprep.mubr.msk.f32.mxu0 %vm82_vm0, %v10416_v25 }
  0x72   :  { %7796 = vmatprep.mubr.msk.f32.mxu1 %vm82_vm0, %v10416_v25  ;;  %9158 = vmatpush3.bf16.msra.mxu0 %v9155_v23  ;;  %v5826_v23 = vld [vmem:[%s13186_s1 + $0x170] sm:$0xff] }
  0x73   :  { %9278 = vmatpush3.bf16.msra.mxu1 %v9275_v24  ;;  %9160 = vmatprep.subr.bf16.mxu0 %v9159_v51  ;;  %v5827_v24 = vld [vmem:[%s13186_s1 + $0x178] sm:$0xff] }
  0x74   :  { %7437 = vmatmul.mubr.msk.f32.gmra.mrb[4].mxu0 %vm82_vm0, %v10431_v28  ;;  %9280 = vmatprep.subr.bf16.mxu1 %v9279_v52  ;;  %v9179_v49 = vpack.c.bf16 %v5827_v24, %v5826_v23  ;;  %v5870_v23 = vld [vmem:[%s13186_s1 + $0x1d0] sm:$0xff]  ;;  %v5871_v24 = vld [vmem:[%s13186_s1 + $0x1d8] sm:$0xff] }
  0x75   :  { %7797 = vmatmul.mubr.msk.f32.gmra.mrb[4].mxu1 %vm82_vm0, %v10431_v28  ;;  %7439 = vmatprep.mubr.msk.f32.mxu0 %vm82_vm0, %v10438_v29 }
  0x76   :  { %7799 = vmatprep.mubr.msk.f32.mxu1 %vm82_vm0, %v10438_v29 }
  0x78   :  { %7440 = vmatmul.mubr.msk.f32.gmra.mrb[6].mxu0 %vm82_vm0, %v10451_v30 }
  0x79   :  { %7800 = vmatmul.mubr.msk.f32.gmra.mrb[6].mxu1 %vm82_vm0, %v10451_v30  ;;  %7442 = vmatprep.mubr.msk.f32.mxu0 %vm82_vm0, %v10458_v31 }
  0x7a   :  { %7802 = vmatprep.mubr.msk.f32.mxu1 %vm82_vm0, %v10458_v31 }
  0x7c   :  { %7443 = vmatmul.mubr.msk.f32.gmra.mrb[8].mxu0 %vm82_vm0, %v10469_v32 }
  0x7d   :  { %7803 = vmatmul.mubr.msk.f32.gmra.mrb[8].mxu1 %vm82_vm0, %v10469_v32  ;;  %7445 = vmatprep.mubr.msk.f32.mxu0 %vm82_vm0, %v10476_v33 }
  0x7e   :  { %7805 = vmatprep.mubr.msk.f32.mxu1 %vm82_vm0, %v10476_v33 }
  0x80   :  { %7446 = vmatmul.mubr.msk.f32.gmra.mrb[10].mxu0 %vm82_vm0, %v10487_v34 }
  0x81   :  { %7806 = vmatmul.mubr.msk.f32.gmra.mrb[10].mxu1 %vm82_vm0, %v10487_v34  ;;  %7448 = vmatprep.mubr.msk.f32.mxu0 %vm82_vm0, %v10494_v35 }
  0x82   :  { %7808 = vmatprep.mubr.msk.f32.mxu1 %vm82_vm0, %v10494_v35 }
  0x84   :  { %7449 = vmatmul.mubr.msk.f32.gmra.mrb[12].mxu0 %vm82_vm0, %v10505_v36 }
  0x85   :  { %7809 = vmatmul.mubr.msk.f32.gmra.mrb[12].mxu1 %vm82_vm0, %v10505_v36  ;;  %7451 = vmatprep.mubr.msk.f32.mxu0 %vm82_vm0, %v10512_v37 }
  0x86   :  { %7811 = vmatprep.mubr.msk.f32.mxu1 %vm82_vm0, %v10512_v37 }
  0x88   :  { %7452 = vmatmul.mubr.msk.f32.gmra.mrb[14].mxu0 %vm82_vm0, %v10523_v38 }
  0x89   :  { %7812 = vmatmul.mubr.msk.f32.gmra.mrb[14].mxu1 %vm82_vm0, %v10523_v38  ;;  %7454 = vmatprep.mubr.msk.f32.mxu0 %vm82_vm0, %v10530_v39 }
  0x8a   :  { %7814 = vmatprep.mubr.msk.f32.mxu1 %vm82_vm0, %v10530_v39 }
  0x8c   :  { %7455 = vmatmul.mubr.msk.f32.gmra.mrb[16].mxu0 %vm82_vm0, %v10541_v40 }
  0x8d   :  { %7815 = vmatmul.mubr.msk.f32.gmra.mrb[16].mxu1 %vm82_vm0, %v10541_v40  ;;  %7457 = vmatprep.mubr.msk.f32.mxu0 %vm82_vm0, %v10548_v41 }
  0x8e   :  { %7817 = vmatprep.mubr.msk.f32.mxu1 %vm82_vm0, %v10548_v41 }
  0x90   :  { %7458 = vmatmul.mubr.msk.f32.gmra.mrb[18].mxu0 %vm82_vm0, %v10559_v42 }
  0x91   :  { %7818 = vmatmul.mubr.msk.f32.gmra.mrb[18].mxu1 %vm82_vm0, %v10559_v42  ;;  %7460 = vmatprep.mubr.msk.f32.mxu0 %vm82_vm0, %v10566_v43 }
  0x92   :  { %7820 = vmatprep.mubr.msk.f32.mxu1 %vm82_vm0, %v10566_v43 }
  0x94   :  { %7461 = vmatmul.mubr.msk.f32.gmra.mrb[20].mxu0 %vm82_vm0, %v10577_v44 }
  0x95   :  { %7821 = vmatmul.mubr.msk.f32.gmra.mrb[20].mxu1 %vm82_vm0, %v10577_v44  ;;  %7463 = vmatprep.mubr.msk.f32.mxu0 %vm82_vm0, %v10584_v46 }
  0x96   :  { %7823 = vmatprep.mubr.msk.f32.mxu1 %vm82_vm0, %v10584_v46 }
  0x98   :  { %7464 = vmatmul.mubr.msk.f32.gmra.mrb[22].mxu0 %vm82_vm0, %v10595_v47 }
  0x99   :  { %7824 = vmatmul.mubr.msk.f32.gmra.mrb[22].mxu1 %vm82_vm0, %v10595_v47  ;;  %7490 = vmatprep.mubr.msk.f32.mxu0 %vm82_vm0, %v10204_v22 }
  0x9a   :  { %7850 = vmatprep.mubr.msk.f32.mxu1 %vm82_vm0, %v10204_v22 }
  0x9c   :  { %7491 = vmatmul.mubr.msk.f32.vlgmr.msra.gmra.mrb[40].mxu0 %vm82_vm0, %v10255_v45 }
  0x9d   :  { %7851 = vmatmul.mubr.msk.f32.vlgmr.msra.gmra.mrb[40].mxu1 %vm82_vm0, %v10255_v45  ;;  %9162 = vmatpush3.bf16.msra.mxu0 %v9159_v51  ;;  %v5860_v51 = vld [vmem:[%s13186_s1 + $0x180] sm:$0xff] }
  0x9e   :  { %9282 = vmatpush3.bf16.msra.mxu1 %v9279_v52  ;;  %7493 = vmatprep.mubr.msk.f32.mxu0 %vm82_vm0, %v10266_v48  ;;  %v5861_v52 = vld [vmem:[%s13186_s1 + $0x188] sm:$0xff] }
  0x9f   :  { %7853 = vmatprep.mubr.msk.f32.mxu1 %vm82_vm0, %v10266_v48  ;;  %9164 = vmatprep.subr.bf16.mxu0 %v9163_v59  ;;  %v9183_v57 = vpack.c.bf16 %v5861_v52, %v5860_v51  ;;  %v10085_v51 = vld [vmem:[%s13187_s0] sm:$0xff]  ;;  %v10086_v52 = vld [vmem:[%s13187_s0 + $0x8] sm:$0xff] }
  0xa0   :  { %7494 = vmatmul.mubr.msk.f32.gmra.mrb[42].mxu0 %vm82_vm0, %v10281_v53  ;;  %9284 = vmatprep.subr.bf16.mxu1 %v9283_v60 }
  0xa1   :  { %7854 = vmatmul.mubr.msk.f32.gmra.mrb[42].mxu1 %vm82_vm0, %v10281_v53  ;;  %7496 = vmatprep.mubr.msk.f32.mxu0 %vm82_vm0, %v10294_v56 }
  0xa2   :  { %7856 = vmatprep.mubr.msk.f32.mxu1 %vm82_vm0, %v10294_v56  ;;  %9166 = vmatpush3.bf16.msra.mxu0 %v9163_v59  ;;  %v5862_v59 = vld [vmem:[%s13186_s1 + $0x190] sm:$0xff] }
  0xa3   :  { %9286 = vmatpush3.bf16.msra.mxu1 %v9283_v60  ;;  %9168 = vmatprep.subr.bf16.mxu0 %v9167_v3  ;;  %v5863_v60 = vld [vmem:[%s13186_s1 + $0x198] sm:$0xff] }
  0xa4   :  { %7497 = vmatmul.mubr.msk.f32.gmra.mrb[44].mxu0 %vm82_vm0, %v10313_v61  ;;  %9288 = vmatprep.subr.bf16.mxu1 %v9287_v4  ;;  %v9187_v1 = vpack.c.bf16 %v5863_v60, %v5862_v59  ;;  %v10088_v59 = vld [vmem:[%s13187_s0 + $0x18] sm:$0xff] }
  0xa5   :  { %7857 = vmatmul.mubr.msk.f32.gmra.mrb[44].mxu1 %vm82_vm0, %v10313_v61  ;;  %7499 = vmatprep.mubr.msk.f32.mxu0 %vm82_vm0, %v10326_v0 }
  0xa6   :  { %7859 = vmatprep.mubr.msk.f32.mxu1 %vm82_vm0, %v10326_v0  ;;  %9170 = vmatpush3.bf16.msra.mxu0 %v9167_v3  ;;  %v5864_v3 = vld [vmem:[%s13186_s1 + $0x1a0] sm:$0xff] }
  0xa7   :  { %9290 = vmatpush3.bf16.msra.mxu1 %v9287_v4  ;;  %9172 = vmatprep.subr.bf16.mxu0 %v9171_v11  ;;  %v5865_v4 = vld [vmem:[%s13186_s1 + $0x1a8] sm:$0xff] }
  0xa8   :  { %7500 = vmatmul.mubr.msk.f32.gmra.mrb[46].mxu0 %vm82_vm0, %v10343_v5  ;;  %9292 = vmatprep.subr.bf16.mxu1 %v9291_v12  ;;  %v9191_v7 = vpack.c.bf16 %v5865_v4, %v5864_v3 }
  0xa9   :  { %7860 = vmatmul.mubr.msk.f32.gmra.mrb[46].mxu1 %vm82_vm0, %v10343_v5  ;;  %7502 = vmatprep.mubr.msk.f32.mxu0 %vm82_vm0, %v10356_v8 }
  0xaa   :  { %7862 = vmatprep.mubr.msk.f32.mxu1 %vm82_vm0, %v10356_v8  ;;  %9174 = vmatpush3.bf16.msra.mxu0 %v9171_v11  ;;  %v6087_v11 = vld [vmem:[%s13186_s1 + $0x398] sm:$0xff] }
  0xab   :  { %9294 = vmatpush3.bf16.msra.mxu1 %v9291_v12  ;;  %9176 = vmatprep.subr.bf16.mxu0 %v9175_v19  ;;  %v9195_v12 = vpack.c.bf16 %v5867_v10, %v5866_v9 }
  0xac   :  { %7503 = vmatmul.mubr.msk.f32.gmra.mrb[48].mxu0 %vm82_vm0, %v10373_v13  ;;  %9296 = vmatprep.subr.bf16.mxu1 %v9295_v20 }
  0xad   :  { %7863 = vmatmul.mubr.msk.f32.gmra.mrb[48].mxu1 %vm82_vm0, %v10373_v13  ;;  %7505 = vmatprep.mubr.msk.f32.mxu0 %vm82_vm0, %v10386_v16 }
  0xae   :  { %7865 = vmatprep.mubr.msk.f32.mxu1 %vm82_vm0, %v10386_v16  ;;  %9178 = vmatpush3.bf16.msra.mxu0 %v9175_v19  ;;  %v9199_v19 = vpack.c.bf16 %v5869_v15, %v5868_v14 }
  0xaf   :  { %9298 = vmatpush3.bf16.msra.mxu1 %v9295_v20  ;;  %9180 = vmatprep.subr.bf16.mxu0 %v9179_v49  ;;  %v9319_v20 = vpack.c.bf16 %v6089_v18, %v6088_v17 }
  0xb0   :  { %7506 = vmatmul.mubr.msk.f32.gmra.mrb[50].mxu0 %vm82_vm0, %v10403_v21  ;;  %9300 = vmatprep.subr.bf16.mxu1 %v9299_v50 }
  0xb1   :  { %7866 = vmatmul.mubr.msk.f32.gmra.mrb[50].mxu1 %vm82_vm0, %v10403_v21  ;;  %7508 = vmatprep.mubr.msk.f32.mxu0 %vm82_vm0, %v10416_v25 }
  0xb2   :  { %7868 = vmatprep.mubr.msk.f32.mxu1 %vm82_vm0, %v10416_v25  ;;  %9182 = vmatpush3.bf16.msra.mxu0 %v9179_v49  ;;  %v9203_v49 = vpack.c.bf16 %v5871_v24, %v5870_v23 }
  0xb3   :  { %9302 = vmatpush3.bf16.msra.mxu1 %v9299_v50  ;;  %9184 = vmatprep.subr.bf16.mxu0 %v9183_v57  ;;  %v9323_v50 = vpack.c.bf16 %v6091_v27, %v6090_v26 }
  0xb4   :  { %7509 = vmatmul.mubr.msk.f32.gmra.mrb[52].mxu0 %vm82_vm0, %v10431_v28  ;;  %9304 = vmatprep.subr.bf16.mxu1 %v9303_v58 }
  0xb5   :  { %7869 = vmatmul.mubr.msk.f32.gmra.mrb[52].mxu1 %vm82_vm0, %v10431_v28  ;;  %7511 = vmatprep.mubr.msk.f32.mxu0 %vm82_vm0, %v10438_v29 }
  0xb6   :  { %7871 = vmatprep.mubr.msk.f32.mxu1 %vm82_vm0, %v10438_v29 }
  0xb8   :  { %7512 = vmatmul.mubr.msk.f32.gmra.mrb[54].mxu0 %vm82_vm0, %v10451_v30 }
  0xb9   :  { %7872 = vmatmul.mubr.msk.f32.gmra.mrb[54].mxu1 %vm82_vm0, %v10451_v30  ;;  %7514 = vmatprep.mubr.msk.f32.mxu0 %vm82_vm0, %v10458_v31 }
  0xba   :  { %7874 = vmatprep.mubr.msk.f32.mxu1 %vm82_vm0, %v10458_v31 }
  0xbc   :  { %7515 = vmatmul.mubr.msk.f32.gmra.mrb[0].mxu0 %vm82_vm0, %v10469_v32 }
  0xbd   :  { %7875 = vmatmul.mubr.msk.f32.gmra.mrb[0].mxu1 %vm82_vm0, %v10469_v32  ;;  %7517 = vmatprep.mubr.msk.f32.mxu0 %vm82_vm0, %v10476_v33 }
  0xbe   :  { %7877 = vmatprep.mubr.msk.f32.mxu1 %vm82_vm0, %v10476_v33 }
  0xc0   :  { %7518 = vmatmul.mubr.msk.f32.gmra.mrb[2].mxu0 %vm82_vm0, %v10487_v34 }
  0xc1   :  { %7878 = vmatmul.mubr.msk.f32.gmra.mrb[2].mxu1 %vm82_vm0, %v10487_v34  ;;  %7520 = vmatprep.mubr.msk.f32.mxu0 %vm82_vm0, %v10494_v35 }
  0xc2   :  { %7880 = vmatprep.mubr.msk.f32.mxu1 %vm82_vm0, %v10494_v35 }
  0xc4   :  { %7521 = vmatmul.mubr.msk.f32.gmra.mrb[4].mxu0 %vm82_vm0, %v10505_v36 }
  0xc5   :  { %7881 = vmatmul.mubr.msk.f32.gmra.mrb[4].mxu1 %vm82_vm0, %v10505_v36  ;;  %7523 = vmatprep.mubr.msk.f32.mxu0 %vm82_vm0, %v10512_v37 }
  0xc6   :  { %7883 = vmatprep.mubr.msk.f32.mxu1 %vm82_vm0, %v10512_v37 }
  0xc8   :  { %7524 = vmatmul.mubr.msk.f32.gmra.mrb[6].mxu0 %vm82_vm0, %v10523_v38 }
  0xc9   :  { %7884 = vmatmul.mubr.msk.f32.gmra.mrb[6].mxu1 %vm82_vm0, %v10523_v38  ;;  %7526 = vmatprep.mubr.msk.f32.mxu0 %vm82_vm0, %v10530_v39 }
  0xca   :  { %7886 = vmatprep.mubr.msk.f32.mxu1 %vm82_vm0, %v10530_v39 }
  0xcc   :  { %7527 = vmatmul.mubr.msk.f32.gmra.mrb[8].mxu0 %vm82_vm0, %v10541_v40 }
  0xcd   :  { %7887 = vmatmul.mubr.msk.f32.gmra.mrb[8].mxu1 %vm82_vm0, %v10541_v40  ;;  %7529 = vmatprep.mubr.msk.f32.mxu0 %vm82_vm0, %v10548_v41 }
  0xce   :  { %7889 = vmatprep.mubr.msk.f32.mxu1 %vm82_vm0, %v10548_v41 }
  0xd0   :  { %7530 = vmatmul.mubr.msk.f32.gmra.mrb[10].mxu0 %vm82_vm0, %v10559_v42 }
  0xd1   :  { %7890 = vmatmul.mubr.msk.f32.gmra.mrb[10].mxu1 %vm82_vm0, %v10559_v42  ;;  %7532 = vmatprep.mubr.msk.f32.mxu0 %vm82_vm0, %v10566_v43 }
  0xd2   :  { %7892 = vmatprep.mubr.msk.f32.mxu1 %vm82_vm0, %v10566_v43 }
  0xd4   :  { %7533 = vmatmul.mubr.msk.f32.gmra.mrb[12].mxu0 %vm82_vm0, %v10577_v44 }
  0xd5   :  { %7893 = vmatmul.mubr.msk.f32.gmra.mrb[12].mxu1 %vm82_vm0, %v10577_v44  ;;  %7535 = vmatprep.mubr.msk.f32.mxu0 %vm82_vm0, %v10584_v46 }
  0xd6   :  { %7895 = vmatprep.mubr.msk.f32.mxu1 %vm82_vm0, %v10584_v46 }
  0xd8   :  { %7536 = vmatmul.mubr.msk.f32.gmra.mrb[14].mxu0 %vm82_vm0, %v10595_v47 }
  0xd9   :  { %7896 = vmatmul.mubr.msk.f32.gmra.mrb[14].mxu1 %vm82_vm0, %v10595_v47  ;;  %7562 = vmatprep.mubr.msk.f32.mxu0 %vm82_vm0, %v10204_v22 }
  0xda   :  { %7922 = vmatprep.mubr.msk.f32.mxu1 %vm82_vm0, %v10204_v22  ;;  %v6084_v22 = vld [vmem:[%s13186_s1 + $0x380] sm:$0xff] }
  0xdc   :  { %7563 = vmatmul.mubr.msk.f32.vlgmr.msra.gmra.mrb[56].mxu0 %vm82_vm0, %v10255_v45 }
  0xdd   :  { %7923 = vmatmul.mubr.msk.f32.vlgmr.msra.gmra.mrb[56].mxu1 %vm82_vm0, %v10255_v45  ;;  %9186 = vmatpush3.bf16.msra.mxu0 %v9183_v57  ;;  %v9311_v45 = vpack.c.bf16 %v6085_v6, %v6084_v22 }
  0xde   :  { %9306 = vmatpush3.bf16.msra.mxu1 %v9303_v58  ;;  %7565 = vmatprep.mubr.msk.f32.mxu0 %vm82_vm0, %v10266_v48 }
  0xdf   :  { %7925 = vmatprep.mubr.msk.f32.mxu1 %vm82_vm0, %v10266_v48  ;;  %9188 = vmatprep.subr.bf16.mxu0 %v9187_v1  ;;  %v6086_v48 = vld [vmem:[%s13186_s1 + $0x390] sm:$0xff] }
  0xe0   :  { %7566 = vmatmul.mubr.msk.f32.gmra.mrb[58].mxu0 %vm82_vm0, %v10281_v53  ;;  %9308 = vmatprep.subr.bf16.mxu1 %v9307_v2 }
  0xe1   :  { %7926 = vmatmul.mubr.msk.f32.gmra.mrb[58].mxu1 %vm82_vm0, %v10281_v53  ;;  %7568 = vmatprep.mubr.msk.f32.mxu0 %vm82_vm0, %v10294_v56  ;;  %v9315_v53 = vpack.c.bf16 %v6087_v11, %v6086_v48 }
  0xe2   :  { %7928 = vmatprep.mubr.msk.f32.mxu1 %vm82_vm0, %v10294_v56  ;;  %9190 = vmatpush3.bf16.msra.mxu0 %v9187_v1 }
  0xe3   :  { %9310 = vmatpush3.bf16.msra.mxu1 %v9307_v2  ;;  %9192 = vmatprep.subr.bf16.mxu0 %v9191_v7 }
  0xe4   :  { %7569 = vmatmul.mubr.msk.f32.gmra.mrb[60].mxu0 %vm82_vm0, %v10313_v61  ;;  %9312 = vmatprep.subr.bf16.mxu1 %v9311_v45 }
  0xe5   :  { %7929 = vmatmul.mubr.msk.f32.gmra.mrb[60].mxu1 %vm82_vm0, %v10313_v61  ;;  %7571 = vmatprep.mubr.msk.f32.mxu0 %vm82_vm0, %v10326_v0 }
  0xe6   :  { %7931 = vmatprep.mubr.msk.f32.mxu1 %vm82_vm0, %v10326_v0  ;;  %9194 = vmatpush3.bf16.msra.mxu0 %v9191_v7 }
  0xe7   :  { %9314 = vmatpush3.bf16.msra.mxu1 %v9311_v45  ;;  %9196 = vmatprep.subr.bf16.mxu0 %v9195_v12 }
  0xe8   :  { %7572 = vmatmul.mubr.msk.f32.gmra.mrb[62].mxu0 %vm82_vm0, %v10343_v5  ;;  %9316 = vmatprep.subr.bf16.mxu1 %v9315_v53 }
  0xe9   :  { %7932 = vmatmul.mubr.msk.f32.gmra.mrb[62].mxu1 %vm82_vm0, %v10343_v5  ;;  %7574 = vmatprep.mubr.msk.f32.mxu0 %vm82_vm0, %v10356_v8 }
  0xea   :  { %7934 = vmatprep.mubr.msk.f32.mxu1 %vm82_vm0, %v10356_v8  ;;  %9198 = vmatpush3.bf16.msra.mxu0 %v9195_v12 }
  0xeb   :  { %9318 = vmatpush3.bf16.msra.mxu1 %v9315_v53  ;;  %9200 = vmatprep.subr.bf16.mxu0 %v9199_v19 }
  0xec   :  { %7575 = vmatmul.mubr.msk.f32.gmra.mrb[64].mxu0 %vm82_vm0, %v10373_v13  ;;  %9320 = vmatprep.subr.bf16.mxu1 %v9319_v20 }
  0xed   :  { %7935 = vmatmul.mubr.msk.f32.gmra.mrb[64].mxu1 %vm82_vm0, %v10373_v13  ;;  %7577 = vmatprep.mubr.msk.f32.mxu0 %vm82_vm0, %v10386_v16 }
  0xee   :  { %7937 = vmatprep.mubr.msk.f32.mxu1 %vm82_vm0, %v10386_v16  ;;  %9202 = vmatpush3.bf16.msra.mxu0 %v9199_v19 }
  0xef   :  { %9322 = vmatpush3.bf16.msra.mxu1 %v9319_v20  ;;  %9204 = vmatprep.subr.bf16.mxu0 %v9203_v49 }
  0xf0   :  { %7578 = vmatmul.mubr.msk.f32.gmra.mrb[66].mxu0 %vm82_vm0, %v10403_v21  ;;  %9324 = vmatprep.subr.bf16.mxu1 %v9323_v50 }
  0xf1   :  { %7938 = vmatmul.mubr.msk.f32.gmra.mrb[66].mxu1 %vm82_vm0, %v10403_v21  ;;  %7580 = vmatprep.mubr.msk.f32.mxu0 %vm82_vm0, %v10416_v25 }
  0xf2   :  { %7940 = vmatprep.mubr.msk.f32.mxu1 %vm82_vm0, %v10416_v25  ;;  %9206 = vmatpush3.bf16.msra.mxu0 %v9203_v49 }
  0xf3   :  { %9326 = vmatpush3.bf16.msra.mxu1 %v9323_v50 }
  0xf4   :  { %7581 = vmatmul.mubr.msk.f32.gmra.mrb[68].mxu0 %vm82_vm0, %v10431_v28 }
  0xf5   :  { %7941 = vmatmul.mubr.msk.f32.gmra.mrb[68].mxu1 %vm82_vm0, %v10431_v28  ;;  %7583 = vmatprep.mubr.msk.f32.mxu0 %vm82_vm0, %v10438_v29 }
  0xf6   :  { %7943 = vmatprep.mubr.msk.f32.mxu1 %vm82_vm0, %v10438_v29 }
  0xf8   :  { %7584 = vmatmul.mubr.msk.f32.gmra.mrb[70].mxu0 %vm82_vm0, %v10451_v30 }
  0xf9   :  { %7944 = vmatmul.mubr.msk.f32.gmra.mrb[70].mxu1 %vm82_vm0, %v10451_v30  ;;  %7586 = vmatprep.mubr.msk.f32.mxu0 %vm82_vm0, %v10458_v31 }
  0xfa   :  { %7946 = vmatprep.mubr.msk.f32.mxu1 %vm82_vm0, %v10458_v31 }
  0xfc   :  { %7587 = vmatmul.mubr.msk.f32.gmra.mrb[48].mxu0 %vm82_vm0, %v10469_v32 }
  0xfd   :  { %7947 = vmatmul.mubr.msk.f32.gmra.mrb[48].mxu1 %vm82_vm0, %v10469_v32  ;;  %7589 = vmatprep.mubr.msk.f32.mxu0 %vm82_vm0, %v10476_v33 }
  0xfe   :  { %7949 = vmatprep.mubr.msk.f32.mxu1 %vm82_vm0, %v10476_v33 }
 0x100   :  { %7590 = vmatmul.mubr.msk.f32.gmra.mrb[50].mxu0 %vm82_vm0, %v10487_v34 }
 0x101   :  { %7950 = vmatmul.mubr.msk.f32.gmra.mrb[50].mxu1 %vm82_vm0, %v10487_v34  ;;  %7592 = vmatprep.mubr.msk.f32.mxu0 %vm82_vm0, %v10494_v35 }
 0x102   :  { %7952 = vmatprep.mubr.msk.f32.mxu1 %vm82_vm0, %v10494_v35 }
 0x104   :  { %7593 = vmatmul.mubr.msk.f32.gmra.mrb[52].mxu0 %vm82_vm0, %v10505_v36 }
 0x105   :  { %7953 = vmatmul.mubr.msk.f32.gmra.mrb[52].mxu1 %vm82_vm0, %v10505_v36  ;;  %7595 = vmatprep.mubr.msk.f32.mxu0 %vm82_vm0, %v10512_v37 }
 0x106   :  { %7955 = vmatprep.mubr.msk.f32.mxu1 %vm82_vm0, %v10512_v37 }
 0x108   :  { %7596 = vmatmul.mubr.msk.f32.gmra.mrb[54].mxu0 %vm82_vm0, %v10523_v38 }
 0x109   :  { %7956 = vmatmul.mubr.msk.f32.gmra.mrb[54].mxu1 %vm82_vm0, %v10523_v38  ;;  %7598 = vmatprep.mubr.msk.f32.mxu0 %vm82_vm0, %v10530_v39 }
 0x10a   :  { %7958 = vmatprep.mubr.msk.f32.mxu1 %vm82_vm0, %v10530_v39 }
 0x10c   :  { %7599 = vmatmul.mubr.msk.f32.gmra.mrb[0].mxu0 %vm82_vm0, %v10541_v40 }
 0x10d   :  { %7959 = vmatmul.mubr.msk.f32.gmra.mrb[0].mxu1 %vm82_vm0, %v10541_v40  ;;  %7601 = vmatprep.mubr.msk.f32.mxu0 %vm82_vm0, %v10548_v41 }
 0x10e   :  { %7961 = vmatprep.mubr.msk.f32.mxu1 %vm82_vm0, %v10548_v41 }
 0x110   :  { %7602 = vmatmul.mubr.msk.f32.gmra.mrb[2].mxu0 %vm82_vm0, %v10559_v42 }
 0x111   :  { %7962 = vmatmul.mubr.msk.f32.gmra.mrb[2].mxu1 %vm82_vm0, %v10559_v42  ;;  %7604 = vmatprep.mubr.msk.f32.mxu0 %vm82_vm0, %v10566_v43 }
 0x112   :  { %7964 = vmatprep.mubr.msk.f32.mxu1 %vm82_vm0, %v10566_v43 }
 0x114   :  { %7605 = vmatmul.mubr.msk.f32.gmra.mrb[4].mxu0 %vm82_vm0, %v10577_v44 }
 0x115   :  { %7965 = vmatmul.mubr.msk.f32.gmra.mrb[4].mxu1 %vm82_vm0, %v10577_v44  ;;  %7607 = vmatprep.mubr.msk.f32.mxu0 %vm82_vm0, %v10584_v46 }
 0x116   :  { %7967 = vmatprep.mubr.msk.f32.mxu1 %vm82_vm0, %v10584_v46 }
 0x118   :  { %7608 = vmatmul.mubr.msk.f32.gmra.mrb[6].mxu0 %vm82_vm0, %v10595_v47 }
 0x119   :  { %7968 = vmatmul.mubr.msk.f32.gmra.mrb[6].mxu1 %vm82_vm0, %v10595_v47  ;;  %7634 = vmatprep.mubr.msk.f32.mxu0 %vm82_vm0, %v10085_v51 }
 0x11a   :  { %7994 = vmatprep.mubr.msk.f32.mxu1 %vm82_vm0, %v10085_v51 }
 0x11c   :  { %7635 = vmatmul.mubr.msk.f32.vlgmr.msra.gmra.mrb[72].mxu0 %vm82_vm0, %v10086_v52 }
 0x11d   :  { %7995 = vmatmul.mubr.msk.f32.vlgmr.msra.gmra.mrb[72].mxu1 %vm82_vm0, %v10086_v52  ;;  %7637 = vmatprep.mubr.msk.f32.mxu0 %vm82_vm0, %v10087_v54 }
 0x11e   :  { %7997 = vmatprep.mubr.msk.f32.mxu1 %vm82_vm0, %v10087_v54 }
 0x11f   :  { %v7384_v55 = vpop.f32.mrb[24].mxu0 }
 0x120   :  { %v7744_v57 = vpop.f32.mrb[24].mxu1  ;;  %v362_v58 = vpop.f32.mrb[25].mxu0  ;;  %7638 = vmatmul.mubr.msk.f32.gmra.mrb[74].mxu0 %vm82_vm0, %v10088_v59 }
 0x121   :  { %v1644_v60 = vpop.f32.mrb[25].mxu1  ;;  %7998 = vmatmul.mubr.msk.f32.gmra.mrb[74].mxu1 %vm82_vm0, %v10088_v59  ;;  %7640 = vmatprep.mubr.msk.f32.mxu0 %vm82_vm0, %v10294_v56 }
 0x122   :  { %8000 = vmatprep.mubr.msk.f32.mxu1 %vm82_vm0, %v10089_v62 }
 0x123   :  { %v7387_v63 = vpop.f32.mrb[26].mxu0 }
 0x124   :  { %v7747_v1 = vpop.f32.mrb[26].mxu1  ;;  %v372_v2 = vpop.f32.mrb[27].mxu0  ;;  %7641 = vmatmul.mubr.msk.f32.gmra.mrb[76].mxu0 %vm82_vm0, %v10313_v61 }
 0x125   :  { %v1654_v3 = vpop.f32.mrb[27].mxu1  ;;  %8001 = vmatmul.mubr.msk.f32.gmra.mrb[76].mxu1 %vm82_vm0, %v10313_v61  ;;  %7643 = vmatprep.mubr.msk.f32.mxu0 %vm82_vm0, %v10326_v0 }
 0x126   :  { %8003 = vmatprep.mubr.msk.f32.mxu1 %vm82_vm0, %v10326_v0 }
 0x127   :  { %v7390_v56 = vpop.f32.mrb[28].mxu0 }
 0x128   :  { %v7750_v4 = vpop.f32.mrb[28].mxu1  ;;  %v382_v22 = vpop.f32.mrb[29].mxu0  ;;  %7644 = vmatmul.mubr.msk.f32.gmra.mrb[78].mxu0 %vm82_vm0, %v10343_v5 }
 0x129   :  { %v1664_v6 = vpop.f32.mrb[29].mxu1  ;;  %8004 = vmatmul.mubr.msk.f32.gmra.mrb[78].mxu1 %vm82_vm0, %v10343_v5  ;;  %7646 = vmatprep.mubr.msk.f32.mxu0 %vm82_vm0, %v10356_v8 }
 0x12a   :  { %8006 = vmatprep.mubr.msk.f32.mxu1 %vm82_vm0, %v10356_v8 }
 0x12b   :  { %v7393_v61 = vpop.f32.mrb[30].mxu0 }
 0x12c   :  { %v7753_v7 = vpop.f32.mrb[30].mxu1  ;;  %v392_v45 = vpop.f32.mrb[31].mxu0  ;;  %7647 = vmatmul.mubr.msk.f32.gmra.mrb[80].mxu0 %vm82_vm0, %v10373_v13 }
 0x12d   :  { %v1674_v0 = vpop.f32.mrb[31].mxu1  ;;  %8007 = vmatmul.mubr.msk.f32.gmra.mrb[80].mxu1 %vm82_vm0, %v10373_v13  ;;  %7649 = vmatprep.mubr.msk.f32.mxu0 %vm82_vm0, %v10386_v16 }
 0x12e   :  { %8009 = vmatprep.mubr.msk.f32.mxu1 %vm82_vm0, %v10386_v16 }
 0x12f   :  { %v7420_v5 = vpop.f32.mrb[32].mxu0 }
 0x130   :  { %v11243_v9 = vadd.f32 %v7420_v5, %v362_v58  ;;  %v7780_v8 = vpop.f32.mrb[32].mxu1  ;;  %v479_v10 = vpop.f32.mrb[33].mxu0  ;;  %7650 = vmatmul.mubr.msk.f32.gmra.mrb[82].mxu0 %vm82_vm0, %v10403_v21  ;;  %v2808_v58 = vld [vmem:[%s13188_s3 + $0x8] sm:$0xff] }
 0x131   :  { %v11247_v48 = vadd.f32 %v7780_v8, %v1644_v60  ;;  %v1761_v11 = vpop.f32.mrb[33].mxu1  ;;  %8010 = vmatmul.mubr.msk.f32.gmra.mrb[82].mxu1 %vm82_vm0, %v10403_v21  ;;  %7652 = vmatprep.mubr.msk.f32.mxu0 %vm82_vm0, %v10416_v25  ;;  %v2809_v8 = vld [vmem:[%s13188_s3 + $0x10] sm:$0xff]  ;;  %v2810_v10 = vld [vmem:[%s13188_s3 + $0x18] sm:$0xff] }
 0x132   :  { %8012 = vmatprep.mubr.msk.f32.mxu1 %vm82_vm0, %v10416_v25 }
 0x133   :  { %v7423_v13 = vpop.f32.mrb[34].mxu0 }
 0x134   :  { %v11255_v16 = vadd.f32 %v7423_v13, %v372_v2  ;;  %v7783_v12 = vpop.f32.mrb[34].mxu1  ;;  %v488_v53 = vpop.f32.mrb[35].mxu0  ;;  %7653 = vmatmul.mubr.msk.f32.gmra.mrb[84].mxu0 %vm82_vm0, %v10431_v28 }
 0x135   :  { %v11259_v14 = vadd.f32 %v7783_v12, %v1654_v3  ;;  %v11261_v15 = vadd.f32 %v7384_v55, %v488_v53  ;;  %v1770_v17 = vpop.f32.mrb[35].mxu1  ;;  %8013 = vmatmul.mubr.msk.f32.gmra.mrb[84].mxu1 %vm82_vm0, %v10431_v28  ;;  %7655 = vmatprep.mubr.msk.f32.mxu0 %vm82_vm0, %v10438_v29  ;;  %v9331_v53 = vpack.c.bf16 %v2810_v10, %v2809_v8 }
 0x136   :  { %13202 = vst [vmem:[#allocation2_spill] sm:$0xff] %v11255_v16  ;;  %v11267_v21 = vadd.f32 %v7744_v57, %v1770_v17  ;;  %8015 = vmatprep.mubr.msk.f32.mxu1 %vm82_vm0, %v10438_v29  ;;  %v13198_v57 = vmov 0.0|0.0  }
 0x137   :  { %13203 = vst [vmem:[#allocation3_spill] sm:$0xff] %v11259_v14  ;;  %13204 = vst [vmem:[#allocation4_spill] sm:$0xff] %v11261_v15  ;;  %v7426_v25 = vpop.f32.mrb[36].mxu0  ;;  %9327 = vmatprep.subr.bf16.mxu0 %v13198_v57  ;;  %9342 = vmatprep.subr.bf16.mxu1 %v13198_v57 }
 0x138   :  { %13205 = vst [vmem:[#allocation5_spill] sm:$0xff] %v11267_v21  ;;  %v11271_v18 = vadd.f32 %v7426_v25, %v382_v22  ;;  %v7786_v19 = vpop.f32.mrb[36].mxu1  ;;  %v498_v20 = vpop.f32.mrb[37].mxu0  ;;  %7656 = vmatmul.mubr.msk.f32.gmra.mrb[86].mxu0 %vm82_vm0, %v10451_v30 }
 0x139   :  { %v11275_v23 = vadd.f32 %v7786_v19, %v1664_v6  ;;  %v11277_v24 = vadd.f32 %v7387_v63, %v498_v20  ;;  %v1780_v28 = vpop.f32.mrb[37].mxu1  ;;  %8016 = vmatmul.mubr.msk.f32.gmra.mrb[86].mxu1 %vm82_vm0, %v10451_v30  ;;  %7658 = vmatprep.mubr.msk.f32.mxu0 %vm82_vm0, %v10458_v31 }
 0x13a   :  { %13206 = vst [vmem:[#allocation6_spill] sm:$0xff] %v11271_v18  ;;  %v11283_v29 = vadd.f32 %v7747_v1, %v1780_v28  ;;  %8018 = vmatprep.mubr.msk.f32.mxu1 %vm82_vm0, %v10458_v31 }
 0x13b   :  { %13207 = vst [vmem:[#allocation7_spill] sm:$0xff] %v11275_v23  ;;  %13208 = vst [vmem:[#allocation8_spill] sm:$0xff] %v11277_v24  ;;  %v7429_v26 = vpop.f32.mrb[38].mxu0 }
 0x13c   :  { %13209 = vst [vmem:[#allocation9_spill] sm:$0xff] %v11283_v29  ;;  %v11287_v27 = vadd.f32 %v7429_v26, %v392_v45  ;;  %v7789_v49 = vpop.f32.mrb[38].mxu1  ;;  %v508_v50 = vpop.f32.mrb[39].mxu0  ;;  %7659 = vmatmul.mubr.msk.f32.gmra.mrb[64].mxu0 %vm82_vm0, %v10469_v32  ;;  %v2811_v26 = vld [vmem:[%s13188_s3 + $0x20] sm:$0xff] }
 0x13d   :  { %v11291_v51 = vadd.f32 %v7789_v49, %v1674_v0  ;;  %v11293_v52 = vadd.f32 %v7390_v56, %v508_v50  ;;  %v1790_v30 = vpop.f32.mrb[39].mxu1  ;;  %8019 = vmatmul.mubr.msk.f32.gmra.mrb[64].mxu1 %vm82_vm0, %v10469_v32  ;;  %7661 = vmatprep.mubr.msk.f32.mxu0 %vm82_vm0, %v10476_v33  ;;  %v2812_v49 = vld [vmem:[%s13188_s3 + $0x28] sm:$0xff] }
 0x13e   :  { %13210 = vst [vmem:[#allocation10_spill] sm:$0xff] %v11287_v27  ;;  %v11299_v31 = vadd.f32 %v7750_v4, %v1790_v30  ;;  %8021 = vmatprep.mubr.msk.f32.mxu1 %vm82_vm0, %v10476_v33 }
 0x13f   :  { %13211 = vst [vmem:[#allocation11_spill] sm:$0xff] %v11291_v51  ;;  %13212 = vst [vmem:[#allocation12_spill] sm:$0xff] %v11293_v52 }
 0x140   :  { %13213 = vst [vmem:[#allocation13_spill] sm:$0xff] %v11299_v31  ;;  %7662 = vmatmul.mubr.msk.f32.gmra.mrb[66].mxu0 %vm82_vm0, %v10487_v34 }
 0x141   :  { %8022 = vmatmul.mubr.msk.f32.gmra.mrb[66].mxu1 %vm82_vm0, %v10487_v34  ;;  %7664 = vmatprep.mubr.msk.f32.mxu0 %vm82_vm0, %v10494_v35 }
 0x142   :  { %8024 = vmatprep.mubr.msk.f32.mxu1 %vm82_vm0, %v10494_v35 }
 0x144   :  { %7665 = vmatmul.mubr.msk.f32.gmra.mrb[68].mxu0 %vm82_vm0, %v10505_v36 }
 0x145   :  { %8025 = vmatmul.mubr.msk.f32.gmra.mrb[68].mxu1 %vm82_vm0, %v10505_v36  ;;  %7667 = vmatprep.mubr.msk.f32.mxu0 %vm82_vm0, %v10512_v37 }
 0x146   :  { %8027 = vmatprep.mubr.msk.f32.mxu1 %vm82_vm0, %v10512_v37 }
 0x148   :  { %7668 = vmatmul.mubr.msk.f32.gmra.mrb[70].mxu0 %vm82_vm0, %v10523_v38 }
 0x149   :  { %8028 = vmatmul.mubr.msk.f32.gmra.mrb[70].mxu1 %vm82_vm0, %v10523_v38  ;;  %7670 = vmatprep.mubr.msk.f32.mxu0 %vm82_vm0, %v10530_v39 }
 0x14a   :  { %8030 = vmatprep.mubr.msk.f32.mxu1 %vm82_vm0, %v10530_v39 }
 0x14c   :  { %7671 = vmatmul.mubr.msk.f32.gmra.mrb[48].mxu0 %vm82_vm0, %v10541_v40 }
 0x14d   :  { %8031 = vmatmul.mubr.msk.f32.gmra.mrb[48].mxu1 %vm82_vm0, %v10541_v40  ;;  %7673 = vmatprep.mubr.msk.f32.mxu0 %vm82_vm0, %v10548_v41 }
 0x14e   :  { %8033 = vmatprep.mubr.msk.f32.mxu1 %vm82_vm0, %v10548_v41 }
 0x150   :  { %7674 = vmatmul.mubr.msk.f32.gmra.mrb[50].mxu0 %vm82_vm0, %v10559_v42 }
 0x151   :  { %8034 = vmatmul.mubr.msk.f32.gmra.mrb[50].mxu1 %vm82_vm0, %v10559_v42  ;;  %7676 = vmatprep.mubr.msk.f32.mxu0 %vm82_vm0, %v10566_v43 }
 0x152   :  { %8036 = vmatprep.mubr.msk.f32.mxu1 %vm82_vm0, %v10566_v43 }
 0x154   :  { %7677 = vmatmul.mubr.msk.f32.gmra.mrb[52].mxu0 %vm82_vm0, %v10577_v44 }
 0x155   :  { %8037 = vmatmul.mubr.msk.f32.gmra.mrb[52].mxu1 %vm82_vm0, %v10577_v44  ;;  %7679 = vmatprep.mubr.msk.f32.mxu0 %vm82_vm0, %v10584_v46 }
 0x156   :  { %8039 = vmatprep.mubr.msk.f32.mxu1 %vm82_vm0, %v10584_v46 }
 0x158   :  { %7680 = vmatmul.mubr.msk.f32.gmra.mrb[54].mxu0 %vm82_vm0, %v10595_v47 }
 0x159   :  { %8040 = vmatmul.mubr.msk.f32.gmra.mrb[54].mxu1 %vm82_vm0, %v10595_v47  ;;  %v2807_v47 = vld [vmem:[%s13188_s3] sm:$0xff] }
 0x15a   :  { %v9328_v60 = vpack.c.bf16 %v2808_v58, %v2807_v47 }
 0x15c   :  { %9329 = vmatpush3.bf16.msra.mxu0 %v9328_v60  ;;  %9344 = vmatpush3.bf16.msra.mxu1 %v9328_v60 }
 0x15d   :  { %9330 = vmatprep.subr.bf16.mxu0 %v13198_v57  ;;  %9345 = vmatprep.subr.bf16.mxu1 %v13198_v57 }
 0x15f   :  { %v7456_v32 = vpop.f32.mrb[16].mxu0 }
 0x160   :  { %v7816_v33 = vpop.f32.mrb[16].mxu1  ;;  %v596_v34 = vpop.f32.mrb[17].mxu0  ;;  %9332 = vmatpush3.bf16.msra.mxu0 %v9331_v53  ;;  %9347 = vmatpush3.bf16.msra.mxu1 %v9331_v53 }
 0x161   :  { %v1878_v35 = vpop.f32.mrb[17].mxu1  ;;  %9333 = vmatprep.subr.bf16.mxu0 %v13198_v57  ;;  %9348 = vmatprep.subr.bf16.mxu1 %v13198_v57 }
 0x163   :  { %v7459_v36 = vpop.f32.mrb[18].mxu0 }
 0x164   :  { %v7819_v37 = vpop.f32.mrb[18].mxu1  ;;  %v606_v38 = vpop.f32.mrb[19].mxu0 }
 0x165   :  { %v1888_v39 = vpop.f32.mrb[19].mxu1 }
 0x167   :  { %v7462_v40 = vpop.f32.mrb[20].mxu0 }
 0x168   :  { %v7822_v41 = vpop.f32.mrb[20].mxu1  ;;  %v616_v42 = vpop.f32.mrb[21].mxu0 }
 0x169   :  { %v1898_v43 = vpop.f32.mrb[21].mxu1 }
 0x16b   :  { %v7465_v44 = vpop.f32.mrb[22].mxu0 }
 0x16c   :  { %v7825_v46 = vpop.f32.mrb[22].mxu1  ;;  %v626_v54 = vpop.f32.mrb[23].mxu0  ;;  %v13200_v44 = vmov 0.0  }
 0x16d   :  { %v1908_v55 = vpop.f32.mrb[23].mxu1  ;;  %v2817_v46 = vld [vmem:[%s13188_s3 + $0x50] sm:$0xf]  ;;  %8064 = vmatprep.mubr.msk.f32.mxu0 %vm10092_vm2, %v13200_v44  ;;  %8107 = vmatprep.mubr.msk.f32.mxu1 %vm10092_vm2, %v13200_v44 }
 0x16f   :  { %v7492_v59 = vpop.f32.mrb[40].mxu0 }
 0x170   :  { %v11363_v62 = vadd.f32 %v7492_v59, %v596_v34  ;;  %v7852_v63 = vpop.f32.mrb[40].mxu1  ;;  %v741_v1 = vpop.f32.mrb[41].mxu0 }
 0x171   :  { %v11365_v2 = vadd.f32 %v7852_v63, %v1878_v35  ;;  %v2023_v3 = vpop.f32.mrb[41].mxu1 }
 0x173   :  { %v7495_v56 = vpop.f32.mrb[42].mxu0 }
 0x174   :  { %v11369_v4 = vadd.f32 %v7495_v56, %v606_v38  ;;  %v7855_v22 = vpop.f32.mrb[42].mxu1  ;;  %v750_v6 = vpop.f32.mrb[43].mxu0  ;;  %v2813_v38 = vld [vmem:[%s13188_s3 + $0x30] sm:$0xff] }
 0x175   :  { %v11371_v61 = vadd.f32 %v7855_v22, %v1888_v39  ;;  %v11373_v7 = vadd.f32 %v7456_v32, %v750_v6  ;;  %v2032_v45 = vpop.f32.mrb[43].mxu1  ;;  %v2814_v39 = vld [vmem:[%s13188_s3 + $0x38] sm:$0xff] }
 0x176   :  { %v11375_v0 = vadd.f32 %v7816_v33, %v2032_v45  ;;  %v9334_v33 = vpack.c.bf16 %v2812_v49, %v2811_v26 }
 0x177   :  { %v7498_v5 = vpop.f32.mrb[44].mxu0 }
 0x178   :  { %v11383_v11 = vadd.f32 %v7498_v5, %v616_v42  ;;  %v7858_v13 = vpop.f32.mrb[44].mxu1  ;;  %v760_v12 = vpop.f32.mrb[45].mxu0  ;;  %9335 = vmatpush3.bf16.msra.mxu0 %v9334_v33  ;;  %9350 = vmatpush3.bf16.msra.mxu1 %v9334_v33  ;;  %v9337_v42 = vpack.c.bf16 %v2814_v39, %v2813_v38 }
 0x179   :  { %v11385_v17 = vadd.f32 %v7858_v13, %v1898_v43  ;;  %v11387_v25 = vadd.f32 %v7459_v36, %v760_v12  ;;  %v2042_v19 = vpop.f32.mrb[45].mxu1  ;;  %9336 = vmatprep.subr.bf16.mxu0 %v13198_v57  ;;  %9351 = vmatprep.subr.bf16.mxu1 %v13198_v57 }
 0x17a   :  { %v11389_v20 = vadd.f32 %v7819_v37, %v2042_v19 }
 0x17b   :  { %v7501_v28 = vpop.f32.mrb[46].mxu0 }
 0x17c   :  { %v11399_v50 = vadd.f32 %v7501_v28, %v626_v54  ;;  %v7861_v30 = vpop.f32.mrb[46].mxu1  ;;  %v770_v32 = vpop.f32.mrb[47].mxu0  ;;  %9338 = vmatpush3.bf16.msra.mxu0 %v9337_v42  ;;  %9353 = vmatpush3.bf16.msra.mxu1 %v9337_v42 }
 0x17d   :  { %v11401_v34 = vadd.f32 %v7861_v30, %v1908_v55  ;;  %v11403_v35 = vadd.f32 %v7462_v40, %v770_v32  ;;  %v2052_v36 = vpop.f32.mrb[47].mxu1  ;;  %9339 = vmatprep.subr.bf16.mxu0 %v13198_v57  ;;  %v2815_v40 = vld [vmem:[%s13188_s3 + $0x40] sm:$0xff]  ;;  %9354 = vmatprep.subr.bf16.mxu1 %v13198_v57 }
 0x17e   :  { %v11405_v37 = vadd.f32 %v7822_v41, %v2052_v36  ;;  %v2816_v41 = vld [vmem:[%s13188_s3 + $0x48] sm:$0xff] }
 0x17f   :  { %v9340_v43 = vpack.c.bf16 %v2816_v41, %v2815_v40 }
 0x181   :  { %9341 = vmatpush3.bf16.msra.mxu0 %v9340_v43  ;;  %9356 = vmatpush3.bf16.msra.mxu1 %v9340_v43 }
 0x182   :  { %8062 = vmatprep.subr.mxu0 %v13200_v44  ;;  %8105 = vmatprep.subr.mxu1 %v13200_v44 }
 0x185   :  { %8063 = vmatpush3.msk.msra.mxu0 %vm2840_vm1, %v2817_v46  ;;  %8106 = vmatpush3.msk.msra.mxu1 %vm2840_vm1, %v2817_v46 }
 0x186   :  { %9372 = vmatprep.subr.bf16.mxu0 %v13198_v57  ;;  %9357 = vmatprep.subr.bf16.mxu1 %v13198_v57 }
 0x19f   :  { %v7528_v54 = vpop.f32.mrb[8].mxu0 }
 0x1a0   :  { %v7888_v55 = vpop.f32.mrb[8].mxu1  ;;  %v858_v47 = vpop.f32.mrb[9].mxu0 }
 0x1a1   :  { %v2140_v58 = vpop.f32.mrb[9].mxu1 }
 0x1a3   :  { %v7531_v59 = vpop.f32.mrb[10].mxu0 }
 0x1a4   :  { %v7891_v60 = vpop.f32.mrb[10].mxu1  ;;  %v868_v63 = vpop.f32.mrb[11].mxu0 }
 0x1a5   :  { %v2150_v1 = vpop.f32.mrb[11].mxu1 }
 0x1a7   :  { %v7534_v3 = vpop.f32.mrb[12].mxu0 }
 0x1a8   :  { %v7894_v56 = vpop.f32.mrb[12].mxu1  ;;  %v878_v22 = vpop.f32.mrb[13].mxu0 }
 0x1a9   :  { %v2160_v6 = vpop.f32.mrb[13].mxu1 }
 0x1ab   :  { %v7537_v45 = vpop.f32.mrb[14].mxu0 }
 0x1ac   :  { %v7897_v5 = vpop.f32.mrb[14].mxu1  ;;  %v888_v8 = vpop.f32.mrb[15].mxu0 }
 0x1ad   :  { %v2170_v10 = vpop.f32.mrb[15].mxu1 }
 0x1af   :  { %v7564_v13 = vpop.f32.mrb[56].mxu0 }
 0x1b0   :  { %v11436_v12 = vadd.f32 %v7564_v13, %v858_v47  ;;  %v7924_v53 = vpop.f32.mrb[56].mxu1  ;;  %v1003_v19 = vpop.f32.mrb[57].mxu0 }
 0x1b1   :  { %v11438_v28 = vadd.f32 %v7924_v53, %v2140_v58  ;;  %v2285_v26 = vpop.f32.mrb[57].mxu1 }
 0x1b3   :  { %v7567_v49 = vpop.f32.mrb[58].mxu0 }
 0x1b4   :  { %v11440_v30 = vadd.f32 %v7567_v49, %v868_v63  ;;  %v7927_v32 = vpop.f32.mrb[58].mxu1  ;;  %v1012_v33 = vpop.f32.mrb[59].mxu0 }
 0x1b5   :  { %v11442_v36 = vadd.f32 %v7927_v32, %v2150_v1  ;;  %v11444_v38 = vadd.f32 %v7528_v54, %v1012_v33  ;;  %v2294_v39 = vpop.f32.mrb[59].mxu1 }
 0x1b6   :  { %v11446_v42 = vadd.f32 %v7888_v55, %v2294_v39 }
 0x1b7   :  { %v7570_v40 = vpop.f32.mrb[60].mxu0 }
 0x1b8   :  { %v11448_v41 = vadd.f32 %v7570_v40, %v878_v22  ;;  %v7930_v43 = vpop.f32.mrb[60].mxu1  ;;  %v1022_v46 = vpop.f32.mrb[61].mxu0 }
 0x1b9   :  { %v11450_v47 = vadd.f32 %v7930_v43, %v2160_v6  ;;  %v11452_v58 = vadd.f32 %v7531_v59, %v1022_v46  ;;  %v2304_v63 = vpop.f32.mrb[61].mxu1 }
 0x1ba   :  { %v11454_v45 = vadd.f32 %v7891_v60, %v2304_v63 }
 0x1bb   :  { %v7573_v5 = vpop.f32.mrb[62].mxu0 }
 0x1bc   :  { %v11456_v1 = vadd.f32 %v7573_v5, %v888_v8  ;;  %v7933_v54 = vpop.f32.mrb[62].mxu1  ;;  %v1032_v13 = vpop.f32.mrb[63].mxu0 }
 0x1bd   :  { %v11458_v53 = vadd.f32 %v7933_v54, %v2170_v10  ;;  %v11460_v55 = vadd.f32 %v7534_v3, %v1032_v13  ;;  %v2314_v22 = vpop.f32.mrb[63].mxu1 }
 0x1be   :  { %v11462_v19 = vadd.f32 %v7894_v56, %v2314_v22 }
 0x1df   :  { %v7600_v26 = vpop.f32.mrb[0].mxu0 }
 0x1e0   :  { %v7960_v6 = vpop.f32.mrb[0].mxu1  ;;  %v1120_v49 = vpop.f32.mrb[1].mxu0 }
 0x1e1   :  { %v2402_v59 = vpop.f32.mrb[1].mxu1 }
 0x1e3   :  { %v7603_v32 = vpop.f32.mrb[2].mxu0 }
 0x1e4   :  { %v7963_v33 = vpop.f32.mrb[2].mxu1  ;;  %v1130_v60 = vpop.f32.mrb[3].mxu0 }
 0x1e5   :  { %v2412_v39 = vpop.f32.mrb[3].mxu1 }
 0x1e7   :  { %v7606_v40 = vpop.f32.mrb[4].mxu0 }
 0x1e8   :  { %v7966_v8 = vpop.f32.mrb[4].mxu1  ;;  %v1140_v43 = vpop.f32.mrb[5].mxu0 }
 0x1e9   :  { %v2422_v46 = vpop.f32.mrb[5].mxu1 }
 0x1eb   :  { %v7609_v63 = vpop.f32.mrb[6].mxu0 }
 0x1ec   :  { %v7969_v10 = vpop.f32.mrb[6].mxu1  ;;  %v1150_v5 = vpop.f32.mrb[7].mxu0 }
 0x1ed   :  { %v2432_v3 = vpop.f32.mrb[7].mxu1 }
 0x1ef   :  { %v7636_v54 = vpop.f32.mrb[72].mxu0 }
 0x1f0   :  { %v1420_v13 = vadd.f32 %v7636_v54, %v1120_v49  ;;  %v7996_v56 = vpop.f32.mrb[72].mxu1  ;;  %v1265_v22 = vpop.f32.mrb[73].mxu0 }
 0x1f1   :  { %v2702_v57 = vadd.f32 %v7996_v56, %v2402_v59  ;;  %v2547_v44 = vpop.f32.mrb[73].mxu1 }
 0x1f3   :  { %v2730_v31 = vmax.f32 %v1420_v13, %v2702_v57  ;;  %v7639_v52 = vpop.f32.mrb[74].mxu0 }
 0x1f4   :  { %v1422_v51 = vadd.f32 %v7639_v52, %v1130_v60  ;;  %v7999_v27 = vpop.f32.mrb[74].mxu1  ;;  %v1274_v29 = vpop.f32.mrb[75].mxu0 }
 0x1f5   :  { %v2704_v24 = vadd.f32 %v7999_v27, %v2412_v39  ;;  %v1421_v23 = vadd.f32 %v7600_v26, %v1274_v29  ;;  %v2556_v18 = vpop.f32.mrb[75].mxu1 }
 0x1f6   :  { %v2703_v21 = vadd.f32 %v7960_v6, %v2556_v18 }
 0x1f7   :  { %v2732_v15 = vmax.f32 %v1422_v51, %v2704_v24  ;;  %v7642_v63 = vpop.f32.mrb[76].mxu0 }
 0x1f8   :  { %v2731_v10 = vmax.f32 %v1421_v23, %v2703_v21  ;;  %v11464_v14 = vadd.f32 %v7642_v63, %v1140_v43  ;;  %v8002_v16 = vpop.f32.mrb[76].mxu1  ;;  %v1284_v49 = vpop.f32.mrb[77].mxu0 }
 0x1f9   :  { %v11466_v54 = vadd.f32 %v8002_v16, %v2422_v46  ;;  %v11468_v59 = vadd.f32 %v7603_v32, %v1284_v49  ;;  %v2566_v57 = vpop.f32.mrb[77].mxu1 }
 0x1fa   :  { %v11470_v44 = vadd.f32 %v7963_v33, %v2566_v57 }
 0x1fb   :  { %v2734_v27 = vmax.f32 %v11464_v14, %v11466_v54  ;;  %v7645_v29 = vpop.f32.mrb[78].mxu0  ;;  %v6142_v54 = vld [vmem:[%s13188_s3 + $0x60] sm:$0xff] }
 0x1fc   :  { %v2733_v18 = vmax.f32 %v11468_v59, %v11470_v44  ;;  %v11476_v24 = vadd.f32 %v7645_v29, %v1150_v5  ;;  %v8005_v21 = vpop.f32.mrb[78].mxu1  ;;  %v1294_v23 = vpop.f32.mrb[79].mxu0 }
 0x1fd   :  { %v11478_v51 = vadd.f32 %v8005_v21, %v2432_v3  ;;  %v11480_v16 = vadd.f32 %v7606_v40, %v1294_v23  ;;  %v2576_v52 = vpop.f32.mrb[79].mxu1 }
 0x1fe   :  { %v11482_v26 = vadd.f32 %v7966_v8, %v2576_v52  ;;  %v11493_v8 = vld [vmem:[%s13189_s2] ss:$0 sm:$0xff] }
 0x1ff   :  { %v2736_v6 = vmax.f32 %v11476_v24, %v11478_v51  ;;  %v7648_v32 = vpop.f32.mrb[80].mxu0  ;;  %v6148_v51 = vld [vmem:[%s13188_s3 + $0x90] sm:$0xff] }
 0x200   :  { %v2735_v14 = vmax.f32 %v11480_v16, %v11482_v26  ;;  %v1427_v33 = vadd.f32 %v7648_v32, %v11436_v12  ;;  %v8008_v60 = vpop.f32.mrb[80].mxu1  ;;  %v1304_v39 = vpop.f32.mrb[81].mxu0 }
 0x201   :  { %v2709_v43 = vadd.f32 %v8008_v60, %v11438_v28  ;;  %v2586_v46 = vpop.f32.mrb[81].mxu1  ;;  %v6141_v28 = vld [vmem:[%s13188_s3 + $0x58] sm:$0xff] }
 0x202   :  { %v11507_v52 = vpack.c.bf16 %v6142_v54, %v6141_v28 }
 0x203   :  { %v2737_v5 = vmax.f32 %v1427_v33, %v2709_v43  ;;  %v7651_v40 = vpop.f32.mrb[82].mxu0 }
 0x204   :  { %v1429_v3 = vadd.f32 %v7651_v40, %v11440_v30  ;;  %v8011_v13 = vpop.f32.mrb[82].mxu1  ;;  %v1313_v56 = vpop.f32.mrb[83].mxu0 }
 0x205   :  { %v2744_v22 = vmax.f32 %v2730_v31, %v2737_v5  ;;  %v2711_v63 = vadd.f32 %v8011_v13, %v11442_v36  ;;  %v1428_v12 = vadd.f32 %v1313_v56, %v11444_v38  ;;  %v2595_v49 = vpop.f32.mrb[83].mxu1  ;;  %v6144_v5 = vld [vmem:[%s13188_s3 + $0x70] sm:$0xff]  ;;  %v13214_v13 = vmov 0.0  }
 0x206   :  { %v2710_v57 = vadd.f32 %v2595_v49, %v11446_v42  ;;  %v13215_v49 = vmov 0.0|0.0  }
 0x207   :  { %v2758_v30 = vadd.f32 %v11493_v8, %v2744_v22  ;;  %v2739_v29 = vmax.f32 %v1429_v3, %v2711_v63  ;;  %v7654_v21 = vpop.f32.mrb[84].mxu0 }
 0x208   :  { %v2738_v31 = vmax.f32 %v1428_v12, %v2710_v57  ;;  %v1431_v36 = vadd.f32 %v7654_v21, %v11448_v41  ;;  %v8014_v23 = vpop.f32.mrb[84].mxu1  ;;  %v1323_v38 = vpop.f32.mrb[85].mxu0  ;;  %v6143_v41 = vld [vmem:[%s13188_s3 + $0x68] sm:$0xff] }
 0x209   :  { %v11509_v32 = vmax.f32 %v2758_v30, 0.0  ;;  %v2746_v33 = vmax.f32 %v2732_v15, %v2739_v29  ;;  %v2713_v60 = vadd.f32 %v8014_v23, %v11450_v47  ;;  %v1430_v39 = vadd.f32 %v1323_v38, %v11452_v58  ;;  %v2605_v42 = vpop.f32.mrb[85].mxu1 }
 0x20a   :  { %v2745_v43 = vmax.f32 %v2731_v10, %v2738_v31  ;;  %v2712_v46 = vadd.f32 %v2605_v42, %v11454_v45  ;;  %v11530_v28 = vpack.c.bf16 %v6144_v5, %v6143_v41 }
 0x20b   :  { %v2741_v40 = vmax.f32 %v1431_v36, %v2713_v60  ;;  %8065 = vmatmul.mubr.msk.f32.vlgmr.msra.gmra.mrb[88].mxu0 %vm2818_vm3, %v11509_v32  ;;  %v7657_v15 = vpop.f32.mrb[86].mxu0  ;;  %v2760_v54 = vadd.f32 %v11493_v8, %v2746_v33 }
 0x20c   :  { %v2759_v47 = vadd.f32 %v11493_v8, %v2745_v43  ;;  %v2740_v58 = vmax.f32 %v1430_v39, %v2712_v46  ;;  %v1433_v10 = vadd.f32 %v7657_v15, %v11456_v1  ;;  %v8017_v3 = vpop.f32.mrb[86].mxu1  ;;  %v1333_v45 = vpop.f32.mrb[87].mxu0  ;;  %8067 = vmatprep.mubr.msk.f32.mxu0 %vm10092_vm2, %v13214_v13  ;;  %9374 = vmatpush3.bf16.msra.mxu0 %v11507_v52 }
 0x20d   :  { %v2748_v56 = vmax.f32 %v2734_v27, %v2741_v40  ;;  %v2715_v22 = vadd.f32 %v8017_v3, %v11458_v53  ;;  %v1432_v63 = vadd.f32 %v1333_v45, %v11460_v55  ;;  %v2615_v12 = vpop.f32.mrb[87].mxu1  ;;  %9375 = vmatprep.subr.bf16.mxu0 %v13215_v49  ;;  %v6145_v53 = vld [vmem:[%s13188_s3 + $0x78] sm:$0xff]  ;;  %v6146_v55 = vld [vmem:[%s13188_s3 + $0x80] sm:$0xff]  ;;  %v11561_v23 = vmax.f32 %v2760_v54, 0.0 }
 0x20e   :  { %v11533_v1 = vmax.f32 %v2759_v47, 0.0  ;;  %v2747_v57 = vmax.f32 %v2733_v18, %v2740_v58  ;;  %v2714_v30 = vadd.f32 %v2615_v12, %v11462_v19 }
 0x20f   :  { %v2743_v27 = vmax.f32 %v1433_v10, %v2715_v22  ;;  %v7660_v29 = vpop.f32.mrb[64].mxu0 }
 0x210   :  { %v2742_v21 = vmax.f32 %v1432_v63, %v2714_v30  ;;  %v11546_v31 = vadd.f32 %v7660_v29, %v11363_v62  ;;  %v8020_v36 = vpop.f32.mrb[64].mxu1  ;;  %8068 = vmatmul.mubr.msk.f32.gmra.mrb[90].mxu0 %vm2818_vm3, %v11533_v1  ;;  %v1343_v59 = vpop.f32.mrb[65].mxu0  ;;  %v11559_v62 = vpack.c.bf16 %v6146_v55, %v6145_v53  ;;  %v2761_v38 = vadd.f32 %v11493_v8, %v2747_v57 }
 0x211   :  { %v2750_v19 = vmax.f32 %v2736_v6, %v2743_v27  ;;  %v11554_v44 = vadd.f32 %v8020_v36, %v11365_v2  ;;  %v2625_v18 = vpop.f32.mrb[65].mxu1  ;;  %8070 = vmatprep.mubr.msk.f32.mxu0 %vm10092_vm2, %v13214_v13  ;;  %9377 = vmatpush3.bf16.msra.mxu0 %v11530_v28  ;;  %v6147_v2 = vld [vmem:[%s13188_s3 + $0x88] sm:$0xff] }
 0x212   :  { %v2749_v24 = vmax.f32 %v2735_v14, %v2742_v21  ;;  %9378 = vmatprep.subr.bf16.mxu0 %v13215_v49  ;;  %v11590_v43 = vpack.c.bf16 %v6148_v51, %v6147_v2  ;;  %v11593_v46 = vmax.f32 %v2761_v38, 0.0  ;;  %v13216_v51 = vld [vmem:[#allocation2_spill] sm:$0xff] }
 0x213   :  { %v2772_v6 = vmax.f32 %v11546_v31, %v11554_v44  ;;  %v7663_v33 = vpop.f32.mrb[66].mxu0  ;;  %v6169_v31 = vld [vmem:[%s13188_s3 + $0xb8] sm:$0xff] }
 0x214   :  { %v11577_v60 = vadd.f32 %v7663_v33, %v11369_v4  ;;  %v8023_v39 = vpop.f32.mrb[66].mxu1  ;;  %8071 = vmatmul.mubr.msk.f32.gmra.mrb[92].mxu0 %vm2818_vm3, %v11561_v23  ;;  %v1352_v16 = vpop.f32.mrb[67].mxu0  ;;  %v2762_v4 = vadd.f32 %v11493_v8, %v2748_v56  ;;  %v2763_v22 = vadd.f32 %v11493_v8, %v2749_v24 }
 0x215   :  { %v11582_v26 = vadd.f32 %v8023_v39, %v11371_v61  ;;  %v11585_v14 = vadd.f32 %v1352_v16, %v11373_v7  ;;  %v2634_v42 = vpop.f32.mrb[67].mxu1  ;;  %8073 = vmatprep.mubr.msk.f32.mxu0 %vm10092_vm2, %v13214_v13  ;;  %9380 = vmatpush3.bf16.msra.mxu0 %v11559_v62  ;;  %v6149_v61 = vld [vmem:[%s13188_s3 + $0x98] sm:$0xff]  ;;  %v6150_v7 = vld [vmem:[%s13188_s3 + $0xa0] sm:$0xff] }
 0x216   :  { %v11596_v41 = vadd.f32 %v2634_v42, %v11375_v0  ;;  %9381 = vmatprep.subr.bf16.mxu0 %v13215_v49  ;;  %v11623_v56 = vpack.c.bf16 %v6150_v7, %v6149_v61  ;;  %v11651_v27 = vmax.f32 %v2763_v22, 0.0  ;;  %v13217_v42 = vld [vmem:[#allocation3_spill] sm:$0xff]  ;;  %v13218_v61 = vld [vmem:[#allocation4_spill] sm:$0xff] }
 0x217   :  { %v2774_v5 = vmax.f32 %v11577_v60, %v11582_v26  ;;  %v7666_v40 = vpop.f32.mrb[68].mxu0 }
 0x218   :  { %v2773_v15 = vmax.f32 %v11585_v14, %v11596_v41  ;;  %v11610_v0 = vadd.f32 %v7666_v40, %v11383_v11  ;;  %v8026_v47 = vpop.f32.mrb[68].mxu1  ;;  %8074 = vmatmul.mubr.msk.f32.gmra.mrb[94].mxu0 %vm2818_vm3, %v11593_v46  ;;  %v1362_v58 = vpop.f32.mrb[69].mxu0  ;;  %v11625_v11 = vmax.f32 %v2762_v4, 0.0  ;;  %v6170_v41 = vld [vmem:[%s13188_s3 + $0xc0] sm:$0xff] }
 0x219   :  { %v11615_v10 = vadd.f32 %v8026_v47, %v11385_v17  ;;  %v11618_v3 = vadd.f32 %v1362_v58, %v11387_v25  ;;  %v2644_v45 = vpop.f32.mrb[69].mxu1  ;;  %8076 = vmatprep.mubr.msk.f32.mxu0 %vm10092_vm2, %v13214_v13  ;;  %9383 = vmatpush3.bf16.msra.mxu0 %v11590_v43  ;;  %v13219_v47 = vld [vmem:[#allocation5_spill] sm:$0xff] }
 0x21a   :  { %v11629_v63 = vadd.f32 %v2644_v45, %v11389_v20  ;;  %9384 = vmatprep.subr.bf16.mxu0 %v13215_v49 }
 0x21b   :  { %v2776_v17 = vmax.f32 %v11610_v0, %v11615_v10  ;;  %v7669_v25 = vpop.f32.mrb[70].mxu0  ;;  %v13227_v0 = vld [vmem:[#allocation13_spill] sm:$0xff] }
 0x21c   :  { %v2775_v12 = vmax.f32 %v11618_v3, %v11629_v63  ;;  %v11637_v54 = vadd.f32 %v7669_v25, %v11399_v50  ;;  %v8029_v57 = vpop.f32.mrb[70].mxu1  ;;  %8077 = vmatmul.mubr.msk.f32.gmra.mrb[96].mxu0 %vm2818_vm3, %v11625_v11  ;;  %v1372_v30 = vpop.f32.mrb[71].mxu0  ;;  %v2764_v50 = vadd.f32 %v11493_v8, %v2750_v19 }
 0x21d   :  { %v11642_v20 = vadd.f32 %v8029_v57, %v11401_v34  ;;  %v11645_v53 = vadd.f32 %v1372_v30, %v11403_v35  ;;  %v2654_v55 = vpop.f32.mrb[71].mxu1  ;;  %8079 = vmatprep.mubr.msk.f32.mxu0 %vm10092_vm2, %v13214_v13  ;;  %9386 = vmatpush3.bf16.msra.mxu0 %v11623_v56  ;;  %v11660_v34 = vld [vmem:[%s13188_s3 + $0xa8] sm:$0xf]  ;;  %v6168_v57 = vld [vmem:[%s13188_s3 + $0xb0] sm:$0xff] }
 0x21e   :  { %v11654_v29 = vadd.f32 %v2654_v55, %v11405_v37  ;;  %8191 = vmatprep.subr.mxu0 %v13214_v13  ;;  %v11674_v24 = vmax.f32 %v2764_v50, 0.0 }
 0x21f   :  { %v2778_v35 = vmax.f32 %v11637_v54, %v11642_v20  ;;  %v7672_v21 = vpop.f32.mrb[48].mxu0  ;;  %v6173_v54 = vld [vmem:[%s13188_s3 + $0xd8] sm:$0xff] }
 0x220   :  { %v2777_v36 = vmax.f32 %v11645_v53, %v11654_v29  ;;  %v9750_v59 = vadd.f32 %v7672_v21, %v11243_v9  ;;  %v8032_v19 = vpop.f32.mrb[48].mxu1  ;;  %8080 = vmatmul.mubr.msk.f32.gmra.mrb[98].mxu0 %vm2818_vm3, %v11651_v27  ;;  %v1382_v37 = vpop.f32.mrb[49].mxu0 }
 0x221   :  { %v9764_v18 = vadd.f32 %v8032_v19, %v11247_v48  ;;  %v2664_v38 = vpop.f32.mrb[49].mxu1  ;;  %8082 = vmatprep.mubr.msk.f32.mxu0 %vm10092_vm2, %v13214_v13  ;;  %8192 = vmatpush3.msk.msra.mxu0 %vm2840_vm1, %v11660_v34  ;;  %v13221_v19 = vld [vmem:[#allocation7_spill] sm:$0xff] }
 0x222   :  { %9387 = vmatprep.subr.bf16.mxu0 %v13215_v49 }
 0x223   :  { %v2779_v2 = vmax.f32 %v9750_v59, %v9764_v18  ;;  %v7675_v9 = vpop.f32.mrb[50].mxu0  ;;  %v13222_v18 = vld [vmem:[#allocation8_spill] sm:$0xff] }
 0x224   :  { %v9751_v33 = vadd.f32 %v7675_v9, %v13216_v51  ;;  %v8035_v39 = vpop.f32.mrb[50].mxu1  ;;  %8083 = vmatmul.mubr.msk.f32.gmra.mrb[100].mxu0 %vm2818_vm3, %v11674_v24  ;;  %v1391_v48 = vpop.f32.mrb[51].mxu0  ;;  %v13223_v51 = vld [vmem:[#allocation9_spill] sm:$0xff] }
 0x225   :  { %v2786_v16 = vmax.f32 %v2772_v6, %v2779_v2  ;;  %v9765_v4 = vadd.f32 %v8035_v39, %v13217_v42  ;;  %v9752_v7 = vadd.f32 %v1391_v48, %v13218_v61  ;;  %v2673_v40 = vpop.f32.mrb[51].mxu1  ;;  %8193 = vmatprep.mubr.msk.f32.mxu0 %vm10092_vm2, %v13214_v13  ;;  %v13220_v6 = vld [vmem:[#allocation6_spill] sm:$0xff]  ;;  %v11707_v39 = vpack.c.bf16 %v6169_v31, %v6168_v57 }
 0x226   :  { %v9766_v58 = vadd.f32 %v2673_v40, %v13219_v47  ;;  %v13226_v47 = vld [vmem:[#allocation12_spill] sm:$0xff] }
 0x227   :  { %v2793_v45 = vadd.f32 %v11493_v8, %v2786_v16  ;;  %v2781_v22 = vmax.f32 %v9751_v33, %v9765_v4  ;;  %v7678_v25 = vpop.f32.mrb[52].mxu0  ;;  %v13224_v16 = vld [vmem:[#allocation10_spill] sm:$0xff] }
 0x228   :  { %v2780_v44 = vmax.f32 %v9752_v7, %v9766_v58  ;;  %v9753_v30 = vadd.f32 %v7678_v25, %v13220_v6  ;;  %v8038_v55 = vpop.f32.mrb[52].mxu1  ;;  %v1401_v50 = vpop.f32.mrb[53].mxu0  ;;  %v13225_v7 = vld [vmem:[#allocation11_spill] sm:$0xff] }
 0x229   :  { %v11696_v21 = vmax.f32 %v2793_v45, 0.0  ;;  %v2788_v59 = vmax.f32 %v2774_v5, %v2781_v22  ;;  %v9767_v37 = vadd.f32 %v8038_v55, %v13221_v19  ;;  %v9754_v38 = vadd.f32 %v1401_v50, %v13222_v18  ;;  %v2683_v2 = vpop.f32.mrb[53].mxu1  ;;  %v6176_v55 = vld [vmem:[%s13188_s3 + $0xf0] sm:$0xff] }
 0x22a   :  { %v2787_v9 = vmax.f32 %v2773_v15, %v2780_v44  ;;  %v9768_v33 = vadd.f32 %v2683_v2, %v13223_v51  ;;  %v6171_v15 = vld [vmem:[%s13188_s3 + $0xc8] sm:$0xff]  ;;  %v6198_v2 = vld [vmem:[%s13188_s3 + $0x120] sm:$0xff] }
 0x22b   :  { %v2783_v48 = vmax.f32 %v9753_v30, %v9767_v37  ;;  %8108 = vmatmul.mubr.msk.f32.vlgmr.msra.gmra.mrb[88].mxu1 %vm2818_vm3, %v11696_v21  ;;  %8194 = vmatmul.mubr.msk.f32.vlgmr.msra.gmra.mrb[88].mxu0 %vm2818_vm3, %v11696_v21  ;;  %v7681_v60 = vpop.f32.mrb[54].mxu0  ;;  %v2795_v45 = vadd.f32 %v11493_v8, %v2788_v59  ;;  %v11741_v57 = vpack.c.bf16 %v6171_v15, %v6170_v41  ;;  %v6195_v37 = vld [vmem:[%s13188_s3 + $0x108] sm:$0xff] }
 0x22c   :  { %v2794_v26 = vadd.f32 %v11493_v8, %v2787_v9  ;;  %v2782_v5 = vmax.f32 %v9754_v38, %v9768_v33  ;;  %v9755_v42 = vadd.f32 %v7681_v60, %v13224_v16  ;;  %v8041_v4 = vpop.f32.mrb[54].mxu1  ;;  %v1411_v14 = vpop.f32.mrb[55].mxu0  ;;  %9359 = vmatpush3.bf16.msra.mxu1 %v11507_v52  ;;  %8110 = vmatprep.mubr.msk.f32.mxu1 %vm10092_vm2, %v13214_v13  ;;  %v6197_v38 = vld [vmem:[%s13188_s3 + $0x118] sm:$0xff]  ;;  %v6199_v51 = vld [vmem:[%s13188_s3 + $0x128] sm:$0xff]  ;;  %v6200_v33 = vld [vmem:[%s13188_s3 + $0x130] sm:$0xff] }
 0x22d   :  { %v2790_v61 = vmax.f32 %v2776_v17, %v2783_v48  ;;  %v9769_v40 = vadd.f32 %v8041_v4, %v13225_v7  ;;  %v9756_v58 = vadd.f32 %v1411_v14, %v13226_v47  ;;  %v2693_v52 = vpop.f32.mrb[55].mxu1  ;;  %8196 = vmatprep.mubr.msk.f32.mxu0 %vm10092_vm2, %v13214_v13  ;;  %9360 = vmatprep.subr.bf16.mxu1 %v13215_v49  ;;  %v11753_v63 = vmax.f32 %v2795_v45, 0.0  ;;  %v6201_v48 = vld [vmem:[%s13188_s3 + $0x138] sm:$0xff]  ;;  %v6202_v60 = vld [vmem:[%s13188_s3 + $0x140] sm:$0xff]  ;;  %v6204_v16 = vld [vmem:[%s13188_s3 + $0x150] sm:$0xff] }
 0x22e   :  { %v11733_v22 = vmax.f32 %v2794_v26, 0.0  ;;  %v2789_v25 = vmax.f32 %v2775_v12, %v2782_v5  ;;  %v9770_v10 = vadd.f32 %v2693_v52, %v13227_v0  ;;  %9389 = vmatpush3.bf16.msra.mxu0 %v11707_v39  ;;  %v11897_v9 = vpack.c.bf16 %v6198_v2, %v6197_v38  ;;  %v6203_v5 = vld [vmem:[%s13188_s3 + $0x148] sm:$0xff]  ;;  %v11975_v4 = vld [vmem:[%s13188_s3 + $0x158] sm:$0xf]  ;;  %v6222_v14 = vld [vmem:[%s13188_s3 + $0x160] sm:$0xff] }
 0x22f   :  { %v2785_v17 = vmax.f32 %v9755_v42, %v9769_v40  ;;  %9390 = vmatprep.subr.bf16.mxu0 %v13215_v49  ;;  %v2797_v20 = vadd.f32 %v11493_v8, %v2790_v61  ;;  %v11936_v26 = vpack.c.bf16 %v6202_v60, %v6201_v48  ;;  %v11956_v42 = vpack.c.bf16 %v6204_v16, %v6203_v5  ;;  %v6223_v41 = vld [vmem:[%s13188_s3 + $0x168] sm:$0xff]  ;;  %v6224_v61 = vld [vmem:[%s13188_s3 + $0x170] sm:$0xff]  ;;  %v6225_v7 = vld [vmem:[%s13188_s3 + $0x178] sm:$0xff] }
 0x230   :  { %v2784_v31 = vmax.f32 %v9756_v58, %v9770_v10  ;;  %8111 = vmatmul.mubr.msk.f32.gmra.mrb[90].mxu1 %vm2818_vm3, %v11733_v22  ;;  %8197 = vmatmul.mubr.msk.f32.gmra.mrb[90].mxu0 %vm2818_vm3, %v11733_v22  ;;  %v2796_v12 = vadd.f32 %v11493_v8, %v2789_v25  ;;  %v11995_v15 = vpack.c.bf16 %v6223_v41, %v6222_v14  ;;  %v6226_v47 = vld [vmem:[%s13188_s3 + $0x180] sm:$0xff]  ;;  %v6227_v58 = vld [vmem:[%s13188_s3 + $0x188] sm:$0xff]  ;;  %v6228_v45 = vld [vmem:[%s13188_s3 + $0x190] sm:$0xff] }
 0x231   :  { %v2792_v3 = vmax.f32 %v2778_v35, %v2785_v17  ;;  %9362 = vmatpush3.bf16.msra.mxu1 %v11530_v28  ;;  %8113 = vmatprep.mubr.msk.f32.mxu1 %vm10092_vm2, %v13214_v13  ;;  %v6172_v28 = vld [vmem:[%s13188_s3 + $0xd0] sm:$0xff]  ;;  %v6174_v35 = vld [vmem:[%s13188_s3 + $0xe0] sm:$0xff]  ;;  %v12024_v40 = vpack.c.bf16 %v6225_v7, %v6224_v61  ;;  %v12043_v52 = vpack.c.bf16 %v6227_v58, %v6226_v47  ;;  %v6229_v25 = vld [vmem:[%s13188_s3 + $0x198] sm:$0xff] }
 0x232   :  { %v2791_v44 = vmax.f32 %v2777_v36, %v2784_v31  ;;  %8199 = vmatprep.mubr.msk.f32.mxu0 %vm10092_vm2, %v13214_v13  ;;  %9363 = vmatprep.subr.bf16.mxu1 %v13215_v49  ;;  %v11777_v53 = vmax.f32 %v2796_v12, 0.0  ;;  %v11782_v29 = vpack.c.bf16 %v6173_v54, %v6172_v28  ;;  %v11798_v36 = vmax.f32 %v2797_v20, 0.0  ;;  %v6230_v10 = vld [vmem:[%s13188_s3 + $0x1a0] sm:$0xff]  ;;  %v6231_v17 = vld [vmem:[%s13188_s3 + $0x1a8] sm:$0xff]  ;;  %v12102_v31 = vld [vmem:[%s13188_s3 + $0x1b0] sm:$0xf] }
 0x233   :  { %9392 = vmatpush3.bf16.msra.mxu0 %v11741_v57  ;;  %v2799_v50 = vadd.f32 %v11493_v8, %v2792_v3  ;;  %v12063_v0 = vpack.c.bf16 %v6229_v25, %v6228_v45  ;;  %v6249_v3 = vld [vmem:[%s13188_s3 + $0x1b8] sm:$0xff]  ;;  %v6250_v12 = vld [vmem:[%s13188_s3 + $0x1c0] sm:$0xff]  ;;  %v6251_v28 = vld [vmem:[%s13188_s3 + $0x1c8] sm:$0xff] }
 0x234   :  { %8114 = vmatmul.mubr.msk.f32.gmra.mrb[92].mxu1 %vm2818_vm3, %v11753_v63  ;;  %8200 = vmatmul.mubr.msk.f32.gmra.mrb[92].mxu0 %vm2818_vm3, %v11753_v63  ;;  %v2798_v6 = vadd.f32 %v11493_v8, %v2791_v44  ;;  %v12122_v44 = vpack.c.bf16 %v6250_v12, %v6249_v3  ;;  %v6252_v54 = vld [vmem:[%s13188_s3 + $0x1d0] sm:$0xff]  ;;  %v6278_v38 = vld [vmem:[%s13188_s3 + $0x220] sm:$0xff]  ;;  %v6279_v2 = vld [vmem:[%s13188_s3 + $0x228] sm:$0xff] }
 0x235   :  { %8116 = vmatprep.mubr.msk.f32.mxu1 %vm10092_vm2, %v13214_v13  ;;  %9365 = vmatpush3.bf16.msra.mxu1 %v11559_v62  ;;  %v6175_v62 = vld [vmem:[%s13188_s3 + $0xe8] sm:$0xff]  ;;  %v11839_v8 = vmax.f32 %v2799_v50, 0.0  ;;  %v12151_v20 = vpack.c.bf16 %v6252_v54, %v6251_v28  ;;  %v6258_v50 = vld [vmem:[%s13188_s3 + $0x200] sm:$0xff]  ;;  %v6284_v5 = vld [vmem:[%s13188_s3 + $0x250] sm:$0xff] }
 0x236   :  { %8202 = vmatprep.mubr.msk.f32.mxu0 %vm10092_vm2, %v13214_v13  ;;  %9366 = vmatprep.subr.bf16.mxu1 %v13215_v49  ;;  %v11804_v30 = vpack.c.bf16 %v6175_v62, %v6174_v35  ;;  %v11823_v59 = vmax.f32 %v2798_v6, 0.0  ;;  %v6254_v35 = vld [vmem:[%s13188_s3 + $0x1e0] sm:$0xff]  ;;  %v6255_v6 = vld [vmem:[%s13188_s3 + $0x1e8] sm:$0xff]  ;;  %v6285_v16 = vld [vmem:[%s13188_s3 + $0x258] sm:$0xff] }
 0x237   :  { %9393 = vmatprep.subr.bf16.mxu0 %v13215_v49  ;;  %v6282_v48 = vld [vmem:[%s13188_s3 + $0x240] sm:$0xff]  ;;  %v6283_v60 = vld [vmem:[%s13188_s3 + $0x248] sm:$0xff]  ;;  %v6304_v41 = vld [vmem:[%s13188_s3 + $0x270] sm:$0xff] }
 0x238   :  { %8117 = vmatmul.mubr.msk.f32.gmra.mrb[94].mxu1 %vm2818_vm3, %v11777_v53  ;;  %8203 = vmatmul.mubr.msk.f32.gmra.mrb[94].mxu0 %vm2818_vm3, %v11777_v53  ;;  %v6303_v14 = vld [vmem:[%s13188_s3 + $0x268] sm:$0xff]  ;;  %v6305_v61 = vld [vmem:[%s13188_s3 + $0x278] sm:$0xff]  ;;  %v6306_v7 = vld [vmem:[%s13188_s3 + $0x280] sm:$0xff] }
 0x239   :  { %8119 = vmatprep.mubr.msk.f32.mxu1 %vm10092_vm2, %v13214_v13  ;;  %9368 = vmatpush3.bf16.msra.mxu1 %v11590_v43  ;;  %v6177_v43 = vld [vmem:[%s13188_s3 + $0xf8] sm:$0xff]  ;;  %v6307_v47 = vld [vmem:[%s13188_s3 + $0x288] sm:$0xff]  ;;  %v6308_v58 = vld [vmem:[%s13188_s3 + $0x290] sm:$0xff] }
 0x23a   :  { %8205 = vmatprep.mubr.msk.f32.mxu0 %vm10092_vm2, %v13214_v13  ;;  %9395 = vmatpush3.bf16.msra.mxu0 %v11782_v29  ;;  %v11827_v19 = vpack.c.bf16 %v6177_v43, %v6176_v55  ;;  %v6257_v43 = vld [vmem:[%s13188_s3 + $0x1f8] sm:$0xff]  ;;  %v6310_v25 = vld [vmem:[%s13188_s3 + $0x2a0] sm:$0xff]  ;;  %v6331_v12 = vld [vmem:[%s13188_s3 + $0x2c8] sm:$0xff] }
 0x23b   :  { %9396 = vmatprep.subr.bf16.mxu0 %v13215_v49  ;;  %9369 = vmatprep.subr.bf16.mxu1 %v13215_v49  ;;  %v6309_v45 = vld [vmem:[%s13188_s3 + $0x298] sm:$0xff]  ;;  %v6330_v3 = vld [vmem:[%s13188_s3 + $0x2c0] sm:$0xff]  ;;  %v6332_v28 = vld [vmem:[%s13188_s3 + $0x2d0] sm:$0xff] }
 0x23c   :  { %8120 = vmatmul.mubr.msk.f32.gmra.mrb[96].mxu1 %vm2818_vm3, %v11798_v36  ;;  %8206 = vmatmul.mubr.msk.f32.gmra.mrb[96].mxu0 %vm2818_vm3, %v11798_v36  ;;  %v6333_v54 = vld [vmem:[%s13188_s3 + $0x2d8] sm:$0xff] }
 0x23d   :  { %8122 = vmatprep.mubr.msk.f32.mxu1 %vm10092_vm2, %v13214_v13  ;;  %8208 = vmatprep.mubr.msk.f32.mxu0 %vm10092_vm2, %v13214_v13 }
 0x23e   :  { %9398 = vmatpush3.bf16.msra.mxu0 %v11804_v30  ;;  %9371 = vmatpush3.bf16.msra.mxu1 %v11623_v56  ;;  %v11848_v56 = vld [vmem:[%s13188_s3 + $0x100] sm:$0xf] }
 0x23f   :  { %9399 = vmatprep.subr.bf16.mxu0 %v13215_v49  ;;  %8148 = vmatprep.subr.mxu1 %v13214_v13 }
 0x240   :  { %8123 = vmatmul.mubr.msk.f32.gmra.mrb[98].mxu1 %vm2818_vm3, %v11823_v59  ;;  %8209 = vmatmul.mubr.msk.f32.gmra.mrb[102].mxu0 %vm2818_vm3, %v11823_v59 }
 0x241   :  { %8125 = vmatprep.mubr.msk.f32.mxu1 %vm10092_vm2, %v13214_v13  ;;  %8211 = vmatprep.mubr.msk.f32.mxu0 %vm10092_vm2, %v13214_v13 }
 0x242   :  { %9401 = vmatpush3.bf16.msra.mxu0 %v11827_v19  ;;  %8149 = vmatpush3.msk.msra.mxu1 %vm2840_vm1, %v11660_v34  ;;  %v6196_v34 = vld [vmem:[%s13188_s3 + $0x110] sm:$0xff] }
 0x243   :  { %8234 = vmatprep.subr.mxu0 %v13214_v13  ;;  %9402 = vmatprep.subr.bf16.mxu1 %v13215_v49  ;;  %v11868_v18 = vpack.c.bf16 %v6196_v34, %v6195_v37  ;;  %v6276_v37 = vld [vmem:[%s13188_s3 + $0x210] sm:$0xff]  ;;  %v6277_v34 = vld [vmem:[%s13188_s3 + $0x218] sm:$0xff] }
 0x244   :  { %8126 = vmatmul.mubr.msk.f32.gmra.mrb[100].mxu1 %vm2818_vm3, %v11839_v8  ;;  %8212 = vmatmul.mubr.msk.f32.gmra.mrb[104].mxu0 %vm2818_vm3, %v11839_v8 }
 0x245   :  { %8150 = vmatprep.mubr.msk.f32.mxu1 %vm10092_vm2, %v13214_v13  ;;  %8236 = vmatprep.mubr.msk.f32.mxu0 %vm10092_vm2, %v13214_v13 }
 0x246   :  { %8235 = vmatpush3.msk.msra.mxu0 %vm2840_vm1, %v11848_v56 }
 0x247   :  { %9432 = vmatprep.subr.bf16.mxu0 %v13215_v49 }
 0x248   :  { %8151 = vmatmul.mubr.msk.f32.vlgmr.msra.gmra.mrb[102].mxu1 %vm2818_vm3, %v11509_v32  ;;  %8237 = vmatmul.mubr.msk.f32.vlgmr.msra.gmra.mrb[106].mxu0 %vm2818_vm3, %v11509_v32 }
 0x249   :  { %9404 = vmatpush3.bf16.msra.mxu1 %v11707_v39  ;;  %8153 = vmatprep.mubr.msk.f32.mxu1 %vm10092_vm2, %v13214_v13  ;;  %v11916_v39 = vpack.c.bf16 %v6200_v33, %v6199_v51  ;;  %v6280_v51 = vld [vmem:[%s13188_s3 + $0x230] sm:$0xff]  ;;  %v6281_v33 = vld [vmem:[%s13188_s3 + $0x238] sm:$0xff] }
 0x24a   :  { %8239 = vmatprep.mubr.msk.f32.mxu0 %vm10092_vm2, %v13214_v13  ;;  %9405 = vmatprep.subr.bf16.mxu1 %v13215_v49 }
 0x24b   :  { %9434 = vmatpush3.bf16.msra.mxu0 %v11868_v18 }
 0x24c   :  { %8154 = vmatmul.mubr.msk.f32.gmra.mrb[88].mxu1 %vm2818_vm3, %v11533_v1  ;;  %8240 = vmatmul.mubr.msk.f32.gmra.mrb[88].mxu0 %vm2818_vm3, %v11533_v1 }
 0x24d   :  { %9407 = vmatpush3.bf16.msra.mxu1 %v11741_v57  ;;  %8156 = vmatprep.mubr.msk.f32.mxu1 %vm10092_vm2, %v13214_v13  ;;  %v12083_v57 = vpack.c.bf16 %v6231_v17, %v6230_v10  ;;  %v6311_v10 = vld [vmem:[%s13188_s3 + $0x2a8] sm:$0xff]  ;;  %v6312_v17 = vld [vmem:[%s13188_s3 + $0x2b0] sm:$0xff] }
 0x24e   :  { %8242 = vmatprep.mubr.msk.f32.mxu0 %vm10092_vm2, %v13214_v13  ;;  %9408 = vmatprep.subr.bf16.mxu1 %v13215_v49 }
 0x24f   :  { %9435 = vmatprep.subr.bf16.mxu0 %v13215_v49 }
 0x250   :  { %8157 = vmatmul.mubr.msk.f32.gmra.mrb[90].mxu1 %vm2818_vm3, %v11561_v23  ;;  %8243 = vmatmul.mubr.msk.f32.gmra.mrb[90].mxu0 %vm2818_vm3, %v11561_v23 }
 0x251   :  { %8159 = vmatprep.mubr.msk.f32.mxu1 %vm10092_vm2, %v13214_v13  ;;  %8245 = vmatprep.mubr.msk.f32.mxu0 %vm10092_vm2, %v13214_v13 }
 0x252   :  { %9410 = vmatpush3.bf16.msra.mxu1 %v11782_v29  ;;  %9437 = vmatpush3.bf16.msra.mxu0 %v11897_v9  ;;  %v6253_v29 = vld [vmem:[%s13188_s3 + $0x1d8] sm:$0xff] }
 0x253   :  { %9411 = vmatprep.subr.bf16.mxu1 %v13215_v49  ;;  %9438 = vmatprep.subr.bf16.mxu0 %v13215_v49  ;;  %v12170_v62 = vpack.c.bf16 %v6254_v35, %v6253_v29  ;;  %v6334_v29 = vld [vmem:[%s13188_s3 + $0x2e0] sm:$0xff]  ;;  %v6335_v35 = vld [vmem:[%s13188_s3 + $0x2e8] sm:$0xff] }
 0x254   :  { %8160 = vmatmul.mubr.msk.f32.gmra.mrb[92].mxu1 %vm2818_vm3, %v11593_v46  ;;  %8246 = vmatmul.mubr.msk.f32.gmra.mrb[92].mxu0 %vm2818_vm3, %v11593_v46 }
 0x255   :  { %8162 = vmatprep.mubr.msk.f32.mxu1 %vm10092_vm2, %v13214_v13  ;;  %8248 = vmatprep.mubr.msk.f32.mxu0 %vm10092_vm2, %v13214_v13 }
 0x256   :  { %9413 = vmatpush3.bf16.msra.mxu1 %v11804_v30  ;;  %9440 = vmatpush3.bf16.msra.mxu0 %v11916_v39  ;;  %v6256_v30 = vld [vmem:[%s13188_s3 + $0x1f0] sm:$0xff] }
 0x257   :  { %9441 = vmatprep.subr.bf16.mxu0 %v13215_v49  ;;  %9414 = vmatprep.subr.bf16.mxu1 %v13215_v49  ;;  %v12190_v55 = vpack.c.bf16 %v6256_v30, %v6255_v6  ;;  %v6336_v6 = vld [vmem:[%s13188_s3 + $0x2f0] sm:$0xff]  ;;  %v6337_v30 = vld [vmem:[%s13188_s3 + $0x2f8] sm:$0xff] }
 0x258   :  { %8163 = vmatmul.mubr.msk.f32.gmra.mrb[94].mxu1 %vm2818_vm3, %v11625_v11  ;;  %8249 = vmatmul.mubr.msk.f32.gmra.mrb[94].mxu0 %vm2818_vm3, %v11625_v11 }
 0x259   :  { %8165 = vmatprep.mubr.msk.f32.mxu1 %vm10092_vm2, %v13214_v13  ;;  %8251 = vmatprep.mubr.msk.f32.mxu0 %vm10092_vm2, %v13214_v13 }
 0x25a   :  { %9443 = vmatpush3.bf16.msra.mxu0 %v11936_v26  ;;  %9416 = vmatpush3.bf16.msra.mxu1 %v11827_v19  ;;  %v12210_v19 = vpack.c.bf16 %v6258_v50, %v6257_v43  ;;  %v6338_v43 = vld [vmem:[%s13188_s3 + $0x300] sm:$0xff]  ;;  %v6339_v50 = vld [vmem:[%s13188_s3 + $0x308] sm:$0xff] }
 0x25b   :  { %9444 = vmatprep.subr.bf16.mxu0 %v13215_v49  ;;  %8277 = vmatprep.subr.mxu1 %v13214_v13 }
 0x25c   :  { %8166 = vmatmul.mubr.msk.f32.gmra.mrb[96].mxu1 %vm2818_vm3, %v11651_v27  ;;  %8252 = vmatmul.mubr.msk.f32.gmra.mrb[96].mxu0 %vm2818_vm3, %v11651_v27 }
 0x25d   :  { %8168 = vmatprep.mubr.msk.f32.mxu1 %vm10092_vm2, %v13214_v13  ;;  %8254 = vmatprep.mubr.msk.f32.mxu0 %vm10092_vm2, %v13214_v13 }
 0x25e   :  { %9446 = vmatpush3.bf16.msra.mxu0 %v11956_v42  ;;  %8278 = vmatpush3.msk.msra.mxu1 %vm2840_vm1, %v11848_v56  ;;  %v12229_v56 = vld [vmem:[%s13188_s3 + $0x208] sm:$0xf] }
 0x25f   :  { %8363 = vmatprep.subr.mxu0 %v13214_v13  ;;  %9417 = vmatprep.subr.bf16.mxu1 %v13215_v49 }
 0x260   :  { %8169 = vmatmul.mubr.msk.f32.gmra.mrb[104].mxu1 %vm2818_vm3, %v11674_v24  ;;  %8255 = vmatmul.mubr.msk.f32.gmra.mrb[108].mxu0 %vm2818_vm3, %v11674_v24 }
 0x261   :  { %8279 = vmatprep.mubr.msk.f32.mxu1 %vm10092_vm2, %v13214_v13  ;;  %8365 = vmatprep.mubr.msk.f32.mxu0 %vm10092_vm2, %v13214_v13 }
 0x262   :  { %8364 = vmatpush3.msk.msra.mxu0 %vm2840_vm1, %v11975_v4 }
 0x263   :  { %9447 = vmatprep.subr.bf16.mxu0 %v13215_v49 }
 0x264   :  { %8280 = vmatmul.mubr.msk.f32.vlgmr.msra.gmra.mrb[106].mxu1 %vm2818_vm3, %v11696_v21  ;;  %8366 = vmatmul.mubr.msk.f32.vlgmr.msra.gmra.mrb[110].mxu0 %vm2818_vm3, %v11696_v21 }
 0x265   :  { %9419 = vmatpush3.bf16.msra.mxu1 %v11868_v18  ;;  %8282 = vmatprep.mubr.msk.f32.mxu1 %vm10092_vm2, %v13214_v13  ;;  %v12249_v18 = vpack.c.bf16 %v6277_v34, %v6276_v37  ;;  %v6357_v37 = vld [vmem:[%s13188_s3 + $0x318] sm:$0xff]  ;;  %v6358_v34 = vld [vmem:[%s13188_s3 + $0x320] sm:$0xff] }
 0x266   :  { %8368 = vmatprep.mubr.msk.f32.mxu0 %vm10092_vm2, %v13214_v13  ;;  %9420 = vmatprep.subr.bf16.mxu1 %v13215_v49 }
 0x267   :  { %9449 = vmatpush3.bf16.msra.mxu0 %v11995_v15 }
 0x268   :  { %8283 = vmatmul.mubr.msk.f32.gmra.mrb[88].mxu1 %vm2818_vm3, %v11733_v22  ;;  %8369 = vmatmul.mubr.msk.f32.gmra.mrb[88].mxu0 %vm2818_vm3, %v11733_v22 }
 0x269   :  { %9422 = vmatpush3.bf16.msra.mxu1 %v11897_v9  ;;  %8285 = vmatprep.mubr.msk.f32.mxu1 %vm10092_vm2, %v13214_v13  ;;  %v12278_v9 = vpack.c.bf16 %v6279_v2, %v6278_v38  ;;  %v6359_v2 = vld [vmem:[%s13188_s3 + $0x328] sm:$0xff] }
 0x26a   :  { %8371 = vmatprep.mubr.msk.f32.mxu0 %vm10092_vm2, %v13214_v13  ;;  %9423 = vmatprep.subr.bf16.mxu1 %v13215_v49 }
 0x26b   :  { %9450 = vmatprep.subr.bf16.mxu0 %v13215_v49 }
 0x26c   :  { %8286 = vmatmul.mubr.msk.f32.gmra.mrb[90].mxu1 %vm2818_vm3, %v11753_v63  ;;  %8372 = vmatmul.mubr.msk.f32.gmra.mrb[90].mxu0 %vm2818_vm3, %v11753_v63 }
 0x26d   :  { %8288 = vmatprep.mubr.msk.f32.mxu1 %vm10092_vm2, %v13214_v13  ;;  %9425 = vmatpush3.bf16.msra.mxu1 %v11916_v39  ;;  %v12297_v39 = vpack.c.bf16 %v6281_v33, %v6280_v51 }
 0x26e   :  { %8374 = vmatprep.mubr.msk.f32.mxu0 %vm10092_vm2, %v13214_v13  ;;  %9452 = vmatpush3.bf16.msra.mxu0 %v12024_v40 }
 0x26f   :  { %9426 = vmatprep.subr.bf16.mxu1 %v13215_v49  ;;  %9453 = vmatprep.subr.bf16.mxu0 %v13215_v49 }
 0x270   :  { %8289 = vmatmul.mubr.msk.f32.gmra.mrb[92].mxu1 %vm2818_vm3, %v11777_v53  ;;  %8375 = vmatmul.mubr.msk.f32.gmra.mrb[92].mxu0 %vm2818_vm3, %v11777_v53 }
 0x271   :  { %8291 = vmatprep.mubr.msk.f32.mxu1 %vm10092_vm2, %v13214_v13  ;;  %9428 = vmatpush3.bf16.msra.mxu1 %v11936_v26  ;;  %v12317_v26 = vpack.c.bf16 %v6283_v60, %v6282_v48  ;;  %v6361_v48 = vld [vmem:[%s13188_s3 + $0x338] sm:$0xff]  ;;  %v6362_v60 = vld [vmem:[%s13188_s3 + $0x340] sm:$0xff] }
 0x272   :  { %8377 = vmatprep.mubr.msk.f32.mxu0 %vm10092_vm2, %v13214_v13  ;;  %9455 = vmatpush3.bf16.msra.mxu0 %v12043_v52 }
 0x273   :  { %9456 = vmatprep.subr.bf16.mxu0 %v13215_v49  ;;  %9429 = vmatprep.subr.bf16.mxu1 %v13215_v49 }
 0x274   :  { %8292 = vmatmul.mubr.msk.f32.gmra.mrb[94].mxu1 %vm2818_vm3, %v11798_v36  ;;  %8378 = vmatmul.mubr.msk.f32.gmra.mrb[94].mxu0 %vm2818_vm3, %v11798_v36 }
 0x275   :  { %8294 = vmatprep.mubr.msk.f32.mxu1 %vm10092_vm2, %v13214_v13  ;;  %8380 = vmatprep.mubr.msk.f32.mxu0 %vm10092_vm2, %v13214_v13 }
 0x276   :  { %9458 = vmatpush3.bf16.msra.mxu0 %v12063_v0  ;;  %9431 = vmatpush3.bf16.msra.mxu1 %v11956_v42  ;;  %v12337_v42 = vpack.c.bf16 %v6285_v16, %v6284_v5  ;;  %v9604_v5 = vpack.c.bf16 %v6362_v60, %v6361_v48  ;;  %v6363_v16 = vld [vmem:[%s13188_s3 + $0x348] sm:$0xff] }
 0x277   :  { %9459 = vmatprep.subr.bf16.mxu0 %v13215_v49  ;;  %8320 = vmatprep.subr.mxu1 %v13214_v13 }
 0x278   :  { %8295 = vmatmul.mubr.msk.f32.gmra.mrb[96].mxu1 %vm2818_vm3, %v11823_v59  ;;  %8381 = vmatmul.mubr.msk.f32.gmra.mrb[96].mxu0 %vm2818_vm3, %v11823_v59 }
 0x279   :  { %8297 = vmatprep.mubr.msk.f32.mxu1 %vm10092_vm2, %v13214_v13  ;;  %8383 = vmatprep.mubr.msk.f32.mxu0 %vm10092_vm2, %v13214_v13 }
 0x27a   :  { %9461 = vmatpush3.bf16.msra.mxu0 %v12083_v57  ;;  %8321 = vmatpush3.msk.msra.mxu1 %vm2840_vm1, %v11975_v4  ;;  %v12356_v4 = vld [vmem:[%s13188_s3 + $0x260] sm:$0xf] }
 0x27b   :  { %8406 = vmatprep.subr.mxu0 %v13214_v13  ;;  %9462 = vmatprep.subr.bf16.mxu1 %v13215_v49 }
 0x27c   :  { %8298 = vmatmul.mubr.msk.f32.gmra.mrb[108].mxu1 %vm2818_vm3, %v11839_v8  ;;  %8384 = vmatmul.mubr.msk.f32.gmra.mrb[112].mxu0 %vm2818_vm3, %v11839_v8 }
 0x27d   :  { %8322 = vmatprep.mubr.msk.f32.mxu1 %vm10092_vm2, %v13214_v13  ;;  %8408 = vmatprep.mubr.msk.f32.mxu0 %vm10092_vm2, %v13214_v13 }
 0x27e   :  { %8407 = vmatpush3.msk.msra.mxu0 %vm2840_vm1, %v12102_v31 }
 0x27f   :  { %9477 = vmatprep.subr.bf16.mxu0 %v13215_v49 }
 0x280   :  { %8323 = vmatmul.mubr.msk.f32.vlgmr.msra.gmra.mrb[110].mxu1 %vm2818_vm3, %v11509_v32  ;;  %8409 = vmatmul.mubr.msk.f32.vlgmr.msra.gmra.mrb[114].mxu0 %vm2818_vm3, %v11509_v32 }
 0x281   :  { %9464 = vmatpush3.bf16.msra.mxu1 %v11995_v15  ;;  %8325 = vmatprep.mubr.msk.f32.mxu1 %vm10092_vm2, %v13214_v13  ;;  %v12376_v15 = vpack.c.bf16 %v6304_v41, %v6303_v14  ;;  %v6365_v14 = vld [vmem:[%s13188_s3 + $0x358] sm:$0xff]  ;;  %v6366_v41 = vld [vmem:[%s13188_s3 + $0x360] sm:$0xff] }
 0x282   :  { %8411 = vmatprep.mubr.msk.f32.mxu0 %vm10092_vm2, %v13214_v13  ;;  %9465 = vmatprep.subr.bf16.mxu1 %v13215_v49 }
 0x283   :  { %9479 = vmatpush3.bf16.msra.mxu0 %v12122_v44 }
 0x284   :  { %8326 = vmatmul.mubr.msk.f32.gmra.mrb[112].mxu1 %vm2818_vm3, %v11533_v1  ;;  %8412 = vmatmul.mubr.msk.f32.gmra.mrb[116].mxu0 %vm2818_vm3, %v11533_v1 }
 0x285   :  { %9467 = vmatpush3.bf16.msra.mxu1 %v12024_v40  ;;  %8328 = vmatprep.mubr.msk.f32.mxu1 %vm10092_vm2, %v13214_v13  ;;  %v12405_v40 = vpack.c.bf16 %v6306_v7, %v6305_v61  ;;  %v6367_v61 = vld [vmem:[%s13188_s3 + $0x368] sm:$0xf] }
 0x286   :  { %8414 = vmatprep.mubr.msk.f32.mxu0 %vm10092_vm2, %v13214_v13  ;;  %9468 = vmatprep.subr.bf16.mxu1 %v13215_v49 }
 0x287   :  { %9480 = vmatprep.subr.bf16.mxu0 %v13215_v49 }
 0x288   :  { %8329 = vmatmul.mubr.msk.f32.gmra.mrb[88].mxu1 %vm2818_vm3, %v11561_v23  ;;  %8415 = vmatmul.mubr.msk.f32.gmra.mrb[88].mxu0 %vm2818_vm3, %v11561_v23 }
 0x289   :  { %8331 = vmatprep.mubr.msk.f32.mxu1 %vm10092_vm2, %v13214_v13  ;;  %8417 = vmatprep.mubr.msk.f32.mxu0 %vm10092_vm2, %v13214_v13 }
 0x28a   :  { %9470 = vmatpush3.bf16.msra.mxu1 %v12043_v52  ;;  %9482 = vmatpush3.bf16.msra.mxu0 %v12151_v20  ;;  %v12424_v52 = vpack.c.bf16 %v6308_v58, %v6307_v47 }
 0x28b   :  { %9471 = vmatprep.subr.bf16.mxu1 %v13215_v49  ;;  %9483 = vmatprep.subr.bf16.mxu0 %v13215_v49 }
 0x28c   :  { %8332 = vmatmul.mubr.msk.f32.gmra.mrb[90].mxu1 %vm2818_vm3, %v11593_v46  ;;  %8418 = vmatmul.mubr.msk.f32.gmra.mrb[90].mxu0 %vm2818_vm3, %v11593_v46 }
 0x28d   :  { %8334 = vmatprep.mubr.msk.f32.mxu1 %vm10092_vm2, %v13214_v13  ;;  %8420 = vmatprep.mubr.msk.f32.mxu0 %vm10092_vm2, %v13214_v13 }
 0x28e   :  { %9473 = vmatpush3.bf16.msra.mxu1 %v12063_v0  ;;  %9485 = vmatpush3.bf16.msra.mxu0 %v12170_v62  ;;  %v12444_v0 = vpack.c.bf16 %v6310_v25, %v6309_v45 }
 0x28f   :  { %9486 = vmatprep.subr.bf16.mxu0 %v13215_v49  ;;  %9474 = vmatprep.subr.bf16.mxu1 %v13215_v49 }
 0x290   :  { %8335 = vmatmul.mubr.msk.f32.gmra.mrb[92].mxu1 %vm2818_vm3, %v11625_v11  ;;  %8421 = vmatmul.mubr.msk.f32.gmra.mrb[92].mxu0 %vm2818_vm3, %v11625_v11 }
 0x291   :  { %8337 = vmatprep.mubr.msk.f32.mxu1 %vm10092_vm2, %v13214_v13  ;;  %8423 = vmatprep.mubr.msk.f32.mxu0 %vm10092_vm2, %v13214_v13 }
 0x292   :  { %9488 = vmatpush3.bf16.msra.mxu0 %v12190_v55  ;;  %9476 = vmatpush3.bf16.msra.mxu1 %v12083_v57  ;;  %v12464_v57 = vpack.c.bf16 %v6312_v17, %v6311_v10 }
 0x293   :  { %9489 = vmatprep.subr.bf16.mxu0 %v13215_v49  ;;  %8449 = vmatprep.subr.mxu1 %v13214_v13 }
 0x294   :  { %8338 = vmatmul.mubr.msk.f32.gmra.mrb[94].mxu1 %vm2818_vm3, %v11651_v27  ;;  %8424 = vmatmul.mubr.msk.f32.gmra.mrb[94].mxu0 %vm2818_vm3, %v11651_v27 }
 0x295   :  { %8340 = vmatprep.mubr.msk.f32.mxu1 %vm10092_vm2, %v13214_v13  ;;  %8426 = vmatprep.mubr.msk.f32.mxu0 %vm10092_vm2, %v13214_v13 }
 0x296   :  { %9491 = vmatpush3.bf16.msra.mxu0 %v12210_v19  ;;  %8450 = vmatpush3.msk.msra.mxu1 %vm2840_vm1, %v12102_v31  ;;  %v12483_v31 = vld [vmem:[%s13188_s3 + $0x2b8] sm:$0xf] }
 0x297   :  { %8492 = vmatprep.subr.mxu0 %v13214_v13  ;;  %9492 = vmatprep.subr.bf16.mxu1 %v13215_v49 }
 0x298   :  { %8341 = vmatmul.mubr.msk.f32.gmra.mrb[96].mxu1 %vm2818_vm3, %v11674_v24  ;;  %8427 = vmatmul.mubr.msk.f32.gmra.mrb[96].mxu0 %vm2818_vm3, %v11674_v24 }
 0x299   :  { %8451 = vmatprep.mubr.msk.f32.mxu1 %vm10092_vm2, %v13214_v13  ;;  %8494 = vmatprep.mubr.msk.f32.mxu0 %vm10092_vm2, %v13214_v13 }
 0x29a   :  { %8493 = vmatpush3.msk.msra.mxu0 %vm2840_vm1, %v12229_v56 }
 0x29b   :  { %9522 = vmatprep.subr.bf16.mxu0 %v13215_v49 }
 0x29c   :  { %8452 = vmatmul.mubr.msk.f32.vlgmr.msra.gmra.mrb[114].mxu1 %vm2818_vm3, %v11696_v21  ;;  %8495 = vmatmul.mubr.msk.f32.vlgmr.msra.gmra.mrb[118].mxu0 %vm2818_vm3, %v11509_v32 }
 0x29d   :  { %9494 = vmatpush3.bf16.msra.mxu1 %v12122_v44  ;;  %8454 = vmatprep.mubr.msk.f32.mxu1 %vm10092_vm2, %v13214_v13  ;;  %v12503_v44 = vpack.c.bf16 %v6331_v12, %v6330_v3 }
 0x29e   :  { %8497 = vmatprep.mubr.msk.f32.mxu0 %vm10092_vm2, %v13214_v13  ;;  %9495 = vmatprep.subr.bf16.mxu1 %v13215_v49 }
 0x29f   :  { %9524 = vmatpush3.bf16.msra.mxu0 %v12249_v18 }
 0x2a0   :  { %8455 = vmatmul.mubr.msk.f32.gmra.mrb[116].mxu1 %vm2818_vm3, %v11733_v22  ;;  %8498 = vmatmul.mubr.msk.f32.gmra.mrb[120].mxu0 %vm2818_vm3, %v11533_v1 }
 0x2a1   :  { %9497 = vmatpush3.bf16.msra.mxu1 %v12151_v20  ;;  %8457 = vmatprep.mubr.msk.f32.mxu1 %vm10092_vm2, %v13214_v13  ;;  %v12532_v20 = vpack.c.bf16 %v6333_v54, %v6332_v28 }
 0x2a2   :  { %8500 = vmatprep.mubr.msk.f32.mxu0 %vm10092_vm2, %v13214_v13  ;;  %9498 = vmatprep.subr.bf16.mxu1 %v13215_v49 }
 0x2a3   :  { %9525 = vmatprep.subr.bf16.mxu0 %v13215_v49 }
 0x2a4   :  { %8458 = vmatmul.mubr.msk.f32.gmra.mrb[88].mxu1 %vm2818_vm3, %v11753_v63  ;;  %8501 = vmatmul.mubr.msk.f32.gmra.mrb[122].mxu0 %vm2818_vm3, %v11561_v23 }
 0x2a5   :  { %8460 = vmatprep.mubr.msk.f32.mxu1 %vm10092_vm2, %v13214_v13  ;;  %8503 = vmatprep.mubr.msk.f32.mxu0 %vm10092_vm2, %v13214_v13 }
 0x2a6   :  { %9500 = vmatpush3.bf16.msra.mxu1 %v12170_v62  ;;  %9527 = vmatpush3.bf16.msra.mxu0 %v12278_v9  ;;  %v12551_v62 = vpack.c.bf16 %v6335_v35, %v6334_v29 }
 0x2a7   :  { %9501 = vmatprep.subr.bf16.mxu1 %v13215_v49  ;;  %9528 = vmatprep.subr.bf16.mxu0 %v13215_v49 }
 0x2a8   :  { %8461 = vmatmul.mubr.msk.f32.gmra.mrb[90].mxu1 %vm2818_vm3, %v11777_v53  ;;  %8504 = vmatmul.mubr.msk.f32.gmra.mrb[124].mxu0 %vm2818_vm3, %v11593_v46 }
 0x2a9   :  { %8463 = vmatprep.mubr.msk.f32.mxu1 %vm10092_vm2, %v13214_v13  ;;  %8506 = vmatprep.mubr.msk.f32.mxu0 %vm10092_vm2, %v13214_v13 }
 0x2aa   :  { %9503 = vmatpush3.bf16.msra.mxu1 %v12190_v55  ;;  %9530 = vmatpush3.bf16.msra.mxu0 %v12297_v39  ;;  %v12571_v55 = vpack.c.bf16 %v6337_v30, %v6336_v6 }
 0x2ab   :  { %9531 = vmatprep.subr.bf16.mxu0 %v13215_v49  ;;  %9504 = vmatprep.subr.bf16.mxu1 %v13215_v49 }
 0x2ac   :  { %8464 = vmatmul.mubr.msk.f32.gmra.mrb[92].mxu1 %vm2818_vm3, %v11798_v36  ;;  %8507 = vmatmul.mubr.msk.f32.gmra.mrb[126].mxu0 %vm2818_vm3, %v11625_v11 }
 0x2ad   :  { %8466 = vmatprep.mubr.msk.f32.mxu1 %vm10092_vm2, %v13214_v13  ;;  %8509 = vmatprep.mubr.msk.f32.mxu0 %vm10092_vm2, %v13214_v13 }
 0x2ae   :  { %9533 = vmatpush3.bf16.msra.mxu0 %v12317_v26  ;;  %9506 = vmatpush3.bf16.msra.mxu1 %v12210_v19  ;;  %v12591_v19 = vpack.c.bf16 %v6339_v50, %v6338_v43 }
 0x2af   :  { %9534 = vmatprep.subr.bf16.mxu0 %v13215_v49  ;;  %8535 = vmatprep.subr.mxu1 %v13214_v13 }
 0x2b0   :  { %8467 = vmatmul.mubr.msk.f32.gmra.mrb[94].mxu1 %vm2818_vm3, %v11823_v59  ;;  %8510 = vmatmul.mubr.msk.f32.gmra.mrb[128].mxu0 %vm2818_vm3, %v11651_v27 }
 0x2b1   :  { %8469 = vmatprep.mubr.msk.f32.mxu1 %vm10092_vm2, %v13214_v13  ;;  %8512 = vmatprep.mubr.msk.f32.mxu0 %vm10092_vm2, %v13214_v13 }
 0x2b2   :  { %9536 = vmatpush3.bf16.msra.mxu0 %v12337_v42  ;;  %8536 = vmatpush3.msk.msra.mxu1 %vm2840_vm1, %v12229_v56  ;;  %v12610_v56 = vld [vmem:[%s13188_s3 + $0x310] sm:$0xf] }
 0x2b3   :  { %8621 = vmatprep.subr.mxu0 %v13214_v13  ;;  %9507 = vmatprep.subr.bf16.mxu1 %v13215_v49 }
 0x2b4   :  { %8470 = vmatmul.mubr.msk.f32.gmra.mrb[96].mxu1 %vm2818_vm3, %v11839_v8  ;;  %8513 = vmatmul.mubr.msk.f32.gmra.mrb[130].mxu0 %vm2818_vm3, %v11674_v24 }
 0x2b5   :  { %8537 = vmatprep.mubr.msk.f32.mxu1 %vm10092_vm2, %v13214_v13  ;;  %8623 = vmatprep.mubr.msk.f32.mxu0 %vm10092_vm2, %v13214_v13 }
 0x2b6   :  { %8622 = vmatpush3.msk.msra.mxu0 %vm2840_vm1, %v12356_v4 }
 0x2b7   :  { %9537 = vmatprep.subr.bf16.mxu0 %v13215_v49 }
 0x2b8   :  { %8538 = vmatmul.mubr.msk.f32.vlgmr.msra.gmra.mrb[118].mxu1 %vm2818_vm3, %v11696_v21  ;;  %8624 = vmatmul.mubr.msk.f32.vlgmr.msra.gmra.mrb[118].mxu0 %vm2818_vm3, %v11696_v21 }
 0x2b9   :  { %9509 = vmatpush3.bf16.msra.mxu1 %v12249_v18  ;;  %8540 = vmatprep.mubr.msk.f32.mxu1 %vm10092_vm2, %v13214_v13  ;;  %v12630_v18 = vpack.c.bf16 %v6358_v34, %v6357_v37 }
 0x2ba   :  { %8626 = vmatprep.mubr.msk.f32.mxu0 %vm10092_vm2, %v13214_v13  ;;  %9510 = vmatprep.subr.bf16.mxu1 %v13215_v49 }
 0x2bb   :  { %9539 = vmatpush3.bf16.msra.mxu0 %v12376_v15 }
 0x2bc   :  { %8541 = vmatmul.mubr.msk.f32.gmra.mrb[120].mxu1 %vm2818_vm3, %v11733_v22  ;;  %8627 = vmatmul.mubr.msk.f32.gmra.mrb[120].mxu0 %vm2818_vm3, %v11733_v22 }
 0x2bd   :  { %9512 = vmatpush3.bf16.msra.mxu1 %v12278_v9  ;;  %8543 = vmatprep.mubr.msk.f32.mxu1 %vm10092_vm2, %v13214_v13  ;;  %v6360_v9 = vld [vmem:[%s13188_s3 + $0x330] sm:$0xff] }
 0x2be   :  { %8629 = vmatprep.mubr.msk.f32.mxu0 %vm10092_vm2, %v13214_v13  ;;  %9513 = vmatprep.subr.bf16.mxu1 %v13215_v49  ;;  %v9601_v33 = vpack.c.bf16 %v6360_v9, %v6359_v2  ;;  %v6385_v2 = vld [vmem:[%s13190_s5 + $0x50] sm:$0xff]  ;;  %v6386_v9 = vld [vmem:[%s13190_s5 + $0x58] sm:$0xff] }
 0x2bf   :  { %9540 = vmatprep.subr.bf16.mxu0 %v13215_v49 }
 0x2c0   :  { %8544 = vmatmul.mubr.msk.f32.gmra.mrb[122].mxu1 %vm2818_vm3, %v11753_v63  ;;  %8630 = vmatmul.mubr.msk.f32.gmra.mrb[122].mxu0 %vm2818_vm3, %v11753_v63 }
 0x2c1   :  { %8546 = vmatprep.mubr.msk.f32.mxu1 %vm10092_vm2, %v13214_v13  ;;  %9515 = vmatpush3.bf16.msra.mxu1 %v12297_v39 }
 0x2c2   :  { %8632 = vmatprep.mubr.msk.f32.mxu0 %vm10092_vm2, %v13214_v13  ;;  %9542 = vmatpush3.bf16.msra.mxu0 %v12405_v40 }
 0x2c3   :  { %9516 = vmatprep.subr.bf16.mxu1 %v13215_v49  ;;  %9543 = vmatprep.subr.bf16.mxu0 %v13215_v49 }
 0x2c4   :  { %8547 = vmatmul.mubr.msk.f32.gmra.mrb[124].mxu1 %vm2818_vm3, %v11777_v53  ;;  %8633 = vmatmul.mubr.msk.f32.gmra.mrb[124].mxu0 %vm2818_vm3, %v11777_v53 }
 0x2c5   :  { %8549 = vmatprep.mubr.msk.f32.mxu1 %vm10092_vm2, %v13214_v13  ;;  %9518 = vmatpush3.bf16.msra.mxu1 %v12317_v26 }
 0x2c6   :  { %8635 = vmatprep.mubr.msk.f32.mxu0 %vm10092_vm2, %v13214_v13  ;;  %9545 = vmatpush3.bf16.msra.mxu0 %v12424_v52 }
 0x2c7   :  { %9546 = vmatprep.subr.bf16.mxu0 %v13215_v49  ;;  %9519 = vmatprep.subr.bf16.mxu1 %v13215_v49 }
 0x2c8   :  { %8550 = vmatmul.mubr.msk.f32.gmra.mrb[126].mxu1 %vm2818_vm3, %v11798_v36  ;;  %8636 = vmatmul.mubr.msk.f32.gmra.mrb[126].mxu0 %vm2818_vm3, %v11798_v36 }
 0x2c9   :  { %8552 = vmatprep.mubr.msk.f32.mxu1 %vm10092_vm2, %v13214_v13  ;;  %8638 = vmatprep.mubr.msk.f32.mxu0 %vm10092_vm2, %v13214_v13 }
 0x2ca   :  { %9548 = vmatpush3.bf16.msra.mxu0 %v12444_v0  ;;  %9521 = vmatpush3.bf16.msra.mxu1 %v12337_v42  ;;  %v6364_v42 = vld [vmem:[%s13188_s3 + $0x350] sm:$0xff] }
 0x2cb   :  { %9549 = vmatprep.subr.bf16.mxu0 %v13215_v49  ;;  %8578 = vmatprep.subr.mxu1 %v13214_v13 }
 0x2cc   :  { %8553 = vmatmul.mubr.msk.f32.gmra.mrb[128].mxu1 %vm2818_vm3, %v11823_v59  ;;  %8639 = vmatmul.mubr.msk.f32.gmra.mrb[132].mxu0 %vm2818_vm3, %v11823_v59 }
 0x2cd   :  { %8555 = vmatprep.mubr.msk.f32.mxu1 %vm10092_vm2, %v13214_v13  ;;  %8641 = vmatprep.mubr.msk.f32.mxu0 %vm10092_vm2, %v13214_v13 }
 0x2ce   :  { %9551 = vmatpush3.bf16.msra.mxu0 %v12464_v57  ;;  %8579 = vmatpush3.msk.msra.mxu1 %vm2840_vm1, %v12356_v4  ;;  %v9607_v4 = vpack.c.bf16 %v6364_v42, %v6363_v16  ;;  %v5075_v16 = vld [vmem:[%s13190_s5 + $0x18] sm:$0xff] }
 0x2cf   :  { %8664 = vmatprep.subr.mxu0 %v13214_v13  ;;  %9552 = vmatprep.subr.bf16.mxu1 %v13215_v49 }
 0x2d0   :  { %8556 = vmatmul.mubr.msk.f32.gmra.mrb[130].mxu1 %vm2818_vm3, %v11839_v8  ;;  %8642 = vmatmul.mubr.msk.f32.gmra.mrb[134].mxu0 %vm2818_vm3, %v11839_v8 }
 0x2d1   :  { %8580 = vmatprep.mubr.msk.f32.mxu1 %vm10092_vm2, %v13214_v13  ;;  %8666 = vmatprep.mubr.msk.f32.mxu0 %vm10092_vm2, %v13214_v13 }
 0x2d2   :  { %8665 = vmatpush3.msk.msra.mxu0 %vm2840_vm1, %v12483_v31 }
 0x2d3   :  { %9582 = vmatprep.subr.bf16.mxu0 %v13215_v49 }
 0x2d4   :  { %8581 = vmatmul.mubr.msk.f32.vlgmr.msra.gmra.mrb[132].mxu1 %vm2818_vm3, %v11509_v32  ;;  %8667 = vmatmul.mubr.msk.f32.vlgmr.msra.gmra.mrb[136].mxu0 %vm2818_vm3, %v11509_v32 }
 0x2d5   :  { %9554 = vmatpush3.bf16.msra.mxu1 %v12376_v15  ;;  %8583 = vmatprep.mubr.msk.f32.mxu1 %vm10092_vm2, %v13214_v13  ;;  %v9610_v15 = vpack.c.bf16 %v6366_v41, %v6365_v14  ;;  %v6387_v14 = vld [vmem:[%s13190_s5 + $0x60] sm:$0xff]  ;;  %v6388_v41 = vld [vmem:[%s13190_s5 + $0x68] sm:$0xff] }
 0x2d6   :  { %8669 = vmatprep.mubr.msk.f32.mxu0 %vm10092_vm2, %v13214_v13  ;;  %9555 = vmatprep.subr.bf16.mxu1 %v13215_v49 }
 0x2d7   :  { %9584 = vmatpush3.bf16.msra.mxu0 %v12503_v44 }
 0x2d8   :  { %8584 = vmatmul.mubr.msk.f32.gmra.mrb[118].mxu1 %vm2818_vm3, %v11533_v1  ;;  %8670 = vmatmul.mubr.msk.f32.gmra.mrb[118].mxu0 %vm2818_vm3, %v11533_v1 }
 0x2d9   :  { %9557 = vmatpush3.bf16.msra.mxu1 %v12405_v40  ;;  %8586 = vmatprep.mubr.msk.f32.mxu1 %vm10092_vm2, %v13214_v13 }
 0x2da   :  { %8672 = vmatprep.mubr.msk.f32.mxu0 %vm10092_vm2, %v13214_v13  ;;  %9558 = vmatprep.subr.bf16.mxu1 %v13215_v49 }
 0x2db   :  { %9585 = vmatprep.subr.bf16.mxu0 %v13215_v49 }
 0x2dc   :  { %8587 = vmatmul.mubr.msk.f32.gmra.mrb[120].mxu1 %vm2818_vm3, %v11561_v23  ;;  %8673 = vmatmul.mubr.msk.f32.gmra.mrb[120].mxu0 %vm2818_vm3, %v11561_v23 }
 0x2dd   :  { %8589 = vmatprep.mubr.msk.f32.mxu1 %vm10092_vm2, %v13214_v13  ;;  %8675 = vmatprep.mubr.msk.f32.mxu0 %vm10092_vm2, %v13214_v13 }
 0x2de   :  { %9560 = vmatpush3.bf16.msra.mxu1 %v12424_v52  ;;  %9587 = vmatpush3.bf16.msra.mxu0 %v12532_v20 }
 0x2df   :  { %9561 = vmatprep.subr.bf16.mxu1 %v13215_v49  ;;  %9588 = vmatprep.subr.bf16.mxu0 %v13215_v49 }
 0x2e0   :  { %8590 = vmatmul.mubr.msk.f32.gmra.mrb[122].mxu1 %vm2818_vm3, %v11593_v46  ;;  %8676 = vmatmul.mubr.msk.f32.gmra.mrb[122].mxu0 %vm2818_vm3, %v11593_v46 }
 0x2e1   :  { %8592 = vmatprep.mubr.msk.f32.mxu1 %vm10092_vm2, %v13214_v13  ;;  %8678 = vmatprep.mubr.msk.f32.mxu0 %vm10092_vm2, %v13214_v13 }
 0x2e2   :  { %9563 = vmatpush3.bf16.msra.mxu1 %v12444_v0  ;;  %9590 = vmatpush3.bf16.msra.mxu0 %v12551_v62 }
 0x2e3   :  { %9591 = vmatprep.subr.bf16.mxu0 %v13215_v49  ;;  %9564 = vmatprep.subr.bf16.mxu1 %v13215_v49 }
 0x2e4   :  { %8593 = vmatmul.mubr.msk.f32.gmra.mrb[124].mxu1 %vm2818_vm3, %v11625_v11  ;;  %8679 = vmatmul.mubr.msk.f32.gmra.mrb[124].mxu0 %vm2818_vm3, %v11625_v11 }
 0x2e5   :  { %8595 = vmatprep.mubr.msk.f32.mxu1 %vm10092_vm2, %v13214_v13  ;;  %8681 = vmatprep.mubr.msk.f32.mxu0 %vm10092_vm2, %v13214_v13 }
 0x2e6   :  { %9593 = vmatpush3.bf16.msra.mxu0 %v12571_v55  ;;  %9566 = vmatpush3.bf16.msra.mxu1 %v12464_v57 }
 0x2e7   :  { %9594 = vmatprep.subr.bf16.mxu0 %v13215_v49  ;;  %8707 = vmatprep.subr.mxu1 %v13214_v13 }
 0x2e8   :  { %8596 = vmatmul.mubr.msk.f32.gmra.mrb[126].mxu1 %vm2818_vm3, %v11651_v27  ;;  %8682 = vmatmul.mubr.msk.f32.gmra.mrb[126].mxu0 %vm2818_vm3, %v11651_v27 }
 0x2e9   :  { %8598 = vmatprep.mubr.msk.f32.mxu1 %vm10092_vm2, %v13214_v13  ;;  %8684 = vmatprep.mubr.msk.f32.mxu0 %vm10092_vm2, %v13214_v13 }
 0x2ea   :  { %9596 = vmatpush3.bf16.msra.mxu0 %v12591_v19  ;;  %8708 = vmatpush3.msk.msra.mxu1 %vm2840_vm1, %v12483_v31 }
 0x2eb   :  { %8793 = vmatprep.subr.mxu0 %v13214_v13  ;;  %9567 = vmatprep.subr.bf16.mxu1 %v13215_v49 }
 0x2ec   :  { %8599 = vmatmul.mubr.msk.f32.gmra.mrb[134].mxu1 %vm2818_vm3, %v11674_v24  ;;  %8685 = vmatmul.mubr.msk.f32.gmra.mrb[138].mxu0 %vm2818_vm3, %v11674_v24 }
 0x2ed   :  { %8709 = vmatprep.mubr.msk.f32.mxu1 %vm10092_vm2, %v13214_v13  ;;  %8795 = vmatprep.mubr.msk.f32.mxu0 %vm10092_vm2, %v13214_v13 }
 0x2ee   :  { %8794 = vmatpush3.msk.msra.mxu0 %vm2840_vm1, %v12610_v56 }
 0x2ef   :  { %9597 = vmatprep.subr.bf16.mxu0 %v13215_v49 }
 0x2f0   :  { %8710 = vmatmul.mubr.msk.f32.vlgmr.msra.gmra.mrb[136].mxu1 %vm2818_vm3, %v11696_v21  ;;  %8796 = vmatmul.mubr.msk.f32.vlgmr.msra.gmra.mrb[140].mxu0 %vm2818_vm3, %v11696_v21 }
 0x2f1   :  { %9569 = vmatpush3.bf16.msra.mxu1 %v12503_v44  ;;  %8712 = vmatprep.mubr.msk.f32.mxu1 %vm10092_vm2, %v13214_v13 }
 0x2f2   :  { %8798 = vmatprep.mubr.msk.f32.mxu0 %vm10092_vm2, %v13214_v13  ;;  %9570 = vmatprep.subr.bf16.mxu1 %v13215_v49 }
 0x2f3   :  { %v2935_v38 = vpop.f32.mrb[98].mxu0  ;;  %9599 = vmatpush3.bf16.msra.mxu0 %v12630_v18 }
 0x2f4   :  { %v8081_v51 = vpop.f32.mrb[99].mxu0  ;;  %8713 = vmatmul.mubr.msk.f32.gmra.mrb[118].mxu1 %vm2818_vm3, %v11733_v22  ;;  %8799 = vmatmul.mubr.msk.f32.gmra.mrb[118].mxu0 %vm2818_vm3, %v11733_v22 }
 0x2f5   :  { %9572 = vmatpush3.bf16.msra.mxu1 %v12532_v20  ;;  %8715 = vmatprep.mubr.msk.f32.mxu1 %vm10092_vm2, %v13214_v13  ;;  %v5072_v51 = vld [vmem:[%s13190_s5] sm:$0xff] }
 0x2f6   :  { %8801 = vmatprep.mubr.msk.f32.mxu0 %vm10092_vm2, %v13214_v13  ;;  %9573 = vmatprep.subr.bf16.mxu1 %v13215_v49 }
 0x2f7   :  { %v2939_v39 = vpop.f32.mrb[100].mxu0  ;;  %9600 = vmatprep.subr.bf16.mxu0 %v13215_v49 }
 0x2f8   :  { %v8084_v26 = vpop.f32.mrb[101].mxu0  ;;  %8716 = vmatmul.mubr.msk.f32.gmra.mrb[120].mxu1 %vm2818_vm3, %v11753_v63  ;;  %8802 = vmatmul.mubr.msk.f32.gmra.mrb[120].mxu0 %vm2818_vm3, %v11753_v63  ;;  %v5073_v39 = vld [vmem:[%s13190_s5 + $0x8] sm:$0xff] }
 0x2f9   :  { %8718 = vmatprep.mubr.msk.f32.mxu1 %vm10092_vm2, %v13214_v13  ;;  %9575 = vmatpush3.bf16.msra.mxu1 %v12551_v62  ;;  %v9643_v60 = vpack.c.bf16 %v5073_v39, %v5072_v51 }
 0x2fa   :  { %8804 = vmatprep.mubr.msk.f32.mxu0 %vm10092_vm2, %v13214_v13  ;;  %9602 = vmatpush3.bf16.msra.mxu0 %v9601_v33 }
 0x2fb   :  { %9576 = vmatprep.subr.bf16.mxu1 %v13215_v49  ;;  %9603 = vmatprep.subr.bf16.mxu0 %v13215_v49 }
 0x2fc   :  { %8719 = vmatmul.mubr.msk.f32.gmra.mrb[122].mxu1 %vm2818_vm3, %v11777_v53  ;;  %8805 = vmatmul.mubr.msk.f32.gmra.mrb[122].mxu0 %vm2818_vm3, %v11777_v53 }
 0x2fd   :  { %8721 = vmatprep.mubr.msk.f32.mxu1 %vm10092_vm2, %v13214_v13  ;;  %9578 = vmatpush3.bf16.msra.mxu1 %v12571_v55 }
 0x2fe   :  { %8807 = vmatprep.mubr.msk.f32.mxu0 %vm10092_vm2, %v13214_v13  ;;  %9605 = vmatpush3.bf16.msra.mxu0 %v9604_v5 }
 0x2ff   :  { %9606 = vmatprep.subr.bf16.mxu0 %v13215_v49  ;;  %9579 = vmatprep.subr.bf16.mxu1 %v13215_v49 }
 0x300   :  { %8722 = vmatmul.mubr.msk.f32.gmra.mrb[124].mxu1 %vm2818_vm3, %v11798_v36  ;;  %8808 = vmatmul.mubr.msk.f32.gmra.mrb[124].mxu0 %vm2818_vm3, %v11798_v36 }
 0x301   :  { %8724 = vmatprep.mubr.msk.f32.mxu1 %vm10092_vm2, %v13214_v13  ;;  %8810 = vmatprep.mubr.msk.f32.mxu0 %vm10092_vm2, %v13214_v13 }
 0x302   :  { %9608 = vmatpush3.bf16.msra.mxu0 %v9607_v4  ;;  %9581 = vmatpush3.bf16.msra.mxu1 %v12591_v19 }
 0x303   :  { %9609 = vmatprep.subr.bf16.mxu0 %v13215_v49  ;;  %8750 = vmatprep.subr.mxu1 %v13214_v13 }
 0x304   :  { %8725 = vmatmul.mubr.msk.f32.gmra.mrb[126].mxu1 %vm2818_vm3, %v11823_v59  ;;  %8811 = vmatmul.mubr.msk.f32.gmra.mrb[126].mxu0 %vm2818_vm3, %v11823_v59 }
 0x305   :  { %8727 = vmatprep.mubr.msk.f32.mxu1 %vm10092_vm2, %v13214_v13  ;;  %8813 = vmatprep.mubr.msk.f32.mxu0 %vm10092_vm2, %v13214_v13 }
 0x306   :  { %9611 = vmatpush3.bf16.msra.mxu0 %v9610_v15  ;;  %8751 = vmatpush3.msk.msra.mxu1 %vm2840_vm1, %v12610_v56 }
 0x307   :  { %8836 = vmatprep.subr.mxu0 %v13214_v13  ;;  %9612 = vmatprep.subr.bf16.mxu1 %v13215_v49 }
 0x308   :  { %8728 = vmatmul.mubr.msk.f32.gmra.mrb[138].mxu1 %vm2818_vm3, %v11839_v8  ;;  %8814 = vmatmul.mubr.msk.f32.gmra.mrb[142].mxu0 %vm2818_vm3, %v11839_v8 }
 0x309   :  { %8752 = vmatprep.mubr.msk.f32.mxu1 %vm10092_vm2, %v13214_v13  ;;  %8838 = vmatprep.mubr.msk.f32.mxu0 %vm10092_vm2, %v13214_v13 }
 0x30a   :  { %8837 = vmatpush3.msk.msra.mxu0 %vm2840_vm1, %v6367_v61 }
 0x30b   :  { %9627 = vmatprep.subr.bf16.mxu0 %v13215_v49 }
 0x30c   :  { %8753 = vmatmul.mubr.msk.f32.vlgmr.msra.gmra.mrb[140].mxu1 %vm2818_vm3, %v11509_v32  ;;  %8839 = vmatmul.mubr.msk.f32.vlgmr.msra.gmra.mrb[144].mxu0 %vm2818_vm3, %v11509_v32 }
 0x30d   :  { %9614 = vmatpush3.bf16.msra.mxu1 %v12630_v18  ;;  %8755 = vmatprep.mubr.msk.f32.mxu1 %vm10092_vm2, %v13214_v13 }
 0x30e   :  { %8841 = vmatprep.mubr.msk.f32.mxu0 %vm10092_vm2, %v13214_v13  ;;  %9615 = vmatprep.subr.bf16.mxu1 %v13215_v49 }
 0x310   :  { %8756 = vmatmul.mubr.msk.f32.gmra.mrb[142].mxu1 %vm2818_vm3, %v11533_v1  ;;  %8842 = vmatmul.mubr.msk.f32.gmra.mrb[146].mxu0 %vm2818_vm3, %v11533_v1 }
 0x311   :  { %9617 = vmatpush3.bf16.msra.mxu1 %v9601_v33  ;;  %8758 = vmatprep.mubr.msk.f32.mxu1 %vm10092_vm2, %v13214_v13  ;;  %v9628_v33 = vpack.c.bf16 %v6386_v9, %v6385_v2 }
 0x312   :  { %8844 = vmatprep.mubr.msk.f32.mxu0 %vm10092_vm2, %v13214_v13  ;;  %9618 = vmatprep.subr.bf16.mxu1 %v13215_v49 }
 0x313   :  { %v3054_v32 = vpop.f32.mrb[98].mxu1  ;;  %v3270_v7 = vpop.f32.mrb[102].mxu0  ;;  %9629 = vmatpush3.bf16.msra.mxu0 %v9628_v33 }
 0x314   :  { %v8124_v40 = vpop.f32.mrb[99].mxu1  ;;  %v8210_v47 = vpop.f32.mrb[103].mxu0  ;;  %8759 = vmatmul.mubr.msk.f32.gmra.mrb[118].mxu1 %vm2818_vm3, %v11561_v23  ;;  %8845 = vmatmul.mubr.msk.f32.gmra.mrb[118].mxu0 %vm2818_vm3, %v11561_v23  ;;  %v5076_v32 = vld [vmem:[%s13190_s5 + $0x20] sm:$0xff]  ;;  %v5077_v7 = vld [vmem:[%s13190_s5 + $0x28] sm:$0xff] }
 0x315   :  { %8761 = vmatprep.mubr.msk.f32.mxu1 %vm10092_vm2, %v13214_v13  ;;  %8847 = vmatprep.mubr.msk.f32.mxu0 %vm10092_vm2, %v13214_v13  ;;  %v9649_v40 = vpack.c.bf16 %v5077_v7, %v5076_v32 }
 0x316   :  { %9620 = vmatpush3.bf16.msra.mxu1 %v9604_v5  ;;  %9630 = vmatprep.subr.bf16.mxu0 %v13215_v49  ;;  %v5074_v5 = vld [vmem:[%s13190_s5 + $0x10] sm:$0xff] }
 0x317   :  { %v3058_v1 = vpop.f32.mrb[100].mxu1  ;;  %v3274_v58 = vpop.f32.mrb[104].mxu0  ;;  %9621 = vmatprep.subr.bf16.mxu1 %v13215_v49  ;;  %v9646_v42 = vpack.c.bf16 %v5075_v16, %v5074_v5 }
 0x318   :  { %v8127_v52 = vpop.f32.mrb[101].mxu1  ;;  %v8213_v45 = vpop.f32.mrb[105].mxu0  ;;  %8762 = vmatmul.mubr.msk.f32.gmra.mrb[120].mxu1 %vm2818_vm3, %v11593_v46  ;;  %8848 = vmatmul.mubr.msk.f32.gmra.mrb[120].mxu0 %vm2818_vm3, %v11593_v46  ;;  %v6389_v58 = vld [vmem:[%s13190_s5 + $0x70] sm:$0xff] }
 0x319   :  { %8764 = vmatprep.mubr.msk.f32.mxu1 %vm10092_vm2, %v13214_v13  ;;  %8850 = vmatprep.mubr.msk.f32.mxu0 %vm10092_vm2, %v13214_v13  ;;  %v6390_v52 = vld [vmem:[%s13190_s5 + $0x78] sm:$0xff] }
 0x31a   :  { %9623 = vmatpush3.bf16.msra.mxu1 %v9607_v4  ;;  %v9634_v45 = vpack.c.bf16 %v6390_v52, %v6389_v58 }
 0x31b   :  { %v3142_v23 = vpop.f32.mrb[102].mxu1  ;;  %v3363_v25 = vpop.f32.mrb[106].mxu0  ;;  %9624 = vmatprep.subr.bf16.mxu1 %v13215_v49 }
 0x31c   :  { %v8152_v0 = vpop.f32.mrb[103].mxu1  ;;  %v8238_v10 = vpop.f32.mrb[107].mxu0  ;;  %8765 = vmatmul.mubr.msk.f32.gmra.mrb[122].mxu1 %vm2818_vm3, %v11625_v11  ;;  %8851 = vmatmul.mubr.msk.f32.gmra.mrb[122].mxu0 %vm2818_vm3, %v11625_v11  ;;  %v5078_v23 = vld [vmem:[%s13190_s5 + $0x30] sm:$0xff]  ;;  %v5079_v25 = vld [vmem:[%s13190_s5 + $0x38] sm:$0xff] }
 0x31d   :  { %8767 = vmatprep.mubr.msk.f32.mxu1 %vm10092_vm2, %v13214_v13  ;;  %8853 = vmatprep.mubr.msk.f32.mxu0 %vm10092_vm2, %v13214_v13  ;;  %v9652_v0 = vpack.c.bf16 %v5079_v25, %v5078_v23 }
 0x31e   :  { %9626 = vmatpush3.bf16.msra.mxu1 %v9610_v15 }
 0x31f   :  { %8879 = vmatprep.subr.mxu1 %v13214_v13 }
 0x320   :  { %8768 = vmatmul.mubr.msk.f32.gmra.mrb[124].mxu1 %vm2818_vm3, %v11651_v27  ;;  %8854 = vmatmul.mubr.msk.f32.gmra.mrb[124].mxu0 %vm2818_vm3, %v11651_v27 }
 0x321   :  { %8770 = vmatprep.mubr.msk.f32.mxu1 %vm10092_vm2, %v13214_v13  ;;  %8856 = vmatprep.mubr.msk.f32.mxu0 %vm10092_vm2, %v13214_v13 }
 0x322   :  { %8880 = vmatpush3.msk.msra.mxu1 %vm2840_vm1, %v6367_v61  ;;  %v9631_v61 = vpack.c.bf16 %v6388_v41, %v6387_v14 }
 0x323   :  { %9642 = vmatprep.subr.bf16.mxu1 %v13215_v49 }
 0x324   :  { %8771 = vmatmul.mubr.msk.f32.gmra.mrb[126].mxu1 %vm2818_vm3, %v11674_v24  ;;  %8857 = vmatmul.mubr.msk.f32.gmra.mrb[126].mxu0 %vm2818_vm3, %v11674_v24 }
 0x325   :  { %8881 = vmatprep.mubr.msk.f32.mxu1 %vm10092_vm2, %v13214_v13  ;;  %8922 = vmatprep.mubr.msk.f32.mxu0 %vm10092_vm2, %v13214_v13 }
 0x326   :  { %9632 = vmatpush3.bf16.msra.mxu0 %v9631_v61 }
 0x327   :  { %9633 = vmatprep.subr.bf16.mxu0 %v13215_v49 }
 0x328   :  { %8882 = vmatmul.mubr.msk.f32.vlgmr.msra.gmra.mrb[144].mxu1 %vm2818_vm3, %v11696_v21 }
 0x329   :  { %8884 = vmatprep.mubr.msk.f32.mxu1 %vm10092_vm2, %v13214_v13  ;;  %9644 = vmatpush3.bf16.msra.mxu1 %v9643_v60 }
 0x32a   :  { %9645 = vmatprep.subr.bf16.mxu1 %v13215_v49  ;;  %9635 = vmatpush3.bf16.msra.mxu0 %v9634_v45 }
 0x32b   :  { %9636 = vmatprep.subr.bf16.mxu0 %v13215_v49 }
 0x32c   :  { %8885 = vmatmul.mubr.msk.f32.gmra.mrb[146].mxu1 %vm2818_vm3, %v11733_v22 }
 0x32d   :  { %8887 = vmatprep.mubr.msk.f32.mxu1 %vm10092_vm2, %v13214_v13  ;;  %9647 = vmatpush3.bf16.msra.mxu1 %v9646_v42 }
 0x32e   :  { %9648 = vmatprep.subr.bf16.mxu1 %v13215_v49 }
 0x330   :  { %8888 = vmatmul.mubr.msk.f32.gmra.mrb[118].mxu1 %vm2818_vm3, %v11753_v63 }
 0x331   :  { %8890 = vmatprep.mubr.msk.f32.mxu1 %vm10092_vm2, %v13214_v13  ;;  %9650 = vmatpush3.bf16.msra.mxu1 %v9649_v40 }
 0x332   :  { %9651 = vmatprep.subr.bf16.mxu1 %v13215_v49 }
 0x333   :  { %v3171_v46 = vpop.f32.mrb[104].mxu1  ;;  %v3392_v11 = vpop.f32.mrb[108].mxu0 }
 0x334   :  { %v8170_v27 = vpop.f32.mrb[105].mxu1  ;;  %v8256_v24 = vpop.f32.mrb[109].mxu0  ;;  %8891 = vmatmul.mubr.msk.f32.gmra.mrb[120].mxu1 %vm2818_vm3, %v11777_v53 }
 0x335   :  { %8893 = vmatprep.mubr.msk.f32.mxu1 %vm10092_vm2, %v13214_v13  ;;  %9653 = vmatpush3.bf16.msra.mxu1 %v9652_v0  ;;  %v6391_v24 = vld [vmem:[%s13190_s5 + $0x80] sm:$0xff] }
 0x336   :  { %9654 = vmatprep.subr.bf16.mxu1 %v13215_v49 }
 0x337   :  { %v3466_v21 = vpop.f32.mrb[106].mxu1  ;;  %v3687_v22 = vpop.f32.mrb[110].mxu0 }
 0x338   :  { %v8281_v17 = vpop.f32.mrb[107].mxu1  ;;  %v8367_v57 = vpop.f32.mrb[111].mxu0  ;;  %8894 = vmatmul.mubr.msk.f32.gmra.mrb[122].mxu1 %vm2818_vm3, %v11798_v36  ;;  %v6392_v21 = vld [vmem:[%s13190_s5 + $0x88] sm:$0xff]  ;;  %v5080_v22 = vld [vmem:[%s13190_s5 + $0x40] sm:$0xff] }
 0x339   :  { %8896 = vmatprep.mubr.msk.f32.mxu1 %vm10092_vm2, %v13214_v13  ;;  %v9637_v17 = vpack.c.bf16 %v6392_v21, %v6391_v24  ;;  %v5081_v57 = vld [vmem:[%s13190_s5 + $0x48] sm:$0xff] }
 0x33b   :  { %9638 = vmatpush3.bf16.msra.mxu0 %v9637_v17 }
 0x33c   :  { %8897 = vmatmul.mubr.msk.f32.gmra.mrb[124].mxu1 %vm2818_vm3, %v11823_v59  ;;  %9639 = vmatprep.subr.bf16.mxu0 %v13215_v49 }
 0x33d   :  { %8899 = vmatprep.mubr.msk.f32.mxu1 %vm10092_vm2, %v13214_v13 }
 0x340   :  { %8900 = vmatmul.mubr.msk.f32.gmra.mrb[126].mxu1 %vm2818_vm3, %v11839_v8 }
 0x341   :  { %8945 = vmatprep.mubr.msk.f32.mxu1 %vm10092_vm2, %v13214_v13 }
 0x34f   :  { %v3495_v63 = vpop.f32.mrb[108].mxu1  ;;  %v3716_v53 = vpop.f32.mrb[112].mxu0 }
 0x350   :  { %v8299_v31 = vpop.f32.mrb[109].mxu1  ;;  %v8385_v3 = vpop.f32.mrb[113].mxu0 }
 0x351   :  { %v9655_v31 = vpack.c.bf16 %v5081_v57, %v5080_v22 }
 0x353   :  { %v3584_v36 = vpop.f32.mrb[110].mxu1  ;;  %v3805_v12 = vpop.f32.mrb[114].mxu0  ;;  %9656 = vmatpush3.bf16.msra.mxu1 %v9655_v31 }
 0x354   :  { %v8324_v44 = vpop.f32.mrb[111].mxu1  ;;  %v8410_v28 = vpop.f32.mrb[115].mxu0  ;;  %v6393_v12 = vld [vmem:[%s13190_s5 + $0x90] sm:$0xff]  ;;  %9672 = vmatprep.subr.bf16.mxu1 %v13215_v49 }
 0x355   :  { %v6394_v44 = vld [vmem:[%s13190_s5 + $0x98] sm:$0xff] }
 0x356   :  { %v9640_v28 = vpack.c.bf16 %v6394_v44, %v6393_v12 }
 0x357   :  { %v3588_v54 = vpop.f32.mrb[112].mxu1  ;;  %v3809_v20 = vpop.f32.mrb[116].mxu0 }
 0x358   :  { %v8327_v59 = vpop.f32.mrb[113].mxu1  ;;  %v8413_v29 = vpop.f32.mrb[117].mxu0  ;;  %9641 = vmatpush3.bf16.msra.mxu0 %v9640_v28 }
 0x359   :  { %9657 = vmatprep.subr.bf16.mxu0 %v13215_v49 }
 0x35b   :  { %v12828_v35 = vpop.f32.mrb[88].mxu0 }
 0x35c   :  { %v8416_v62 = vpop.f32.mrb[89].mxu0 }
 0x35f   :  { %v12830_v6 = vpop.f32.mrb[90].mxu0 }
 0x360   :  { %v8419_v8 = vpop.f32.mrb[91].mxu0 }
 0x363   :  { %v12832_v30 = vpop.f32.mrb[92].mxu0 }
 0x364   :  { %v8422_v55 = vpop.f32.mrb[93].mxu0 }
 0x367   :  { %v12834_v43 = vpop.f32.mrb[94].mxu0 }
 0x368   :  { %v8425_v50 = vpop.f32.mrb[95].mxu0 }
 0x36b   :  { %v12836_v19 = vpop.f32.mrb[96].mxu0 }
 0x36c   :  { %v8428_v56 = vpop.f32.mrb[97].mxu0 }
 0x36f   :  { %v3908_v37 = vpop.f32.mrb[114].mxu1 }
 0x370   :  { %v8453_v34 = vpop.f32.mrb[115].mxu1 }
 0x373   :  { %v3912_v18 = vpop.f32.mrb[116].mxu1 }
 0x374   :  { %v8456_v38 = vpop.f32.mrb[117].mxu1 }
 0x377   :  { %v12850_v48 = vpop.f32.mrb[88].mxu1 }
 0x378   :  { %v8459_v26 = vpop.f32.mrb[89].mxu1 }
 0x37b   :  { %v12860_v4 = vpop.f32.mrb[90].mxu1 }
 0x37c   :  { %v8462_v15 = vpop.f32.mrb[91].mxu1 }
 0x37f   :  { %v12875_v47 = vpop.f32.mrb[92].mxu1 }
 0x380   :  { %v8465_v1 = vpop.f32.mrb[93].mxu1 }
 0x383   :  { %v12891_v10 = vpop.f32.mrb[94].mxu1  ;;  %v4051_v46 = vpop.f32.mrb[128].mxu0 }
 0x384   :  { %v8468_v11 = vpop.f32.mrb[95].mxu1  ;;  %v8511_v27 = vpop.f32.mrb[129].mxu0 }
 0x387   :  { %v12907_v63 = vpop.f32.mrb[96].mxu1  ;;  %v4055_v53 = vpop.f32.mrb[130].mxu0 }
 0x388   :  { %v8471_v3 = vpop.f32.mrb[97].mxu1  ;;  %v8514_v36 = vpop.f32.mrb[131].mxu0 }
 0x39f   :  { %v4149_v54 = vpop.f32.mrb[128].mxu1  ;;  %v4365_v20 = vpop.f32.mrb[132].mxu0 }
 0x3a0   :  { %v8554_v59 = vpop.f32.mrb[129].mxu1  ;;  %v8640_v29 = vpop.f32.mrb[133].mxu0  ;;  %v6408_v54 = vld [vmem:[%s13190_s5 + $0xf0] sm:$0xff]  ;;  %v6409_v20 = vld [vmem:[%s13190_s5 + $0xf8] sm:$0xff] }
 0x3a3   :  { %v4153_v62 = vpop.f32.mrb[130].mxu1  ;;  %v4369_v8 = vpop.f32.mrb[134].mxu0 }
 0x3a4   :  { %v8557_v55 = vpop.f32.mrb[131].mxu1  ;;  %v8643_v50 = vpop.f32.mrb[135].mxu0  ;;  %v9673_v8 = vpack.c.bf16 %v6409_v20, %v6408_v54  ;;  %v6424_v54 = vld [vmem:[%s13190_s5 + $0x168] sm:$0xff] }
 0x3a5   :  { %v6397_v55 = vld [vmem:[%s13190_s5 + $0xa0] sm:$0xff] }
 0x3a7   :  { %v4237_v56 = vpop.f32.mrb[132].mxu1  ;;  %v4458_v37 = vpop.f32.mrb[136].mxu0 }
 0x3a8   :  { %v8582_v34 = vpop.f32.mrb[133].mxu1  ;;  %v8668_v18 = vpop.f32.mrb[137].mxu0  ;;  %v6398_v37 = vld [vmem:[%s13190_s5 + $0xa8] sm:$0xff] }
 0x3a9   :  { %v6410_v34 = vld [vmem:[%s13190_s5 + $0x100] sm:$0xff] }
 0x3bf   :  { %v4266_v38 = vpop.f32.mrb[134].mxu1  ;;  %v4487_v2 = vpop.f32.mrb[138].mxu0 }
 0x3c0   :  { %v8600_v9 = vpop.f32.mrb[135].mxu1  ;;  %v8686_v51 = vpop.f32.mrb[139].mxu0 }
 0x3c1   :  { %v9658_v51 = vpack.c.bf16 %v6398_v37, %v6397_v55  ;;  %v5504_v37 = vld [vmem:[%s13192_s7] sm:$0xff] }
 0x3c3   :  { %v4561_v33 = vpop.f32.mrb[136].mxu1  ;;  %v4782_v39 = vpop.f32.mrb[140].mxu0 }
 0x3c4   :  { %v8711_v60 = vpop.f32.mrb[137].mxu1  ;;  %v8797_v26 = vpop.f32.mrb[141].mxu0  ;;  %v6399_v39 = vld [vmem:[%s13190_s5 + $0xb0] sm:$0xff] }
 0x3db   :  { %v4590_v5 = vpop.f32.mrb[138].mxu1  ;;  %v4811_v16 = vpop.f32.mrb[142].mxu0 }
 0x3dc   :  { %v8729_v42 = vpop.f32.mrb[139].mxu1  ;;  %v8815_v14 = vpop.f32.mrb[143].mxu0  ;;  %v6412_v5 = vld [vmem:[%s13190_s5 + $0x110] sm:$0xff]  ;;  %v6413_v16 = vld [vmem:[%s13190_s5 + $0x118] sm:$0xff] }
 0x3df   :  { %v4679_v41 = vpop.f32.mrb[140].mxu1  ;;  %v4900_v15 = vpop.f32.mrb[144].mxu0 }
 0x3e0   :  { %v8754_v61 = vpop.f32.mrb[141].mxu1  ;;  %v8840_v32 = vpop.f32.mrb[145].mxu0 }
 0x3e1   :  { %v9679_v61 = vpack.c.bf16 %v6413_v16, %v6412_v5  ;;  %v6401_v32 = vld [vmem:[%s13190_s5 + $0xc0] sm:$0xff]  ;;  %v5514_v5 = vld [vmem:[%s13192_s7 + $0x50] sm:$0xff]  ;;  %v5515_v16 = vld [vmem:[%s13192_s7 + $0x58] sm:$0xff] }
 0x3e3   :  { %v4683_v7 = vpop.f32.mrb[142].mxu1  ;;  %v4904_v40 = vpop.f32.mrb[146].mxu0 }
 0x3e4   :  { %v8757_v1 = vpop.f32.mrb[143].mxu1  ;;  %v8843_v58 = vpop.f32.mrb[147].mxu0  ;;  %v6414_v40 = vld [vmem:[%s13190_s5 + $0x120] sm:$0xff] }
 0x3e5   :  { %v6415_v1 = vld [vmem:[%s13190_s5 + $0x128] sm:$0xff] }
 0x3e7   :  { %v4908_v52 = vpop.f32.mrb[118].mxu0 }
 0x3e8   :  { %v5040_v45 = vmax.f32 %v12828_v35, %v4908_v52  ;;  %v8846_v23 = vpop.f32.mrb[119].mxu0 }
 0x3eb   :  { %v4913_v25 = vpop.f32.mrb[120].mxu0 }
 0x3ec   :  { %v5041_v0 = vmax.f32 %v12830_v6, %v4913_v25  ;;  %v8849_v46 = vpop.f32.mrb[121].mxu0  ;;  %v9682_v25 = vpack.c.bf16 %v6415_v1, %v6414_v40  ;;  %v5599_v40 = vld [vmem:[%s13193_s9 + $0x8] sm:$0xff]  ;;  %v5600_v1 = vld [vmem:[%s13193_s9 + $0x10] sm:$0xff] }
 0x3ef   :  { %v4918_v11 = vpop.f32.mrb[122].mxu0 }
 0x3f0   :  { %v5042_v27 = vmax.f32 %v12832_v30, %v4918_v11  ;;  %v8852_v24 = vpop.f32.mrb[123].mxu0  ;;  %v12930_v30 = vld [vmem:[%s13191_s4] ss:$0 sm:$0xff]  ;;  %v6416_v11 = vld [vmem:[%s13190_s5 + $0x130] sm:$0xff] }
 0x3f3   :  { %v4923_v21 = vpop.f32.mrb[124].mxu0 }
 0x3f4   :  { %v5043_v22 = vmax.f32 %v12834_v43, %v4923_v21  ;;  %v8855_v17 = vpop.f32.mrb[125].mxu0 }
 0x3f5   :  { %v6406_v17 = vld [vmem:[%s13190_s5 + $0xe8] sm:$0xff] }
 0x3f7   :  { %v12922_v57 = vpop.f32.mrb[126].mxu0 }
 0x3f8   :  { %v5044_v53 = vmax.f32 %v12836_v19, %v12922_v57  ;;  %v8858_v31 = vpop.f32.mrb[127].mxu0 }
 0x3fb   :  { %v5003_v35 = vpop.f32.mrb[144].mxu1 }
 0x3fc   :  { %v8883_v3 = vpop.f32.mrb[145].mxu1  ;;  %v6419_v35 = vld [vmem:[%s13190_s5 + $0x140] sm:$0xff] }
 0x3fd   :  { %v6420_v3 = vld [vmem:[%s13190_s5 + $0x148] sm:$0xff] }
 0x3ff   :  { %v5007_v36 = vpop.f32.mrb[146].mxu1 }
 0x400   :  { %v8886_v12 = vpop.f32.mrb[147].mxu1  ;;  %v9688_v36 = vpack.c.bf16 %v6420_v3, %v6419_v35 }
 0x403   :  { %v5011_v6 = vpop.f32.mrb[118].mxu1 }
 0x404   :  { %v5045_v44 = vmax.f32 %v12850_v48, %v5011_v6  ;;  %v8889_v28 = vpop.f32.mrb[119].mxu1  ;;  %v6421_v6 = vld [vmem:[%s13190_s5 + $0x150] sm:$0xff] }
 0x406   :  { %v5050_v43 = vmax.f32 %v5040_v45, %v5045_v44  ;;  %v6422_v44 = vld [vmem:[%s13190_s5 + $0x158] sm:$0xff] }
 0x407   :  { %v5016_v59 = vpop.f32.mrb[120].mxu1  ;;  %v9691_v28 = vpack.c.bf16 %v6422_v44, %v6421_v6 }
 0x408   :  { %v5062_v29 = vadd.f32 %v12930_v30, %v5050_v43  ;;  %v5046_v48 = vmax.f32 %v12860_v4, %v5016_v59  ;;  %v8892_v62 = vpop.f32.mrb[121].mxu1  ;;  %v6411_v4 = vld [vmem:[%s13190_s5 + $0x108] sm:$0xff]  ;;  %v6423_v43 = vld [vmem:[%s13190_s5 + $0x160] sm:$0xff]  ;;  %v6425_v59 = vld [vmem:[%s13190_s5 + $0x170] sm:$0xff] }
 0x409   :  { %v9676_v33 = vpack.c.bf16 %v6411_v4, %v6410_v34  ;;  %v9694_v20 = vpack.c.bf16 %v6424_v54, %v6423_v43  ;;  %v6427_v62 = vld [vmem:[%s13190_s5 + $0x180] sm:$0xff]  ;;  %v5505_v34 = vld [vmem:[%s13192_s7 + $0x8] sm:$0xff]  ;;  %v5506_v4 = vld [vmem:[%s13192_s7 + $0x10] sm:$0xff] }
 0x40a   :  { %v5067_v50 = vmax.f32 %v5062_v29, 0.0  ;;  %v5051_v56 = vmax.f32 %v5041_v0, %v5046_v48  ;;  %v6403_v0 = vld [vmem:[%s13190_s5 + $0xd0] sm:$0xff]  ;;  %v6426_v29 = vld [vmem:[%s13190_s5 + $0x178] sm:$0xff] }
 0x40b   :  { %v5021_v18 = vpop.f32.mrb[122].mxu1  ;;  %v9697_v48 = vpack.c.bf16 %v6426_v29, %v6425_v59 }
 0x40c   :  { %v5063_v38 = vadd.f32 %v12930_v30, %v5051_v56  ;;  %v5047_v2 = vmax.f32 %v12875_v47, %v5021_v18  ;;  %v8895_v9 = vpop.f32.mrb[123].mxu1  ;;  %8946 = vmatmul.mubr.msk.f32.vlgmr.msra.gmra.mrb[148].mxu1 %vm5093_vm4, %v5067_v50  ;;  %v6400_v47 = vld [vmem:[%s13190_s5 + $0xb8] sm:$0xff] }
 0x40d   :  { %9674 = vmatpush3.bf16.msra.mxu1 %v9673_v8  ;;  %8991 = vmatprep.mubr.msk.f32.mxu1 %vm10092_vm2, %v13214_v13  ;;  %v9661_v15 = vpack.c.bf16 %v6400_v47, %v6399_v39  ;;  %v6428_v8 = vld [vmem:[%s13190_s5 + $0x188] sm:$0xff]  ;;  %v5510_v9 = vld [vmem:[%s13192_s7 + $0x30] sm:$0xff] }
 0x40e   :  { %v5068_v60 = vmax.f32 %v5063_v38, 0.0  ;;  %v5052_v26 = vmax.f32 %v5042_v27, %v5047_v2  ;;  %9675 = vmatprep.subr.bf16.mxu1 %v13215_v49  ;;  %v6417_v27 = vld [vmem:[%s13190_s5 + $0x138] sm:$0xff]  ;;  %v9700_v55 = vpack.c.bf16 %v6428_v8, %v6427_v62  ;;  %v5508_v38 = vld [vmem:[%s13192_s7 + $0x20] sm:$0xff]  ;;  %v5509_v2 = vld [vmem:[%s13192_s7 + $0x28] sm:$0xff] }
 0x40f   :  { %v5026_v42 = vpop.f32.mrb[124].mxu1  ;;  %v9685_v24 = vpack.c.bf16 %v6417_v27, %v6416_v11  ;;  %v5606_v27 = vld [vmem:[%s13193_s9 + $0x40] sm:$0xff] }
 0x410   :  { %v5048_v14 = vmax.f32 %v12891_v10, %v5026_v42  ;;  %v8898_v41 = vpop.f32.mrb[125].mxu1  ;;  %8923 = vmatmul.mubr.msk.f32.vlgmr.msra.gmra.mrb[148].mxu0 %vm5093_vm4, %v5068_v60  ;;  %v6402_v10 = vld [vmem:[%s13190_s5 + $0xc8] sm:$0xff]  ;;  %v5512_v60 = vld [vmem:[%s13192_s7 + $0x40] sm:$0xff]  ;;  %v9718_v42 = vpack.c.bf16 %v5515_v16, %v5514_v5 }
 0x411   :  { %9659 = vmatpush3.bf16.msra.mxu0 %v9658_v51  ;;  %9677 = vmatpush3.bf16.msra.mxu1 %v9676_v33  ;;  %v9664_v23 = vpack.c.bf16 %v6402_v10, %v6401_v32  ;;  %v9709_v51 = vpack.c.bf16 %v5509_v2, %v5508_v38  ;;  %v5511_v33 = vld [vmem:[%s13192_s7 + $0x38] sm:$0xff]  ;;  %v5517_v41 = vld [vmem:[%s13192_s7 + $0x68] sm:$0xff]  ;;  %v5598_v10 = vld [vmem:[%s13193_s9] sm:$0xff] }
 0x412   :  { %v5053_v7 = vmax.f32 %v5043_v22, %v5048_v14  ;;  %9660 = vmatprep.subr.bf16.mxu0 %v13215_v49  ;;  %9678 = vmatprep.subr.bf16.mxu1 %v13215_v49  ;;  %v6405_v22 = vld [vmem:[%s13190_s5 + $0xe0] sm:$0xff]  ;;  %v9712_v39 = vpack.c.bf16 %v5511_v33, %v5510_v9  ;;  %v5519_v32 = vld [vmem:[%s13192_s7 + $0x78] sm:$0xff] }
 0x413   :  { %v5031_v58 = vpop.f32.mrb[126].mxu1  ;;  %8968 = vmatprep.mubr.msk.f32.mxu0 %vm10092_vm2, %v13214_v13  ;;  %v9670_v57 = vpack.c.bf16 %v6406_v17, %v6405_v22  ;;  %v5516_v14 = vld [vmem:[%s13192_s7 + $0x60] sm:$0xff]  ;;  %v5609_v22 = vld [vmem:[%s13193_s9 + $0x58] sm:$0xff] }
 0x414   :  { %v5049_v52 = vmax.f32 %v12907_v63, %v5031_v58  ;;  %v8901_v45 = vpop.f32.mrb[127].mxu1  ;;  %v6404_v63 = vld [vmem:[%s13190_s5 + $0xd8] sm:$0xff]  ;;  %v5065_v21 = vadd.f32 %v12930_v30, %v5053_v7  ;;  %v9727_v58 = vpack.c.bf16 %v5599_v40, %v5598_v10  ;;  %v6432_v38 = vld [vmem:[%s13196_s10] ss:$0 sm:$0xff] }
 0x415   :  { %9662 = vmatpush3.bf16.msra.mxu0 %v9661_v15  ;;  %9680 = vmatpush3.bf16.msra.mxu1 %v9679_v61  ;;  %v9667_v19 = vpack.c.bf16 %v6404_v63, %v6403_v0  ;;  %v9721_v15 = vpack.c.bf16 %v5517_v41, %v5516_v14  ;;  %v5518_v61 = vld [vmem:[%s13192_s7 + $0x70] sm:$0xff]  ;;  %v5605_v63 = vld [vmem:[%s13193_s9 + $0x38] sm:$0xff] }
 0x416   :  { %v5054_v46 = vmax.f32 %v5044_v53, %v5049_v52  ;;  %9663 = vmatprep.subr.bf16.mxu0 %v13215_v49  ;;  %9681 = vmatprep.subr.bf16.mxu1 %v13215_v49  ;;  %v5064_v53 = vadd.f32 %v12930_v30, %v5052_v26  ;;  %v5070_v31 = vmax.f32 %v5065_v21, 0.0  ;;  %v5513_v26 = vld [vmem:[%s13192_s7 + $0x48] sm:$0xff]  ;;  %v9724_v7 = vpack.c.bf16 %v5519_v32, %v5518_v61  ;;  %v5601_v52 = vld [vmem:[%s13193_s9 + $0x18] sm:$0xff]  ;;  %v5608_v21 = vld [vmem:[%s13193_s9 + $0x50] sm:$0xff] }
 0x417   :  { %v9715_v47 = vpack.c.bf16 %v5513_v26, %v5512_v60  ;;  %v9730_v45 = vpack.c.bf16 %v5601_v52, %v5600_v1  ;;  %v9742_v17 = vpack.c.bf16 %v5609_v22, %v5608_v21 }
 0x418   :  { %v5069_v12 = vmax.f32 %v5064_v53, 0.0  ;;  %v5066_v50 = vadd.f32 %v12930_v30, %v5054_v46  ;;  %v9703_v30 = vpack.c.bf16 %v5505_v34, %v5504_v37  ;;  %v5604_v46 = vld [vmem:[%s13193_s9 + $0x30] sm:$0xff]  ;;  %v5611_v53 = vld [vmem:[%s13193_s9 + $0x68] sm:$0xff]  ;;  %v6431_v34 = vld [vmem:[%s13195_s8] ss:$0 sm:$0xff] }
 0x419   :  { %9665 = vmatpush3.bf16.msra.mxu0 %v9664_v23  ;;  %9683 = vmatpush3.bf16.msra.mxu1 %v9682_v25  ;;  %v5602_v23 = vld [vmem:[%s13193_s9 + $0x20] sm:$0xff]  ;;  %v5603_v25 = vld [vmem:[%s13193_s9 + $0x28] sm:$0xff]  ;;  %v9736_v11 = vpack.c.bf16 %v5605_v63, %v5604_v46 }
 0x41a   :  { %9666 = vmatprep.subr.bf16.mxu0 %v13215_v49  ;;  %9684 = vmatprep.subr.bf16.mxu1 %v13215_v49  ;;  %v5071_v56 = vmax.f32 %v5066_v50, 0.0  ;;  %v9733_v0 = vpack.c.bf16 %v5603_v25, %v5602_v23  ;;  %v5612_v50 = vld [vmem:[%s13193_s9 + $0x70] sm:$0xff] }
 0x41d   :  { %9668 = vmatpush3.bf16.msra.mxu0 %v9667_v19  ;;  %9686 = vmatpush3.bf16.msra.mxu1 %v9685_v24  ;;  %v5607_v19 = vld [vmem:[%s13193_s9 + $0x48] sm:$0xff] }
 0x41e   :  { %9669 = vmatprep.subr.bf16.mxu0 %v13215_v49  ;;  %9702 = vmatprep.subr.bf16.mxu1 %v13215_v49  ;;  %v9739_v24 = vpack.c.bf16 %v5607_v19, %v5606_v27 }
 0x420   :  { %8992 = vmatmul.mubr.msk.f32.vlgmr.msra.gmra.mrb[150].mxu1 %vm5093_vm4, %v5070_v31 }
 0x421   :  { %9671 = vmatpush3.bf16.msra.mxu0 %v9670_v57  ;;  %9049 = vmatprep.mubr.msk.f32.mxu1 %vm10092_vm2, %v13214_v13  ;;  %v5610_v57 = vld [vmem:[%s13193_s9 + $0x60] sm:$0xff] }
 0x422   :  { %9687 = vmatprep.subr.bf16.mxu0 %v13215_v49  ;;  %9704 = vmatpush3.bf16.msra.mxu1 %v9703_v30  ;;  %v9745_v31 = vpack.c.bf16 %v5611_v53, %v5610_v57 }
 0x423   :  { %9705 = vmatprep.subr.bf16.mxu1 %v13215_v49 }
 0x424   :  { %8969 = vmatmul.mubr.msk.f32.vlgmr.msra.gmra.mrb[150].mxu0 %vm5093_vm4, %v5069_v12 }
 0x425   :  { %9689 = vmatpush3.bf16.msra.mxu0 %v9688_v36  ;;  %9014 = vmatprep.mubr.msk.f32.mxu0 %vm10092_vm2, %v13214_v13 }
 0x426   :  { %9690 = vmatprep.subr.bf16.mxu0 %v13215_v49 }
 0x429   :  { %9692 = vmatpush3.bf16.msra.mxu0 %v9691_v28 }
 0x42a   :  { %9693 = vmatprep.subr.bf16.mxu0 %v13215_v49 }
 0x42d   :  { %9695 = vmatpush3.bf16.msra.mxu0 %v9694_v20 }
 0x42e   :  { %9696 = vmatprep.subr.bf16.mxu0 %v13215_v49 }
 0x431   :  { %9698 = vmatpush3.bf16.msra.mxu0 %v9697_v48  ;;  %v6430_v48 = vld [vmem:[%s13194_s6] ss:$0 sm:$0xff] }
 0x432   :  { %9699 = vmatprep.subr.bf16.mxu0 %v13215_v49 }
 0x435   :  { %9701 = vmatpush3.bf16.msra.mxu0 %v9700_v55 }
 0x436   :  { %9726 = vmatprep.subr.bf16.mxu0 %v13215_v49 }
 0x438   :  { %9015 = vmatmul.mubr.msk.f32.vlgmr.msra.gmra.mrb[152].mxu0 %vm5093_vm4, %v5071_v56  ;;  %v5613_v56 = vld [vmem:[%s13193_s9 + $0x78] sm:$0xff] }
 0x439   :  { %9084 = vmatprep.mubr.msk.f32.mxu0 %vm10092_vm2, %v13214_v13  ;;  %v5507_v13 = vld [vmem:[%s13192_s7 + $0x18] sm:$0xff]  ;;  %9728 = vmatpush3.bf16.msra.mxu0 %v9727_v58  ;;  %v9748_v37 = vpack.c.bf16 %v5613_v56, %v5612_v50 }
 0x43a   :  { %v9706_v18 = vpack.c.bf16 %v5507_v13, %v5506_v4  ;;  %9729 = vmatprep.subr.bf16.mxu0 %v13215_v49 }
 0x43c   :  { %9707 = vmatpush3.bf16.msra.mxu1 %v9706_v18 }
 0x43d   :  { %9708 = vmatprep.subr.bf16.mxu1 %v13215_v49  ;;  %9731 = vmatpush3.bf16.msra.mxu0 %v9730_v45 }
 0x43e   :  { %9732 = vmatprep.subr.bf16.mxu0 %v13215_v49 }
 0x440   :  { %9710 = vmatpush3.bf16.msra.mxu1 %v9709_v51 }
 0x441   :  { %9711 = vmatprep.subr.bf16.mxu1 %v13215_v49  ;;  %9734 = vmatpush3.bf16.msra.mxu0 %v9733_v0 }
 0x442   :  { %9735 = vmatprep.subr.bf16.mxu0 %v13215_v49 }
 0x444   :  { %9713 = vmatpush3.bf16.msra.mxu1 %v9712_v39 }
 0x445   :  { %9714 = vmatprep.subr.bf16.mxu1 %v13215_v49  ;;  %9737 = vmatpush3.bf16.msra.mxu0 %v9736_v11 }
 0x446   :  { %9738 = vmatprep.subr.bf16.mxu0 %v13215_v49 }
 0x448   :  { %9716 = vmatpush3.bf16.msra.mxu1 %v9715_v47 }
 0x449   :  { %9717 = vmatprep.subr.bf16.mxu1 %v13215_v49  ;;  %9740 = vmatpush3.bf16.msra.mxu0 %v9739_v24 }
 0x44a   :  { %9741 = vmatprep.subr.bf16.mxu0 %v13215_v49 }
 0x44c   :  { %9719 = vmatpush3.bf16.msra.mxu1 %v9718_v42 }
 0x44d   :  { %9720 = vmatprep.subr.bf16.mxu1 %v13215_v49  ;;  %9743 = vmatpush3.bf16.msra.mxu0 %v9742_v17 }
 0x44e   :  { %9744 = vmatprep.subr.bf16.mxu0 %v13215_v49 }
 0x450   :  { %9722 = vmatpush3.bf16.msra.mxu1 %v9721_v15 }
 0x451   :  { %9723 = vmatprep.subr.bf16.mxu1 %v13215_v49  ;;  %9746 = vmatpush3.bf16.msra.mxu0 %v9745_v31 }
 0x452   :  { %9747 = vmatprep.subr.bf16.mxu0 %v13215_v49 }
 0x454   :  { %9725 = vmatpush3.bf16.msra.mxu1 %v9724_v7 }
 0x455   :  { %9749 = vmatpush3.bf16.msra.mxu0 %v9748_v37 }
 0x4df   :  { %v5236_v35 = vpop.f32.mrb[148].mxu1 }
 0x4e0   :  { %v8947_v3 = vpop.f32.mrb[149].mxu1 }
 0x4e3   :  { %v5163_v36 = vpop.f32.mrb[148].mxu0 }
 0x4e4   :  { %v5237_v12 = vadd.f32 %v5236_v35, %v5163_v36  ;;  %v8924_v6 = vpop.f32.mrb[149].mxu0 }
 0x4f3   :  { %v5405_v44 = vpop.f32.mrb[150].mxu1 }
 0x4f4   :  { %v8993_v28 = vpop.f32.mrb[151].mxu1 }
 0x4f7   :  { %v5320_v43 = vpop.f32.mrb[150].mxu0 }
 0x4f8   :  { %v5324_v54 = vadd.f32 %v5320_v43, %v5237_v12  ;;  %v8970_v20 = vpop.f32.mrb[151].mxu0 }
 0x4fa   :  { %v5409_v59 = vadd.f32 %v5405_v44, %v5324_v54 }
 0x50b   :  { %v5490_v29 = vpop.f32.mrb[152].mxu0 }
 0x50c   :  { %v5494_v62 = vadd.f32 %v5490_v29, %v5409_v59  ;;  %v9016_v8 = vpop.f32.mrb[153].mxu0 }
 0x50e   :  { %v5502_v55 = vadd.f32 %v6430_v48, %v5494_v62 }
 0x510   :  { %v5503_v49 = vmax.f32 %v5502_v55, 0.0 }
 0x512   :  { %9050 = vmatmul.mubr.f32.vlgmr.msra.gmra.mrb[152].mxu1 %v5503_v49 }
 0x5e5   :  { %v5593_v30 = vpop.f32.mrb[152].mxu1 }
 0x5e6   :  { %v5594_v4 = vadd.f32 %v6431_v34, %v5593_v30  ;;  %v9051_v13 = vpop.f32.mrb[153].mxu1 }
 0x5e8   :  { %v5597_v18 = vmax.f32 %v5594_v4, 0.0 }
 0x5ea   :  { %9085 = vmatmul.mubr.f32.vlgmr.msra.gmra.mrb[154].mxu0 %v5597_v18 }
 0x6bd   :  { %v5687_v2 = vpop.f32.mrb[154].mxu0 }
 0x6be   :  { %v5688_v9 = vadd.f32 %v6432_v38, %v5687_v2  ;;  %v9086_v51 = vpop.f32.mrb[155].mxu0 }
 0x6c0   :  { %5691 = vst [vmem:[%s13197_s11] sm:$0xff] %v5688_v9 }

</bundles_post_ra>
